<compile_context>
chip_gen: v6e
topology: v6e:2x2x1
jax: 0.10.0
libtpu: 0.0.40
codegen_flags: <defaults>
</compile_context>

<pallas_src>
import jax
import jax.numpy as jnp
import numpy as np
from jax.experimental import pallas as pl
from jax.experimental.pallas import tpu as pltpu


# ------------------------------ small helpers --------------------------------
def _round_up(x, m):
    return (x + m - 1) // m * m


def _pick_time_chunk(T, max_chunk=16):
    """Largest divisor of T that is <= max_chunk (timesteps per grid step)."""
    for c in range(min(T, max_chunk), 0, -1):
        if T % c == 0:
            return c
    return 1


def _pick_row_tile(M, max_tile=512):
    """Row tile for the input-projection matmul (divides M, multiple of 8)."""
    if M <= max_tile:
        return M
    for c in range(max_tile - max_tile % 8, 7, -8):
        if M % c == 0:
            return c
    return M


def _vmem_limit(block_bytes, scratch_bytes=0):
    """Scoped-VMEM budget: double-buffered blocks + scratch + margin."""
    est = 2 * block_bytes + scratch_bytes + (4 << 20)
    return int(min(max(est, 16 << 20), 64 << 20))


# --------------------------- input projection kernel -------------------------
def _input_proj_kernel(x_ref, w_ref, b_ref, out_ref):
    # gates_x = x @ W_ih^T + (b_ih + b_hh); one big MXU matmul, not T tiny ones.
    out_ref[...] = (
        jnp.dot(x_ref[...], w_ref[...], preferred_element_type=jnp.float32)
        + b_ref[...]
    )


def input_projection(x_flat, w_ih_t, bias):
    """x_flat: (M, C), w_ih_t: (C, 4*H_pad), bias: (1, 4*H_pad) -> (M, 4*H_pad)."""
    M, C = x_flat.shape
    G = w_ih_t.shape[1]
    tm = _pick_row_tile(M)
    block_bytes = 4 * (tm * C + C * G + G + tm * G)
    return pl.pallas_call(
        _input_proj_kernel,
        out_shape=jax.ShapeDtypeStruct((M, G), jnp.float32),
        grid_spec=pltpu.PrefetchScalarGridSpec(
            num_scalar_prefetch=0,
            grid=(M // tm,),
            in_specs=[
                pl.BlockSpec((tm, C), lambda i: (i, 0)),
                pl.BlockSpec((C, G), lambda i: (0, 0)),
                pl.BlockSpec((1, G), lambda i: (0, 0)),
            ],
            out_specs=pl.BlockSpec((tm, G), lambda i: (i, 0)),
        ),
        compiler_params=pltpu.CompilerParams(
            dimension_semantics=("parallel",),
            vmem_limit_bytes=_vmem_limit(block_bytes),
        ),
    )(x_flat, w_ih_t, bias)


# ------------------------------ recurrent kernels -----------------------------
def _lstm_cell_update(gates, c_prev, H):
    # Gate blocks live at lane-aligned offsets k*H (H = H_pad, multiple of 128),
    # so these slices are free views (no XLU relayout).
    i_g = jax.nn.sigmoid(gates[:, 0 * H:1 * H])
    f_g = jax.nn.sigmoid(gates[:, 1 * H:2 * H])
    g_g = jnp.tanh(gates[:, 2 * H:3 * H])
    o_g = jax.nn.sigmoid(gates[:, 3 * H:4 * H])
    c_new = f_g * c_prev + i_g * g_g
    h_new = o_g * jnp.tanh(c_new)
    return h_new, c_new


def _lstm_seq_kernel(gx_ref, whh_ref, hseq_ref, h_scr, c_scr):
    """Intermediate layer: emits the full hidden sequence (lane-dense H_pad).

    gx_ref:   (T_CHUNK, B, 4H)  precomputed x-projection + bias
    whh_ref:  (H, 4H)           hidden->gates weight (transposed, gate-padded)
    hseq_ref: (T_CHUNK, B, H)   hidden states for this time chunk
    h_scr/c_scr: (B, H)         carried state in VMEM scratch
    """
    @pl.when(pl.program_id(0) == 0)
    def _():
        h_scr[...] = jnp.zeros_like(h_scr)
        c_scr[...] = jnp.zeros_like(c_scr)

    w_hh = whh_ref[...]          # hoisted: loaded once per grid step
    H = h_scr.shape[1]
    t_chunk = gx_ref.shape[0]

    def step(t, carry):
        gates = gx_ref[t] + jnp.dot(
            h_scr[...], w_hh, preferred_element_type=jnp.float32
        )
        h_new, c_new = _lstm_cell_update(gates, c_scr[...], H)
        h_scr[...] = h_new
        c_scr[...] = c_new
        hseq_ref[t] = h_new
        return carry

    jax.lax.fori_loop(0, t_chunk, step, 0, unroll=True)


def _lstm_last_kernel(gx_ref, whh_ref, wout_ref, bout_ref, out_ref, h_scr, c_scr):
    """Last layer: no (T,B,H) output; final Linear fused at the last timestep."""
    @pl.when(pl.program_id(0) == 0)
    def _():
        h_scr[...] = jnp.zeros_like(h_scr)
        c_scr[...] = jnp.zeros_like(c_scr)
        out_ref[...] = jnp.zeros_like(out_ref)

    w_hh = whh_ref[...]
    H = h_scr.shape[1]
    t_chunk = gx_ref.shape[0]

    def step(t, carry):
        gates = gx_ref[t] + jnp.dot(
            h_scr[...], w_hh, preferred_element_type=jnp.float32
        )
        h_new, c_new = _lstm_cell_update(gates, c_scr[...], H)
        h_scr[...] = h_new
        c_scr[...] = c_new
        return carry

    jax.lax.fori_loop(0, t_chunk, step, 0, unroll=True)

    @pl.when(pl.program_id(0) == pl.num_programs(0) - 1)
    def _():
        # Fused output_linear: (B,H)x(H,1) expressed as a VPU mul + lane reduce.
        out_ref[...] = (
            jnp.sum(h_scr[...] * wout_ref[...], axis=-1, keepdims=True)
            + bout_ref[...]
        )


def lstm_recurrence_seq(gx, w_hh_t):
    T, B, G = gx.shape
    H = w_hh_t.shape[0]
    tc = _pick_time_chunk(T)
    block_bytes = 4 * (tc * B * G + H * G + tc * B * H)
    scratch_bytes = 4 * 2 * B * H
    return pl.pallas_call(
        _lstm_seq_kernel,
        out_shape=jax.ShapeDtypeStruct((T, B, H), jnp.float32),
        grid_spec=pltpu.PrefetchScalarGridSpec(
            num_scalar_prefetch=0,
            grid=(T // tc,),
            in_specs=[
                pl.BlockSpec((tc, B, G), lambda i: (i, 0, 0)),
                pl.BlockSpec((H, G), lambda i: (0, 0)),
            ],
            out_specs=pl.BlockSpec((tc, B, H), lambda i: (i, 0, 0)),
            scratch_shapes=[
                pltpu.VMEM((B, H), jnp.float32),
                pltpu.VMEM((B, H), jnp.float32),
            ],
        ),
        compiler_params=pltpu.CompilerParams(
            dimension_semantics=("arbitrary",),  # recurrence: sequential in time
            vmem_limit_bytes=_vmem_limit(block_bytes, scratch_bytes),
        ),
    )(gx, w_hh_t)


def lstm_recurrence_last(gx, w_hh_t, w_out_row, b_out):
    T, B, G = gx.shape
    H = w_hh_t.shape[0]
    tc = _pick_time_chunk(T)
    block_bytes = 4 * (tc * B * G + H * G + H + 1 + B)
    scratch_bytes = 4 * 2 * B * H
    return pl.pallas_call(
        _lstm_last_kernel,
        out_shape=jax.ShapeDtypeStruct((B, 1), jnp.float32),
        grid_spec=pltpu.PrefetchScalarGridSpec(
            num_scalar_prefetch=0,
            grid=(T // tc,),
            in_specs=[
                pl.BlockSpec((tc, B, G), lambda i: (i, 0, 0)),
                pl.BlockSpec((H, G), lambda i: (0, 0)),
                pl.BlockSpec((1, H), lambda i: (0, 0)),
                pl.BlockSpec((1, 1), lambda i: (0, 0)),
            ],
            out_specs=pl.BlockSpec((B, 1), lambda i: (0, 0)),
            scratch_shapes=[
                pltpu.VMEM((B, H), jnp.float32),
                pltpu.VMEM((B, H), jnp.float32),
            ],
        ),
        compiler_params=pltpu.CompilerParams(
            dimension_semantics=("arbitrary",),
            vmem_limit_bytes=_vmem_limit(block_bytes, scratch_bytes),
        ),
    )(gx, w_hh_t, w_out_row, b_out)


# ------------------------------ full model wrapper ----------------------------
def lstm_model_forward(x_btc, kparams):
    """x_btc: (B, T, C) -> (B,)  (matches LSTMModel.forward)."""
    B, T, C = x_btc.shape
    H_pad = kparams["layers"][0]["w_hh_t"].shape[0]
    B_pad = _round_up(B, 8)  # fill the 8 sublanes

    x = jnp.transpose(x_btc, (1, 0, 2)).astype(jnp.float32)  # time-major (T,B,C)
    if B_pad != B:
        x = jnp.pad(x, ((0, 0), (0, B_pad - B), (0, 0)))

    layers = kparams["layers"]
    n_layers = len(layers)
    h_seq = x
    out = None
    for idx, lp in enumerate(layers):
        c_in = h_seq.shape[-1]
        gx = input_projection(
            h_seq.reshape(T * B_pad, c_in), lp["w_ih_t"], lp["bias"]
        ).reshape(T, B_pad, 4 * H_pad)
        if idx < n_layers - 1:
            h_seq = lstm_recurrence_seq(gx, lp["w_hh_t"])
        else:
            out = lstm_recurrence_last(
                gx, lp["w_hh_t"], kparams["w_out_row"], kparams["b_out"]
            )
    return out[:B, 0]


# ------------------------------ parameter handling -----------------------------
def init_raw_params(key, input_size, hidden_size, num_layers):
    """nn.LSTM / nn.Linear shaped params, U(-1/sqrt(H), 1/sqrt(H)); gate order i,f,g,o."""
    bound = 1.0 / np.sqrt(hidden_size)
    layers = []
    in_sz = input_size
    for _ in range(num_layers):
        key, k1, k2, k3, k4 = jax.random.split(key, 5)
        layers.append(dict(
            w_ih=jax.random.uniform(k1, (4 * hidden_size, in_sz), jnp.float32, -bound, bound),
            w_hh=jax.random.uniform(k2, (4 * hidden_size, hidden_size), jnp.float32, -bound, bound),
            b_ih=jax.random.uniform(k3, (4 * hidden_size,), jnp.float32, -bound, bound),
            b_hh=jax.random.uniform(k4, (4 * hidden_size,), jnp.float32, -bound, bound),
        ))
        in_sz = hidden_size
    key, k5, k6 = jax.random.split(key, 3)
    w_out = jax.random.uniform(k5, (1, hidden_size), jnp.float32, -bound, bound)
    b_out = jax.random.uniform(k6, (1,), jnp.float32, -bound, bound)
    return dict(layers=layers, w_out=w_out, b_out=b_out, hidden_size=hidden_size)


def _gate_pad(mat_t, H, H_pad, row_pad_to=None):
    """(in_dim, 4H) -> (row_pad_to or in_dim, 4*H_pad); gate k re-packed at
    lane-aligned column offset k*H_pad (padding stays zero -> padded h stays 0)."""
    in_dim = mat_t.shape[0]
    rows = in_dim if row_pad_to is None else row_pad_to
    out = jnp.zeros((rows, 4 * H_pad), jnp.float32)
    for k in range(4):
        out = out.at[:in_dim, k * H_pad:k * H_pad + H].set(
            mat_t[:, k * H:(k + 1) * H]
        )
    return out


def prepare_kernel_params(raw):
    """Transpose, combine biases, and lane/sublane-pad weights for the kernels."""
    H = raw["hidden_size"]
    H_pad = _round_up(H, 128)  # lane-align the four gate blocks
    layers = []
    for li, lp in enumerate(raw["layers"]):
        row_pad = None if li == 0 else H_pad  # layers >0 consume padded hidden
        layers.append(dict(
            w_ih_t=_gate_pad(lp["w_ih"].T, H, H_pad, row_pad_to=row_pad),
            w_hh_t=_gate_pad(lp["w_hh"].T, H, H_pad, row_pad_to=H_pad),
            bias=_gate_pad((lp["b_ih"] + lp["b_hh"])[None, :], H, H_pad),
        ))
    w_out_row = jnp.zeros((1, H_pad), jnp.float32).at[:, :H].set(raw["w_out"])
    b_out = raw["b_out"].reshape(1, 1).astype(jnp.float32)
    return dict(layers=layers, w_out_row=w_out_row, b_out=b_out)


# ------------------------------ pure-JAX reference -----------------------------
def reference_forward(x_btc, raw):
    H = raw["hidden_size"]
    x_tbc = jnp.transpose(x_btc, (1, 0, 2))
    B = x_tbc.shape[1]
    h_seq = x_tbc
    for lp in raw["layers"]:
        w_ih_t, w_hh_t = lp["w_ih"].T, lp["w_hh"].T
        bias = (lp["b_ih"] + lp["b_hh"])[None, :]

        def step(carry, x_t, w_ih_t=w_ih_t, w_hh_t=w_hh_t, bias=bias):
            h, c = carry
            gates = x_t @ w_ih_t + h @ w_hh_t + bias
            i = jax.nn.sigmoid(gates[:, 0 * H:1 * H])
            f = jax.nn.sigmoid(gates[:, 1 * H:2 * H])
            g = jnp.tanh(gates[:, 2 * H:3 * H])
            o = jax.nn.sigmoid(gates[:, 3 * H:4 * H])
            c_new = f * c + i * g
            h_new = o * jnp.tanh(c_new)
            return (h_new, c_new), h_new

        init = (jnp.zeros((B, H), jnp.float32), jnp.zeros((B, H), jnp.float32))
        _, h_seq = jax.lax.scan(step, init, h_seq)
    last_h = h_seq[-1]
    return (last_h @ raw["w_out"].T + raw["b_out"])[:, 0]


if __name__ == "__main__":
    B, T, C, H, L = 2, 8, 16, 32, 2

    key = jax.random.PRNGKey(0)
    key, kx = jax.random.split(key)
    x = jax.random.normal(kx, (B, T, C), jnp.float32)

    raw = init_raw_params(key, input_size=C, hidden_size=H, num_layers=L)
    kparams = prepare_kernel_params(raw)

    out = jax.block_until_ready(jax.jit(lstm_model_forward)(x, kparams))
    ref = jax.block_until_ready(reference_forward(x, raw))

    assert out.shape == (B,), out.shape
    np.testing.assert_allclose(np.asarray(out), np.asarray(ref), rtol=1e-4, atol=1e-5)

    print("KERNEL_OK")
</pallas_src>

<mosaic_0001>
module attributes {stable_mosaic.version = 11 : i64} {
  func.func @_input_proj_kernel(%arg0: i32, %arg1: memref<64x16xf32, #tpu.memory_space<vmem>>, %arg2: memref<16x512xf32, #tpu.memory_space<vmem>>, %arg3: memref<1x512xf32, #tpu.memory_space<vmem>>, %arg4: memref<64x512xf32, #tpu.memory_space<vmem>>) attributes {dimension_semantics = [#tpu.dimension_semantics<parallel>], iteration_bounds = array<i64: 1>, scalar_prefetch = 0 : i64, scratch_operands = 0 : i64, tpu.core_type = #tpu.core_type<tc>, window_params = [{transform_indices = @transform_0, window_bounds = array<i64: 64, 16>}, {pipeline_mode = #tpu.pipeline_mode<synchronous>, transform_indices = @transform_1, window_bounds = array<i64: 16, 512>}, {pipeline_mode = #tpu.pipeline_mode<synchronous>, transform_indices = @transform_2, window_bounds = array<i64: 1, 512>}, {transform_indices = @transform_3, window_bounds = array<i64: 64, 512>}]} {
    %c0 = arith.constant 0 : index
    %c0_0 = arith.constant 0 : index
    %0 = vector.load %arg1[%c0, %c0_0] : memref<64x16xf32, #tpu.memory_space<vmem>>, vector<64x16xf32>
    %c0_1 = arith.constant 0 : index
    %c0_2 = arith.constant 0 : index
    %1 = vector.load %arg2[%c0_1, %c0_2] : memref<16x512xf32, #tpu.memory_space<vmem>>, vector<16x512xf32>
    %cst = arith.constant dense<0.000000e+00> : vector<64x512xf32>
    %2 = tpu.matmul %0, %1, %cst {dimension_numbers = #tpu.dot_dimension_numbers<[1], [0], [0], [1], [0, 0, 1, 1], [], []>} : vector<64x16xf32>, vector<16x512xf32>, vector<64x512xf32> -> vector<64x512xf32>
    %c0_3 = arith.constant 0 : index
    %c0_4 = arith.constant 0 : index
    %3 = vector.load %arg3[%c0_3, %c0_4] : memref<1x512xf32, #tpu.memory_space<vmem>>, vector<1x512xf32>
    %4 = vector.broadcast %3 : vector<1x512xf32> to vector<64x512xf32>
    %5 = arith.addf %2, %4 : vector<64x512xf32>
    %c0_5 = arith.constant 0 : index
    %c0_6 = arith.constant 0 : index
    %6 = vector.load %arg4[%c0_5, %c0_6] : memref<64x512xf32, #tpu.memory_space<vmem>>, vector<64x512xf32>
    tpu.vector_store %arg4[%c0_5, %c0_6], %5 {strides = array<i32>} : memref<64x512xf32, #tpu.memory_space<vmem>>, vector<64x512xf32>,
    return
  }
  func.func @transform_0(%arg0: i32) -> (i32, i32) {
    %c0_i32 = arith.constant 0 : i32
    %c0_i32_0 = arith.constant 0 : i32
    return %arg0, %c0_i32 : i32, i32
  }
  func.func @transform_1(%arg0: i32) -> (i32, i32) {
    %c0_i32 = arith.constant 0 : i32
    %c0_i32_0 = arith.constant 0 : i32
    %c0_i32_1 = arith.constant 0 : i32
    return %c0_i32, %c0_i32_0 : i32, i32
  }
  func.func @transform_2(%arg0: i32) -> (i32, i32) {
    %c0_i32 = arith.constant 0 : i32
    %c0_i32_0 = arith.constant 0 : i32
    %c0_i32_1 = arith.constant 0 : i32
    return %c0_i32, %c0_i32_0 : i32, i32
  }
  func.func @transform_3(%arg0: i32) -> (i32, i32) {
    %c0_i32 = arith.constant 0 : i32
    %c0_i32_0 = arith.constant 0 : i32
    return %arg0, %c0_i32 : i32, i32
  }
}

module attributes {stable_mosaic.version = 11 : i64} {
  func.func @_lstm_seq_kernel(%arg0: i32, %arg1: memref<8x8x512xf32, #tpu.memory_space<vmem>>, %arg2: memref<128x512xf32, #tpu.memory_space<vmem>>, %arg3: memref<8x8x128xf32, #tpu.memory_space<vmem>>, %arg4: memref<8x128xf32, #tpu.memory_space<vmem>>, %arg5: memref<8x128xf32, #tpu.memory_space<vmem>>) attributes {dimension_semantics = [#tpu.dimension_semantics<arbitrary>], iteration_bounds = array<i64: 1>, scalar_prefetch = 0 : i64, scratch_operands = 2 : i64, tpu.core_type = #tpu.core_type<tc>, window_params = [{transform_indices = @transform_0, window_bounds = array<i64: 8, 8, 512>}, {pipeline_mode = #tpu.pipeline_mode<synchronous>, transform_indices = @transform_1, window_bounds = array<i64: 128, 512>}, {transform_indices = @transform_2, window_bounds = array<i64: 8, 8, 128>}]} {
    %c0_i32 = arith.constant 0 : i32
    %0 = arith.cmpi eq, %arg0, %c0_i32 : i32
    %1 = arith.extui %0 : i1 to i32
    %c0_i32_0 = arith.constant 0 : i32
    %2 = arith.cmpi ne, %1, %c0_i32_0 : i32
    scf.if %2 {
      %cst_130 = arith.constant 0.000000e+00 : f32
      %308 = vector.broadcast %cst_130 : f32 to vector<8x128xf32>
      %c0_131 = arith.constant 0 : index
      %c0_132 = arith.constant 0 : index
      %309 = vector.load %arg4[%c0_131, %c0_132] : memref<8x128xf32, #tpu.memory_space<vmem>>, vector<8x128xf32>
      tpu.vector_store %arg4[%c0_131, %c0_132], %308 {strides = array<i32>} : memref<8x128xf32, #tpu.memory_space<vmem>>, vector<8x128xf32>,
      %cst_133 = arith.constant 0.000000e+00 : f32
      %310 = vector.broadcast %cst_133 : f32 to vector<8x128xf32>
      %c0_134 = arith.constant 0 : index
      %c0_135 = arith.constant 0 : index
      %311 = vector.load %arg5[%c0_134, %c0_135] : memref<8x128xf32, #tpu.memory_space<vmem>>, vector<8x128xf32>
      tpu.vector_store %arg5[%c0_134, %c0_135], %310 {strides = array<i32>} : memref<8x128xf32, #tpu.memory_space<vmem>>, vector<8x128xf32>,
    } else {
    }
    %c0 = arith.constant 0 : index
    %c0_1 = arith.constant 0 : index
    %3 = vector.load %arg2[%c0, %c0_1] : memref<128x512xf32, #tpu.memory_space<vmem>>, vector<128x512xf32>
    %c0_i32_2 = arith.constant 0 : i32
    %4 = arith.index_cast %c0_i32_2 : i32 to index
    %c0_3 = arith.constant 0 : index
    %c0_4 = arith.constant 0 : index
    %5 = vector.load %arg1[%4, %c0_3, %c0_4] : memref<8x8x512xf32, #tpu.memory_space<vmem>>, vector<1x8x512xf32>
    %6 = vector.shape_cast %5 : vector<1x8x512xf32> to vector<8x512xf32>
    %c0_5 = arith.constant 0 : index
    %c0_6 = arith.constant 0 : index
    %7 = vector.load %arg4[%c0_5, %c0_6] : memref<8x128xf32, #tpu.memory_space<vmem>>, vector<8x128xf32>
    %cst = arith.constant dense<0.000000e+00> : vector<8x512xf32>
    %8 = tpu.matmul %7, %3, %cst {dimension_numbers = #tpu.dot_dimension_numbers<[1], [0], [0], [1], [0, 0, 1, 1], [], []>} : vector<8x128xf32>, vector<128x512xf32>, vector<8x512xf32> -> vector<8x512xf32>
    %9 = arith.addf %6, %8 : vector<8x512xf32>
    %c0_7 = arith.constant 0 : index
    %c0_8 = arith.constant 0 : index
    %10 = vector.load %arg5[%c0_7, %c0_8] : memref<8x128xf32, #tpu.memory_space<vmem>>, vector<8x128xf32>
    %11 = vector.extract_strided_slice %9 {offsets = [0, 0], sizes = [8, 128], strides = [1, 1]} : vector<8x512xf32> to vector<8x128xf32>
    %12 = arith.negf %11 : vector<8x128xf32>
    %13 = math.exp %12 : vector<8x128xf32>
    %cst_9 = arith.constant 1.000000e+00 : f32
    %14 = vector.broadcast %cst_9 : f32 to vector<8x128xf32>
    %15 = arith.addf %14, %13 : vector<8x128xf32>
    %16 = arith.divf %14, %15 : vector<8x128xf32>
    %17 = vector.extract_strided_slice %9 {offsets = [0, 128], sizes = [8, 128], strides = [1, 1]} : vector<8x512xf32> to vector<8x128xf32>
    %18 = arith.negf %17 : vector<8x128xf32>
    %19 = math.exp %18 : vector<8x128xf32>
    %cst_10 = arith.constant 1.000000e+00 : f32
    %20 = vector.broadcast %cst_10 : f32 to vector<8x128xf32>
    %21 = arith.addf %20, %19 : vector<8x128xf32>
    %22 = arith.divf %20, %21 : vector<8x128xf32>
    %23 = vector.extract_strided_slice %9 {offsets = [0, 256], sizes = [8, 128], strides = [1, 1]} : vector<8x512xf32> to vector<8x128xf32>
    %24 = math.tanh %23 : vector<8x128xf32>
    %25 = vector.extract_strided_slice %9 {offsets = [0, 384], sizes = [8, 128], strides = [1, 1]} : vector<8x512xf32> to vector<8x128xf32>
    %26 = arith.negf %25 : vector<8x128xf32>
    %27 = math.exp %26 : vector<8x128xf32>
    %cst_11 = arith.constant 1.000000e+00 : f32
    %28 = vector.broadcast %cst_11 : f32 to vector<8x128xf32>
    %29 = arith.addf %28, %27 : vector<8x128xf32>
    %30 = arith.divf %28, %29 : vector<8x128xf32>
    %31 = arith.mulf %22, %10 : vector<8x128xf32>
    %32 = arith.mulf %16, %24 : vector<8x128xf32>
    %33 = arith.addf %31, %32 : vector<8x128xf32>
    %34 = math.tanh %33 : vector<8x128xf32>
    %35 = arith.mulf %30, %34 : vector<8x128xf32>
    %c0_12 = arith.constant 0 : index
    %c0_13 = arith.constant 0 : index
    %36 = vector.load %arg4[%c0_12, %c0_13] : memref<8x128xf32, #tpu.memory_space<vmem>>, vector<8x128xf32>
    tpu.vector_store %arg4[%c0_12, %c0_13], %35 {strides = array<i32>} : memref<8x128xf32, #tpu.memory_space<vmem>>, vector<8x128xf32>,
    %c0_14 = arith.constant 0 : index
    %c0_15 = arith.constant 0 : index
    %37 = vector.load %arg5[%c0_14, %c0_15] : memref<8x128xf32, #tpu.memory_space<vmem>>, vector<8x128xf32>
    tpu.vector_store %arg5[%c0_14, %c0_15], %33 {strides = array<i32>} : memref<8x128xf32, #tpu.memory_space<vmem>>, vector<8x128xf32>,
    %38 = arith.index_cast %c0_i32_2 : i32 to index
    %c0_16 = arith.constant 0 : index
    %c0_17 = arith.constant 0 : index
    %39 = vector.load %arg3[%38, %c0_16, %c0_17] : memref<8x8x128xf32, #tpu.memory_space<vmem>>, vector<1x8x128xf32>
    %40 = vector.shape_cast %39 : vector<1x8x128xf32> to vector<8x128xf32>
    %41 = vector.shape_cast %35 : vector<8x128xf32> to vector<1x8x128xf32>
    tpu.vector_store %arg3[%38, %c0_16, %c0_17], %41 {strides = array<i32>} : memref<8x8x128xf32, #tpu.memory_space<vmem>>, vector<1x8x128xf32>,
    %c1_i32 = arith.constant 1 : i32
    %42 = arith.index_cast %c1_i32 : i32 to index
    %c0_18 = arith.constant 0 : index
    %c0_19 = arith.constant 0 : index
    %43 = vector.load %arg1[%42, %c0_18, %c0_19] : memref<8x8x512xf32, #tpu.memory_space<vmem>>, vector<1x8x512xf32>
    %44 = vector.shape_cast %43 : vector<1x8x512xf32> to vector<8x512xf32>
    %c0_20 = arith.constant 0 : index
    %c0_21 = arith.constant 0 : index
    %45 = vector.load %arg4[%c0_20, %c0_21] : memref<8x128xf32, #tpu.memory_space<vmem>>, vector<8x128xf32>
    %cst_22 = arith.constant dense<0.000000e+00> : vector<8x512xf32>
    %46 = tpu.matmul %45, %3, %cst_22 {dimension_numbers = #tpu.dot_dimension_numbers<[1], [0], [0], [1], [0, 0, 1, 1], [], []>} : vector<8x128xf32>, vector<128x512xf32>, vector<8x512xf32> -> vector<8x512xf32>
    %47 = arith.addf %44, %46 : vector<8x512xf32>
    %c0_23 = arith.constant 0 : index
    %c0_24 = arith.constant 0 : index
    %48 = vector.load %arg5[%c0_23, %c0_24] : memref<8x128xf32, #tpu.memory_space<vmem>>, vector<8x128xf32>
    %49 = vector.extract_strided_slice %47 {offsets = [0, 0], sizes = [8, 128], strides = [1, 1]} : vector<8x512xf32> to vector<8x128xf32>
    %50 = arith.negf %49 : vector<8x128xf32>
    %51 = math.exp %50 : vector<8x128xf32>
    %cst_25 = arith.constant 1.000000e+00 : f32
    %52 = vector.broadcast %cst_25 : f32 to vector<8x128xf32>
    %53 = arith.addf %52, %51 : vector<8x128xf32>
    %54 = arith.divf %52, %53 : vector<8x128xf32>
    %55 = vector.extract_strided_slice %47 {offsets = [0, 128], sizes = [8, 128], strides = [1, 1]} : vector<8x512xf32> to vector<8x128xf32>
    %56 = arith.negf %55 : vector<8x128xf32>
    %57 = math.exp %56 : vector<8x128xf32>
    %cst_26 = arith.constant 1.000000e+00 : f32
    %58 = vector.broadcast %cst_26 : f32 to vector<8x128xf32>
    %59 = arith.addf %58, %57 : vector<8x128xf32>
    %60 = arith.divf %58, %59 : vector<8x128xf32>
    %61 = vector.extract_strided_slice %47 {offsets = [0, 256], sizes = [8, 128], strides = [1, 1]} : vector<8x512xf32> to vector<8x128xf32>
    %62 = math.tanh %61 : vector<8x128xf32>
    %63 = vector.extract_strided_slice %47 {offsets = [0, 384], sizes = [8, 128], strides = [1, 1]} : vector<8x512xf32> to vector<8x128xf32>
    %64 = arith.negf %63 : vector<8x128xf32>
    %65 = math.exp %64 : vector<8x128xf32>
    %cst_27 = arith.constant 1.000000e+00 : f32
    %66 = vector.broadcast %cst_27 : f32 to vector<8x128xf32>
    %67 = arith.addf %66, %65 : vector<8x128xf32>
    %68 = arith.divf %66, %67 : vector<8x128xf32>
    %69 = arith.mulf %60, %48 : vector<8x128xf32>
    %70 = arith.mulf %54, %62 : vector<8x128xf32>
    %71 = arith.addf %69, %70 : vector<8x128xf32>
    %72 = math.tanh %71 : vector<8x128xf32>
    %73 = arith.mulf %68, %72 : vector<8x128xf32>
    %c0_28 = arith.constant 0 : index
    %c0_29 = arith.constant 0 : index
    %74 = vector.load %arg4[%c0_28, %c0_29] : memref<8x128xf32, #tpu.memory_space<vmem>>, vector<8x128xf32>
    tpu.vector_store %arg4[%c0_28, %c0_29], %73 {strides = array<i32>} : memref<8x128xf32, #tpu.memory_space<vmem>>, vector<8x128xf32>,
    %c0_30 = arith.constant 0 : index
    %c0_31 = arith.constant 0 : index
    %75 = vector.load %arg5[%c0_30, %c0_31] : memref<8x128xf32, #tpu.memory_space<vmem>>, vector<8x128xf32>
    tpu.vector_store %arg5[%c0_30, %c0_31], %71 {strides = array<i32>} : memref<8x128xf32, #tpu.memory_space<vmem>>, vector<8x128xf32>,
    %76 = arith.index_cast %c1_i32 : i32 to index
    %c0_32 = arith.constant 0 : index
    %c0_33 = arith.constant 0 : index
    %77 = vector.load %arg3[%76, %c0_32, %c0_33] : memref<8x8x128xf32, #tpu.memory_space<vmem>>, vector<1x8x128xf32>
    %78 = vector.shape_cast %77 : vector<1x8x128xf32> to vector<8x128xf32>
    %79 = vector.shape_cast %73 : vector<8x128xf32> to vector<1x8x128xf32>
    tpu.vector_store %arg3[%76, %c0_32, %c0_33], %79 {strides = array<i32>} : memref<8x8x128xf32, #tpu.memory_space<vmem>>, vector<1x8x128xf32>,
    %c2_i32 = arith.constant 2 : i32
    %80 = arith.index_cast %c2_i32 : i32 to index
    %c0_34 = arith.constant 0 : index
    %c0_35 = arith.constant 0 : index
    %81 = vector.load %arg1[%80, %c0_34, %c0_35] : memref<8x8x512xf32, #tpu.memory_space<vmem>>, vector<1x8x512xf32>
    %82 = vector.shape_cast %81 : vector<1x8x512xf32> to vector<8x512xf32>
    %c0_36 = arith.constant 0 : index
    %c0_37 = arith.constant 0 : index
    %83 = vector.load %arg4[%c0_36, %c0_37] : memref<8x128xf32, #tpu.memory_space<vmem>>, vector<8x128xf32>
    %cst_38 = arith.constant dense<0.000000e+00> : vector<8x512xf32>
    %84 = tpu.matmul %83, %3, %cst_38 {dimension_numbers = #tpu.dot_dimension_numbers<[1], [0], [0], [1], [0, 0, 1, 1], [], []>} : vector<8x128xf32>, vector<128x512xf32>, vector<8x512xf32> -> vector<8x512xf32>
    %85 = arith.addf %82, %84 : vector<8x512xf32>
    %c0_39 = arith.constant 0 : index
    %c0_40 = arith.constant 0 : index
    %86 = vector.load %arg5[%c0_39, %c0_40] : memref<8x128xf32, #tpu.memory_space<vmem>>, vector<8x128xf32>
    %87 = vector.extract_strided_slice %85 {offsets = [0, 0], sizes = [8, 128], strides = [1, 1]} : vector<8x512xf32> to vector<8x128xf32>
    %88 = arith.negf %87 : vector<8x128xf32>
    %89 = math.exp %88 : vector<8x128xf32>
    %cst_41 = arith.constant 1.000000e+00 : f32
    %90 = vector.broadcast %cst_41 : f32 to vector<8x128xf32>
    %91 = arith.addf %90, %89 : vector<8x128xf32>
    %92 = arith.divf %90, %91 : vector<8x128xf32>
    %93 = vector.extract_strided_slice %85 {offsets = [0, 128], sizes = [8, 128], strides = [1, 1]} : vector<8x512xf32> to vector<8x128xf32>
    %94 = arith.negf %93 : vector<8x128xf32>
    %95 = math.exp %94 : vector<8x128xf32>
    %cst_42 = arith.constant 1.000000e+00 : f32
    %96 = vector.broadcast %cst_42 : f32 to vector<8x128xf32>
    %97 = arith.addf %96, %95 : vector<8x128xf32>
    %98 = arith.divf %96, %97 : vector<8x128xf32>
    %99 = vector.extract_strided_slice %85 {offsets = [0, 256], sizes = [8, 128], strides = [1, 1]} : vector<8x512xf32> to vector<8x128xf32>
    %100 = math.tanh %99 : vector<8x128xf32>
    %101 = vector.extract_strided_slice %85 {offsets = [0, 384], sizes = [8, 128], strides = [1, 1]} : vector<8x512xf32> to vector<8x128xf32>
    %102 = arith.negf %101 : vector<8x128xf32>
    %103 = math.exp %102 : vector<8x128xf32>
    %cst_43 = arith.constant 1.000000e+00 : f32
    %104 = vector.broadcast %cst_43 : f32 to vector<8x128xf32>
    %105 = arith.addf %104, %103 : vector<8x128xf32>
    %106 = arith.divf %104, %105 : vector<8x128xf32>
    %107 = arith.mulf %98, %86 : vector<8x128xf32>
    %108 = arith.mulf %92, %100 : vector<8x128xf32>
    %109 = arith.addf %107, %108 : vector<8x128xf32>
    %110 = math.tanh %109 : vector<8x128xf32>
    %111 = arith.mulf %106, %110 : vector<8x128xf32>
    %c0_44 = arith.constant 0 : index
    %c0_45 = arith.constant 0 : index
    %112 = vector.load %arg4[%c0_44, %c0_45] : memref<8x128xf32, #tpu.memory_space<vmem>>, vector<8x128xf32>
    tpu.vector_store %arg4[%c0_44, %c0_45], %111 {strides = array<i32>} : memref<8x128xf32, #tpu.memory_space<vmem>>, vector<8x128xf32>,
    %c0_46 = arith.constant 0 : index
    %c0_47 = arith.constant 0 : index
    %113 = vector.load %arg5[%c0_46, %c0_47] : memref<8x128xf32, #tpu.memory_space<vmem>>, vector<8x128xf32>
    tpu.vector_store %arg5[%c0_46, %c0_47], %109 {strides = array<i32>} : memref<8x128xf32, #tpu.memory_space<vmem>>, vector<8x128xf32>,
    %114 = arith.index_cast %c2_i32 : i32 to index
    %c0_48 = arith.constant 0 : index
    %c0_49 = arith.constant 0 : index
    %115 = vector.load %arg3[%114, %c0_48, %c0_49] : memref<8x8x128xf32, #tpu.memory_space<vmem>>, vector<1x8x128xf32>
    %116 = vector.shape_cast %115 : vector<1x8x128xf32> to vector<8x128xf32>
    %117 = vector.shape_cast %111 : vector<8x128xf32> to vector<1x8x128xf32>
    tpu.vector_store %arg3[%114, %c0_48, %c0_49], %117 {strides = array<i32>} : memref<8x8x128xf32, #tpu.memory_space<vmem>>, vector<1x8x128xf32>,
    %c3_i32 = arith.constant 3 : i32
    %118 = arith.index_cast %c3_i32 : i32 to index
    %c0_50 = arith.constant 0 : index
    %c0_51 = arith.constant 0 : index
    %119 = vector.load %arg1[%118, %c0_50, %c0_51] : memref<8x8x512xf32, #tpu.memory_space<vmem>>, vector<1x8x512xf32>
    %120 = vector.shape_cast %119 : vector<1x8x512xf32> to vector<8x512xf32>
    %c0_52 = arith.constant 0 : index
    %c0_53 = arith.constant 0 : index
    %121 = vector.load %arg4[%c0_52, %c0_53] : memref<8x128xf32, #tpu.memory_space<vmem>>, vector<8x128xf32>
    %cst_54 = arith.constant dense<0.000000e+00> : vector<8x512xf32>
    %122 = tpu.matmul %121, %3, %cst_54 {dimension_numbers = #tpu.dot_dimension_numbers<[1], [0], [0], [1], [0, 0, 1, 1], [], []>} : vector<8x128xf32>, vector<128x512xf32>, vector<8x512xf32> -> vector<8x512xf32>
    %123 = arith.addf %120, %122 : vector<8x512xf32>
    %c0_55 = arith.constant 0 : index
    %c0_56 = arith.constant 0 : index
    %124 = vector.load %arg5[%c0_55, %c0_56] : memref<8x128xf32, #tpu.memory_space<vmem>>, vector<8x128xf32>
    %125 = vector.extract_strided_slice %123 {offsets = [0, 0], sizes = [8, 128], strides = [1, 1]} : vector<8x512xf32> to vector<8x128xf32>
    %126 = arith.negf %125 : vector<8x128xf32>
    %127 = math.exp %126 : vector<8x128xf32>
    %cst_57 = arith.constant 1.000000e+00 : f32
    %128 = vector.broadcast %cst_57 : f32 to vector<8x128xf32>
    %129 = arith.addf %128, %127 : vector<8x128xf32>
    %130 = arith.divf %128, %129 : vector<8x128xf32>
    %131 = vector.extract_strided_slice %123 {offsets = [0, 128], sizes = [8, 128], strides = [1, 1]} : vector<8x512xf32> to vector<8x128xf32>
    %132 = arith.negf %131 : vector<8x128xf32>
    %133 = math.exp %132 : vector<8x128xf32>
    %cst_58 = arith.constant 1.000000e+00 : f32
    %134 = vector.broadcast %cst_58 : f32 to vector<8x128xf32>
    %135 = arith.addf %134, %133 : vector<8x128xf32>
    %136 = arith.divf %134, %135 : vector<8x128xf32>
    %137 = vector.extract_strided_slice %123 {offsets = [0, 256], sizes = [8, 128], strides = [1, 1]} : vector<8x512xf32> to vector<8x128xf32>
    %138 = math.tanh %137 : vector<8x128xf32>
    %139 = vector.extract_strided_slice %123 {offsets = [0, 384], sizes = [8, 128], strides = [1, 1]} : vector<8x512xf32> to vector<8x128xf32>
    %140 = arith.negf %139 : vector<8x128xf32>
    %141 = math.exp %140 : vector<8x128xf32>
    %cst_59 = arith.constant 1.000000e+00 : f32
    %142 = vector.broadcast %cst_59 : f32 to vector<8x128xf32>
    %143 = arith.addf %142, %141 : vector<8x128xf32>
    %144 = arith.divf %142, %143 : vector<8x128xf32>
    %145 = arith.mulf %136, %124 : vector<8x128xf32>
    %146 = arith.mulf %130, %138 : vector<8x128xf32>
    %147 = arith.addf %145, %146 : vector<8x128xf32>
    %148 = math.tanh %147 : vector<8x128xf32>
    %149 = arith.mulf %144, %148 : vector<8x128xf32>
    %c0_60 = arith.constant 0 : index
    %c0_61 = arith.constant 0 : index
    %150 = vector.load %arg4[%c0_60, %c0_61] : memref<8x128xf32, #tpu.memory_space<vmem>>, vector<8x128xf32>
    tpu.vector_store %arg4[%c0_60, %c0_61], %149 {strides = array<i32>} : memref<8x128xf32, #tpu.memory_space<vmem>>, vector<8x128xf32>,
    %c0_62 = arith.constant 0 : index
    %c0_63 = arith.constant 0 : index
    %151 = vector.load %arg5[%c0_62, %c0_63] : memref<8x128xf32, #tpu.memory_space<vmem>>, vector<8x128xf32>
    tpu.vector_store %arg5[%c0_62, %c0_63], %147 {strides = array<i32>} : memref<8x128xf32, #tpu.memory_space<vmem>>, vector<8x128xf32>,
    %152 = arith.index_cast %c3_i32 : i32 to index
    %c0_64 = arith.constant 0 : index
    %c0_65 = arith.constant 0 : index
    %153 = vector.load %arg3[%152, %c0_64, %c0_65] : memref<8x8x128xf32, #tpu.memory_space<vmem>>, vector<1x8x128xf32>
    %154 = vector.shape_cast %153 : vector<1x8x128xf32> to vector<8x128xf32>
    %155 = vector.shape_cast %149 : vector<8x128xf32> to vector<1x8x128xf32>
    tpu.vector_store %arg3[%152, %c0_64, %c0_65], %155 {strides = array<i32>} : memref<8x8x128xf32, #tpu.memory_space<vmem>>, vector<1x8x128xf32>,
    %c4_i32 = arith.constant 4 : i32
    %156 = arith.index_cast %c4_i32 : i32 to index
    %c0_66 = arith.constant 0 : index
    %c0_67 = arith.constant 0 : index
    %157 = vector.load %arg1[%156, %c0_66, %c0_67] : memref<8x8x512xf32, #tpu.memory_space<vmem>>, vector<1x8x512xf32>
    %158 = vector.shape_cast %157 : vector<1x8x512xf32> to vector<8x512xf32>
    %c0_68 = arith.constant 0 : index
    %c0_69 = arith.constant 0 : index
    %159 = vector.load %arg4[%c0_68, %c0_69] : memref<8x128xf32, #tpu.memory_space<vmem>>, vector<8x128xf32>
    %cst_70 = arith.constant dense<0.000000e+00> : vector<8x512xf32>
    %160 = tpu.matmul %159, %3, %cst_70 {dimension_numbers = #tpu.dot_dimension_numbers<[1], [0], [0], [1], [0, 0, 1, 1], [], []>} : vector<8x128xf32>, vector<128x512xf32>, vector<8x512xf32> -> vector<8x512xf32>
    %161 = arith.addf %158, %160 : vector<8x512xf32>
    %c0_71 = arith.constant 0 : index
    %c0_72 = arith.constant 0 : index
    %162 = vector.load %arg5[%c0_71, %c0_72] : memref<8x128xf32, #tpu.memory_space<vmem>>, vector<8x128xf32>
    %163 = vector.extract_strided_slice %161 {offsets = [0, 0], sizes = [8, 128], strides = [1, 1]} : vector<8x512xf32> to vector<8x128xf32>
    %164 = arith.negf %163 : vector<8x128xf32>
    %165 = math.exp %164 : vector<8x128xf32>
    %cst_73 = arith.constant 1.000000e+00 : f32
    %166 = vector.broadcast %cst_73 : f32 to vector<8x128xf32>
    %167 = arith.addf %166, %165 : vector<8x128xf32>
    %168 = arith.divf %166, %167 : vector<8x128xf32>
    %169 = vector.extract_strided_slice %161 {offsets = [0, 128], sizes = [8, 128], strides = [1, 1]} : vector<8x512xf32> to vector<8x128xf32>
    %170 = arith.negf %169 : vector<8x128xf32>
    %171 = math.exp %170 : vector<8x128xf32>
    %cst_74 = arith.constant 1.000000e+00 : f32
    %172 = vector.broadcast %cst_74 : f32 to vector<8x128xf32>
    %173 = arith.addf %172, %171 : vector<8x128xf32>
    %174 = arith.divf %172, %173 : vector<8x128xf32>
    %175 = vector.extract_strided_slice %161 {offsets = [0, 256], sizes = [8, 128], strides = [1, 1]} : vector<8x512xf32> to vector<8x128xf32>
    %176 = math.tanh %175 : vector<8x128xf32>
    %177 = vector.extract_strided_slice %161 {offsets = [0, 384], sizes = [8, 128], strides = [1, 1]} : vector<8x512xf32> to vector<8x128xf32>
    %178 = arith.negf %177 : vector<8x128xf32>
    %179 = math.exp %178 : vector<8x128xf32>
    %cst_75 = arith.constant 1.000000e+00 : f32
    %180 = vector.broadcast %cst_75 : f32 to vector<8x128xf32>
    %181 = arith.addf %180, %179 : vector<8x128xf32>
    %182 = arith.divf %180, %181 : vector<8x128xf32>
    %183 = arith.mulf %174, %162 : vector<8x128xf32>
    %184 = arith.mulf %168, %176 : vector<8x128xf32>
    %185 = arith.addf %183, %184 : vector<8x128xf32>
    %186 = math.tanh %185 : vector<8x128xf32>
    %187 = arith.mulf %182, %186 : vector<8x128xf32>
    %c0_76 = arith.constant 0 : index
    %c0_77 = arith.constant 0 : index
    %188 = vector.load %arg4[%c0_76, %c0_77] : memref<8x128xf32, #tpu.memory_space<vmem>>, vector<8x128xf32>
    tpu.vector_store %arg4[%c0_76, %c0_77], %187 {strides = array<i32>} : memref<8x128xf32, #tpu.memory_space<vmem>>, vector<8x128xf32>,
    %c0_78 = arith.constant 0 : index
    %c0_79 = arith.constant 0 : index
    %189 = vector.load %arg5[%c0_78, %c0_79] : memref<8x128xf32, #tpu.memory_space<vmem>>, vector<8x128xf32>
    tpu.vector_store %arg5[%c0_78, %c0_79], %185 {strides = array<i32>} : memref<8x128xf32, #tpu.memory_space<vmem>>, vector<8x128xf32>,
    %190 = arith.index_cast %c4_i32 : i32 to index
    %c0_80 = arith.constant 0 : index
    %c0_81 = arith.constant 0 : index
    %191 = vector.load %arg3[%190, %c0_80, %c0_81] : memref<8x8x128xf32, #tpu.memory_space<vmem>>, vector<1x8x128xf32>
    %192 = vector.shape_cast %191 : vector<1x8x128xf32> to vector<8x128xf32>
    %193 = vector.shape_cast %187 : vector<8x128xf32> to vector<1x8x128xf32>
    tpu.vector_store %arg3[%190, %c0_80, %c0_81], %193 {strides = array<i32>} : memref<8x8x128xf32, #tpu.memory_space<vmem>>, vector<1x8x128xf32>,
    %c5_i32 = arith.constant 5 : i32
    %194 = arith.index_cast %c5_i32 : i32 to index
    %c0_82 = arith.constant 0 : index
    %c0_83 = arith.constant 0 : index
    %195 = vector.load %arg1[%194, %c0_82, %c0_83] : memref<8x8x512xf32, #tpu.memory_space<vmem>>, vector<1x8x512xf32>
    %196 = vector.shape_cast %195 : vector<1x8x512xf32> to vector<8x512xf32>
    %c0_84 = arith.constant 0 : index
    %c0_85 = arith.constant 0 : index
    %197 = vector.load %arg4[%c0_84, %c0_85] : memref<8x128xf32, #tpu.memory_space<vmem>>, vector<8x128xf32>
    %cst_86 = arith.constant dense<0.000000e+00> : vector<8x512xf32>
    %198 = tpu.matmul %197, %3, %cst_86 {dimension_numbers = #tpu.dot_dimension_numbers<[1], [0], [0], [1], [0, 0, 1, 1], [], []>} : vector<8x128xf32>, vector<128x512xf32>, vector<8x512xf32> -> vector<8x512xf32>
    %199 = arith.addf %196, %198 : vector<8x512xf32>
    %c0_87 = arith.constant 0 : index
    %c0_88 = arith.constant 0 : index
    %200 = vector.load %arg5[%c0_87, %c0_88] : memref<8x128xf32, #tpu.memory_space<vmem>>, vector<8x128xf32>
    %201 = vector.extract_strided_slice %199 {offsets = [0, 0], sizes = [8, 128], strides = [1, 1]} : vector<8x512xf32> to vector<8x128xf32>
    %202 = arith.negf %201 : vector<8x128xf32>
    %203 = math.exp %202 : vector<8x128xf32>
    %cst_89 = arith.constant 1.000000e+00 : f32
    %204 = vector.broadcast %cst_89 : f32 to vector<8x128xf32>
    %205 = arith.addf %204, %203 : vector<8x128xf32>
    %206 = arith.divf %204, %205 : vector<8x128xf32>
    %207 = vector.extract_strided_slice %199 {offsets = [0, 128], sizes = [8, 128], strides = [1, 1]} : vector<8x512xf32> to vector<8x128xf32>
    %208 = arith.negf %207 : vector<8x128xf32>
    %209 = math.exp %208 : vector<8x128xf32>
    %cst_90 = arith.constant 1.000000e+00 : f32
    %210 = vector.broadcast %cst_90 : f32 to vector<8x128xf32>
    %211 = arith.addf %210, %209 : vector<8x128xf32>
    %212 = arith.divf %210, %211 : vector<8x128xf32>
    %213 = vector.extract_strided_slice %199 {offsets = [0, 256], sizes = [8, 128], strides = [1, 1]} : vector<8x512xf32> to vector<8x128xf32>
    %214 = math.tanh %213 : vector<8x128xf32>
    %215 = vector.extract_strided_slice %199 {offsets = [0, 384], sizes = [8, 128], strides = [1, 1]} : vector<8x512xf32> to vector<8x128xf32>
    %216 = arith.negf %215 : vector<8x128xf32>
    %217 = math.exp %216 : vector<8x128xf32>
    %cst_91 = arith.constant 1.000000e+00 : f32
    %218 = vector.broadcast %cst_91 : f32 to vector<8x128xf32>
    %219 = arith.addf %218, %217 : vector<8x128xf32>
    %220 = arith.divf %218, %219 : vector<8x128xf32>
    %221 = arith.mulf %212, %200 : vector<8x128xf32>
    %222 = arith.mulf %206, %214 : vector<8x128xf32>
    %223 = arith.addf %221, %222 : vector<8x128xf32>
    %224 = math.tanh %223 : vector<8x128xf32>
    %225 = arith.mulf %220, %224 : vector<8x128xf32>
    %c0_92 = arith.constant 0 : index
    %c0_93 = arith.constant 0 : index
    %226 = vector.load %arg4[%c0_92, %c0_93] : memref<8x128xf32, #tpu.memory_space<vmem>>, vector<8x128xf32>
    tpu.vector_store %arg4[%c0_92, %c0_93], %225 {strides = array<i32>} : memref<8x128xf32, #tpu.memory_space<vmem>>, vector<8x128xf32>,
    %c0_94 = arith.constant 0 : index
    %c0_95 = arith.constant 0 : index
    %227 = vector.load %arg5[%c0_94, %c0_95] : memref<8x128xf32, #tpu.memory_space<vmem>>, vector<8x128xf32>
    tpu.vector_store %arg5[%c0_94, %c0_95], %223 {strides = array<i32>} : memref<8x128xf32, #tpu.memory_space<vmem>>, vector<8x128xf32>,
    %228 = arith.index_cast %c5_i32 : i32 to index
    %c0_96 = arith.constant 0 : index
    %c0_97 = arith.constant 0 : index
    %229 = vector.load %arg3[%228, %c0_96, %c0_97] : memref<8x8x128xf32, #tpu.memory_space<vmem>>, vector<1x8x128xf32>
    %230 = vector.shape_cast %229 : vector<1x8x128xf32> to vector<8x128xf32>
    %231 = vector.shape_cast %225 : vector<8x128xf32> to vector<1x8x128xf32>
    tpu.vector_store %arg3[%228, %c0_96, %c0_97], %231 {strides = array<i32>} : memref<8x8x128xf32, #tpu.memory_space<vmem>>, vector<1x8x128xf32>,
    %c6_i32 = arith.constant 6 : i32
    %232 = arith.index_cast %c6_i32 : i32 to index
    %c0_98 = arith.constant 0 : index
    %c0_99 = arith.constant 0 : index
    %233 = vector.load %arg1[%232, %c0_98, %c0_99] : memref<8x8x512xf32, #tpu.memory_space<vmem>>, vector<1x8x512xf32>
    %234 = vector.shape_cast %233 : vector<1x8x512xf32> to vector<8x512xf32>
    %c0_100 = arith.constant 0 : index
    %c0_101 = arith.constant 0 : index
    %235 = vector.load %arg4[%c0_100, %c0_101] : memref<8x128xf32, #tpu.memory_space<vmem>>, vector<8x128xf32>
    %cst_102 = arith.constant dense<0.000000e+00> : vector<8x512xf32>
    %236 = tpu.matmul %235, %3, %cst_102 {dimension_numbers = #tpu.dot_dimension_numbers<[1], [0], [0], [1], [0, 0, 1, 1], [], []>} : vector<8x128xf32>, vector<128x512xf32>, vector<8x512xf32> -> vector<8x512xf32>
    %237 = arith.addf %234, %236 : vector<8x512xf32>
    %c0_103 = arith.constant 0 : index
    %c0_104 = arith.constant 0 : index
    %238 = vector.load %arg5[%c0_103, %c0_104] : memref<8x128xf32, #tpu.memory_space<vmem>>, vector<8x128xf32>
    %239 = vector.extract_strided_slice %237 {offsets = [0, 0], sizes = [8, 128], strides = [1, 1]} : vector<8x512xf32> to vector<8x128xf32>
    %240 = arith.negf %239 : vector<8x128xf32>
    %241 = math.exp %240 : vector<8x128xf32>
    %cst_105 = arith.constant 1.000000e+00 : f32
    %242 = vector.broadcast %cst_105 : f32 to vector<8x128xf32>
    %243 = arith.addf %242, %241 : vector<8x128xf32>
    %244 = arith.divf %242, %243 : vector<8x128xf32>
    %245 = vector.extract_strided_slice %237 {offsets = [0, 128], sizes = [8, 128], strides = [1, 1]} : vector<8x512xf32> to vector<8x128xf32>
    %246 = arith.negf %245 : vector<8x128xf32>
    %247 = math.exp %246 : vector<8x128xf32>
    %cst_106 = arith.constant 1.000000e+00 : f32
    %248 = vector.broadcast %cst_106 : f32 to vector<8x128xf32>
    %249 = arith.addf %248, %247 : vector<8x128xf32>
    %250 = arith.divf %248, %249 : vector<8x128xf32>
    %251 = vector.extract_strided_slice %237 {offsets = [0, 256], sizes = [8, 128], strides = [1, 1]} : vector<8x512xf32> to vector<8x128xf32>
    %252 = math.tanh %251 : vector<8x128xf32>
    %253 = vector.extract_strided_slice %237 {offsets = [0, 384], sizes = [8, 128], strides = [1, 1]} : vector<8x512xf32> to vector<8x128xf32>
    %254 = arith.negf %253 : vector<8x128xf32>
    %255 = math.exp %254 : vector<8x128xf32>
    %cst_107 = arith.constant 1.000000e+00 : f32
    %256 = vector.broadcast %cst_107 : f32 to vector<8x128xf32>
    %257 = arith.addf %256, %255 : vector<8x128xf32>
    %258 = arith.divf %256, %257 : vector<8x128xf32>
    %259 = arith.mulf %250, %238 : vector<8x128xf32>
    %260 = arith.mulf %244, %252 : vector<8x128xf32>
    %261 = arith.addf %259, %260 : vector<8x128xf32>
    %262 = math.tanh %261 : vector<8x128xf32>
    %263 = arith.mulf %258, %262 : vector<8x128xf32>
    %c0_108 = arith.constant 0 : index
    %c0_109 = arith.constant 0 : index
    %264 = vector.load %arg4[%c0_108, %c0_109] : memref<8x128xf32, #tpu.memory_space<vmem>>, vector<8x128xf32>
    tpu.vector_store %arg4[%c0_108, %c0_109], %263 {strides = array<i32>} : memref<8x128xf32, #tpu.memory_space<vmem>>, vector<8x128xf32>,
    %c0_110 = arith.constant 0 : index
    %c0_111 = arith.constant 0 : index
    %265 = vector.load %arg5[%c0_110, %c0_111] : memref<8x128xf32, #tpu.memory_space<vmem>>, vector<8x128xf32>
    tpu.vector_store %arg5[%c0_110, %c0_111], %261 {strides = array<i32>} : memref<8x128xf32, #tpu.memory_space<vmem>>, vector<8x128xf32>,
    %266 = arith.index_cast %c6_i32 : i32 to index
    %c0_112 = arith.constant 0 : index
    %c0_113 = arith.constant 0 : index
    %267 = vector.load %arg3[%266, %c0_112, %c0_113] : memref<8x8x128xf32, #tpu.memory_space<vmem>>, vector<1x8x128xf32>
    %268 = vector.shape_cast %267 : vector<1x8x128xf32> to vector<8x128xf32>
    %269 = vector.shape_cast %263 : vector<8x128xf32> to vector<1x8x128xf32>
    tpu.vector_store %arg3[%266, %c0_112, %c0_113], %269 {strides = array<i32>} : memref<8x8x128xf32, #tpu.memory_space<vmem>>, vector<1x8x128xf32>,
    %c7_i32 = arith.constant 7 : i32
    %270 = arith.index_cast %c7_i32 : i32 to index
    %c0_114 = arith.constant 0 : index
    %c0_115 = arith.constant 0 : index
    %271 = vector.load %arg1[%270, %c0_114, %c0_115] : memref<8x8x512xf32, #tpu.memory_space<vmem>>, vector<1x8x512xf32>
    %272 = vector.shape_cast %271 : vector<1x8x512xf32> to vector<8x512xf32>
    %c0_116 = arith.constant 0 : index
    %c0_117 = arith.constant 0 : index
    %273 = vector.load %arg4[%c0_116, %c0_117] : memref<8x128xf32, #tpu.memory_space<vmem>>, vector<8x128xf32>
    %cst_118 = arith.constant dense<0.000000e+00> : vector<8x512xf32>
    %274 = tpu.matmul %273, %3, %cst_118 {dimension_numbers = #tpu.dot_dimension_numbers<[1], [0], [0], [1], [0, 0, 1, 1], [], []>} : vector<8x128xf32>, vector<128x512xf32>, vector<8x512xf32> -> vector<8x512xf32>
    %275 = arith.addf %272, %274 : vector<8x512xf32>
    %c0_119 = arith.constant 0 : index
    %c0_120 = arith.constant 0 : index
    %276 = vector.load %arg5[%c0_119, %c0_120] : memref<8x128xf32, #tpu.memory_space<vmem>>, vector<8x128xf32>
    %277 = vector.extract_strided_slice %275 {offsets = [0, 0], sizes = [8, 128], strides = [1, 1]} : vector<8x512xf32> to vector<8x128xf32>
    %278 = arith.negf %277 : vector<8x128xf32>
    %279 = math.exp %278 : vector<8x128xf32>
    %cst_121 = arith.constant 1.000000e+00 : f32
    %280 = vector.broadcast %cst_121 : f32 to vector<8x128xf32>
    %281 = arith.addf %280, %279 : vector<8x128xf32>
    %282 = arith.divf %280, %281 : vector<8x128xf32>
    %283 = vector.extract_strided_slice %275 {offsets = [0, 128], sizes = [8, 128], strides = [1, 1]} : vector<8x512xf32> to vector<8x128xf32>
    %284 = arith.negf %283 : vector<8x128xf32>
    %285 = math.exp %284 : vector<8x128xf32>
    %cst_122 = arith.constant 1.000000e+00 : f32
    %286 = vector.broadcast %cst_122 : f32 to vector<8x128xf32>
    %287 = arith.addf %286, %285 : vector<8x128xf32>
    %288 = arith.divf %286, %287 : vector<8x128xf32>
    %289 = vector.extract_strided_slice %275 {offsets = [0, 256], sizes = [8, 128], strides = [1, 1]} : vector<8x512xf32> to vector<8x128xf32>
    %290 = math.tanh %289 : vector<8x128xf32>
    %291 = vector.extract_strided_slice %275 {offsets = [0, 384], sizes = [8, 128], strides = [1, 1]} : vector<8x512xf32> to vector<8x128xf32>
    %292 = arith.negf %291 : vector<8x128xf32>
    %293 = math.exp %292 : vector<8x128xf32>
    %cst_123 = arith.constant 1.000000e+00 : f32
    %294 = vector.broadcast %cst_123 : f32 to vector<8x128xf32>
    %295 = arith.addf %294, %293 : vector<8x128xf32>
    %296 = arith.divf %294, %295 : vector<8x128xf32>
    %297 = arith.mulf %288, %276 : vector<8x128xf32>
    %298 = arith.mulf %282, %290 : vector<8x128xf32>
    %299 = arith.addf %297, %298 : vector<8x128xf32>
    %300 = math.tanh %299 : vector<8x128xf32>
    %301 = arith.mulf %296, %300 : vector<8x128xf32>
    %c0_124 = arith.constant 0 : index
    %c0_125 = arith.constant 0 : index
    %302 = vector.load %arg4[%c0_124, %c0_125] : memref<8x128xf32, #tpu.memory_space<vmem>>, vector<8x128xf32>
    tpu.vector_store %arg4[%c0_124, %c0_125], %301 {strides = array<i32>} : memref<8x128xf32, #tpu.memory_space<vmem>>, vector<8x128xf32>,
    %c0_126 = arith.constant 0 : index
    %c0_127 = arith.constant 0 : index
    %303 = vector.load %arg5[%c0_126, %c0_127] : memref<8x128xf32, #tpu.memory_space<vmem>>, vector<8x128xf32>
    tpu.vector_store %arg5[%c0_126, %c0_127], %299 {strides = array<i32>} : memref<8x128xf32, #tpu.memory_space<vmem>>, vector<8x128xf32>,
    %304 = arith.index_cast %c7_i32 : i32 to index
    %c0_128 = arith.constant 0 : index
    %c0_129 = arith.constant 0 : index
    %305 = vector.load %arg3[%304, %c0_128, %c0_129] : memref<8x8x128xf32, #tpu.memory_space<vmem>>, vector<1x8x128xf32>
    %306 = vector.shape_cast %305 : vector<1x8x128xf32> to vector<8x128xf32>
    %307 = vector.shape_cast %301 : vector<8x128xf32> to vector<1x8x128xf32>
    tpu.vector_store %arg3[%304, %c0_128, %c0_129], %307 {strides = array<i32>} : memref<8x8x128xf32, #tpu.memory_space<vmem>>, vector<1x8x128xf32>,
    %c8_i32 = arith.constant 8 : i32
    return
  }
  func.func @transform_0(%arg0: i32) -> (i32, i32, i32) {
    %c0_i32 = arith.constant 0 : i32
    %c0_i32_0 = arith.constant 0 : i32
    %c0_i32_1 = arith.constant 0 : i32
    return %arg0, %c0_i32, %c0_i32_0 : i32, i32, i32
  }
  func.func @transform_1(%arg0: i32) -> (i32, i32) {
    %c0_i32 = arith.constant 0 : i32
    %c0_i32_0 = arith.constant 0 : i32
    %c0_i32_1 = arith.constant 0 : i32
    return %c0_i32, %c0_i32_0 : i32, i32
  }
  func.func @transform_2(%arg0: i32) -> (i32, i32, i32) {
    %c0_i32 = arith.constant 0 : i32
    %c0_i32_0 = arith.constant 0 : i32
    %c0_i32_1 = arith.constant 0 : i32
    return %arg0, %c0_i32, %c0_i32_0 : i32, i32, i32
  }
}

module attributes {stable_mosaic.version = 11 : i64} {
  func.func @_input_proj_kernel(%arg0: i32, %arg1: memref<64x128xf32, #tpu.memory_space<vmem>>, %arg2: memref<128x512xf32, #tpu.memory_space<vmem>>, %arg3: memref<1x512xf32, #tpu.memory_space<vmem>>, %arg4: memref<64x512xf32, #tpu.memory_space<vmem>>) attributes {dimension_semantics = [#tpu.dimension_semantics<parallel>], iteration_bounds = array<i64: 1>, scalar_prefetch = 0 : i64, scratch_operands = 0 : i64, tpu.core_type = #tpu.core_type<tc>, window_params = [{transform_indices = @transform_0, window_bounds = array<i64: 64, 128>}, {pipeline_mode = #tpu.pipeline_mode<synchronous>, transform_indices = @transform_1, window_bounds = array<i64: 128, 512>}, {pipeline_mode = #tpu.pipeline_mode<synchronous>, transform_indices = @transform_2, window_bounds = array<i64: 1, 512>}, {transform_indices = @transform_3, window_bounds = array<i64: 64, 512>}]} {
    %c0 = arith.constant 0 : index
    %c0_0 = arith.constant 0 : index
    %0 = vector.load %arg1[%c0, %c0_0] : memref<64x128xf32, #tpu.memory_space<vmem>>, vector<64x128xf32>
    %c0_1 = arith.constant 0 : index
    %c0_2 = arith.constant 0 : index
    %1 = vector.load %arg2[%c0_1, %c0_2] : memref<128x512xf32, #tpu.memory_space<vmem>>, vector<128x512xf32>
    %cst = arith.constant dense<0.000000e+00> : vector<64x512xf32>
    %2 = tpu.matmul %0, %1, %cst {dimension_numbers = #tpu.dot_dimension_numbers<[1], [0], [0], [1], [0, 0, 1, 1], [], []>} : vector<64x128xf32>, vector<128x512xf32>, vector<64x512xf32> -> vector<64x512xf32>
    %c0_3 = arith.constant 0 : index
    %c0_4 = arith.constant 0 : index
    %3 = vector.load %arg3[%c0_3, %c0_4] : memref<1x512xf32, #tpu.memory_space<vmem>>, vector<1x512xf32>
    %4 = vector.broadcast %3 : vector<1x512xf32> to vector<64x512xf32>
    %5 = arith.addf %2, %4 : vector<64x512xf32>
    %c0_5 = arith.constant 0 : index
    %c0_6 = arith.constant 0 : index
    %6 = vector.load %arg4[%c0_5, %c0_6] : memref<64x512xf32, #tpu.memory_space<vmem>>, vector<64x512xf32>
    tpu.vector_store %arg4[%c0_5, %c0_6], %5 {strides = array<i32>} : memref<64x512xf32, #tpu.memory_space<vmem>>, vector<64x512xf32>,
    return
  }
  func.func @transform_0(%arg0: i32) -> (i32, i32) {
    %c0_i32 = arith.constant 0 : i32
    %c0_i32_0 = arith.constant 0 : i32
    return %arg0, %c0_i32 : i32, i32
  }
  func.func @transform_1(%arg0: i32) -> (i32, i32) {
    %c0_i32 = arith.constant 0 : i32
    %c0_i32_0 = arith.constant 0 : i32
    %c0_i32_1 = arith.constant 0 : i32
    return %c0_i32, %c0_i32_0 : i32, i32
  }
  func.func @transform_2(%arg0: i32) -> (i32, i32) {
    %c0_i32 = arith.constant 0 : i32
    %c0_i32_0 = arith.constant 0 : i32
    %c0_i32_1 = arith.constant 0 : i32
    return %c0_i32, %c0_i32_0 : i32, i32
  }
  func.func @transform_3(%arg0: i32) -> (i32, i32) {
    %c0_i32 = arith.constant 0 : i32
    %c0_i32_0 = arith.constant 0 : i32
    return %arg0, %c0_i32 : i32, i32
  }
}

module attributes {stable_mosaic.version = 11 : i64} {
  func.func @_lstm_last_kernel(%arg0: i32, %arg1: memref<8x8x512xf32, #tpu.memory_space<vmem>>, %arg2: memref<128x512xf32, #tpu.memory_space<vmem>>, %arg3: memref<1x128xf32, #tpu.memory_space<vmem>>, %arg4: memref<1x1xf32, #tpu.memory_space<vmem>>, %arg5: memref<8x1xf32, #tpu.memory_space<vmem>>, %arg6: memref<8x128xf32, #tpu.memory_space<vmem>>, %arg7: memref<8x128xf32, #tpu.memory_space<vmem>>) attributes {dimension_semantics = [#tpu.dimension_semantics<arbitrary>], iteration_bounds = array<i64: 1>, scalar_prefetch = 0 : i64, scratch_operands = 2 : i64, tpu.core_type = #tpu.core_type<tc>, window_params = [{transform_indices = @transform_0, window_bounds = array<i64: 8, 8, 512>}, {pipeline_mode = #tpu.pipeline_mode<synchronous>, transform_indices = @transform_1, window_bounds = array<i64: 128, 512>}, {pipeline_mode = #tpu.pipeline_mode<synchronous>, transform_indices = @transform_2, window_bounds = array<i64: 1, 128>}, {pipeline_mode = #tpu.pipeline_mode<synchronous>, transform_indices = @transform_3, window_bounds = array<i64: 1, 1>}, {pipeline_mode = #tpu.pipeline_mode<synchronous>, transform_indices = @transform_4, window_bounds = array<i64: 8, 1>}]} {
    %c0_i32 = arith.constant 0 : i32
    %0 = arith.cmpi eq, %arg0, %c0_i32 : i32
    %1 = arith.extui %0 : i1 to i32
    %c0_i32_0 = arith.constant 0 : i32
    %2 = arith.cmpi ne, %1, %c0_i32_0 : i32
    scf.if %2 {
      %cst_116 = arith.constant 0.000000e+00 : f32
      %279 = vector.broadcast %cst_116 : f32 to vector<8x128xf32>
      %c0_117 = arith.constant 0 : index
      %c0_118 = arith.constant 0 : index
      %280 = vector.load %arg6[%c0_117, %c0_118] : memref<8x128xf32, #tpu.memory_space<vmem>>, vector<8x128xf32>
      tpu.vector_store %arg6[%c0_117, %c0_118], %279 {strides = array<i32>} : memref<8x128xf32, #tpu.memory_space<vmem>>, vector<8x128xf32>,
      %cst_119 = arith.constant 0.000000e+00 : f32
      %281 = vector.broadcast %cst_119 : f32 to vector<8x128xf32>
      %c0_120 = arith.constant 0 : index
      %c0_121 = arith.constant 0 : index
      %282 = vector.load %arg7[%c0_120, %c0_121] : memref<8x128xf32, #tpu.memory_space<vmem>>, vector<8x128xf32>
      tpu.vector_store %arg7[%c0_120, %c0_121], %281 {strides = array<i32>} : memref<8x128xf32, #tpu.memory_space<vmem>>, vector<8x128xf32>,
      %cst_122 = arith.constant 0.000000e+00 : f32
      %283 = vector.broadcast %cst_122 : f32 to vector<8x1xf32>
      %c0_123 = arith.constant 0 : index
      %c0_124 = arith.constant 0 : index
      %284 = vector.load %arg5[%c0_123, %c0_124] : memref<8x1xf32, #tpu.memory_space<vmem>>, vector<8x1xf32>
      tpu.vector_store %arg5[%c0_123, %c0_124], %283 {strides = array<i32>} : memref<8x1xf32, #tpu.memory_space<vmem>>, vector<8x1xf32>,
    } else {
    }
    %c0 = arith.constant 0 : index
    %c0_1 = arith.constant 0 : index
    %3 = vector.load %arg2[%c0, %c0_1] : memref<128x512xf32, #tpu.memory_space<vmem>>, vector<128x512xf32>
    %c0_i32_2 = arith.constant 0 : i32
    %4 = arith.index_cast %c0_i32_2 : i32 to index
    %c0_3 = arith.constant 0 : index
    %c0_4 = arith.constant 0 : index
    %5 = vector.load %arg1[%4, %c0_3, %c0_4] : memref<8x8x512xf32, #tpu.memory_space<vmem>>, vector<1x8x512xf32>
    %6 = vector.shape_cast %5 : vector<1x8x512xf32> to vector<8x512xf32>
    %c0_5 = arith.constant 0 : index
    %c0_6 = arith.constant 0 : index
    %7 = vector.load %arg6[%c0_5, %c0_6] : memref<8x128xf32, #tpu.memory_space<vmem>>, vector<8x128xf32>
    %cst = arith.constant dense<0.000000e+00> : vector<8x512xf32>
    %8 = tpu.matmul %7, %3, %cst {dimension_numbers = #tpu.dot_dimension_numbers<[1], [0], [0], [1], [0, 0, 1, 1], [], []>} : vector<8x128xf32>, vector<128x512xf32>, vector<8x512xf32> -> vector<8x512xf32>
    %9 = arith.addf %6, %8 : vector<8x512xf32>
    %c0_7 = arith.constant 0 : index
    %c0_8 = arith.constant 0 : index
    %10 = vector.load %arg7[%c0_7, %c0_8] : memref<8x128xf32, #tpu.memory_space<vmem>>, vector<8x128xf32>
    %11 = vector.extract_strided_slice %9 {offsets = [0, 0], sizes = [8, 128], strides = [1, 1]} : vector<8x512xf32> to vector<8x128xf32>
    %12 = arith.negf %11 : vector<8x128xf32>
    %13 = math.exp %12 : vector<8x128xf32>
    %cst_9 = arith.constant 1.000000e+00 : f32
    %14 = vector.broadcast %cst_9 : f32 to vector<8x128xf32>
    %15 = arith.addf %14, %13 : vector<8x128xf32>
    %16 = arith.divf %14, %15 : vector<8x128xf32>
    %17 = vector.extract_strided_slice %9 {offsets = [0, 128], sizes = [8, 128], strides = [1, 1]} : vector<8x512xf32> to vector<8x128xf32>
    %18 = arith.negf %17 : vector<8x128xf32>
    %19 = math.exp %18 : vector<8x128xf32>
    %cst_10 = arith.constant 1.000000e+00 : f32
    %20 = vector.broadcast %cst_10 : f32 to vector<8x128xf32>
    %21 = arith.addf %20, %19 : vector<8x128xf32>
    %22 = arith.divf %20, %21 : vector<8x128xf32>
    %23 = vector.extract_strided_slice %9 {offsets = [0, 256], sizes = [8, 128], strides = [1, 1]} : vector<8x512xf32> to vector<8x128xf32>
    %24 = math.tanh %23 : vector<8x128xf32>
    %25 = vector.extract_strided_slice %9 {offsets = [0, 384], sizes = [8, 128], strides = [1, 1]} : vector<8x512xf32> to vector<8x128xf32>
    %26 = arith.negf %25 : vector<8x128xf32>
    %27 = math.exp %26 : vector<8x128xf32>
    %cst_11 = arith.constant 1.000000e+00 : f32
    %28 = vector.broadcast %cst_11 : f32 to vector<8x128xf32>
    %29 = arith.addf %28, %27 : vector<8x128xf32>
    %30 = arith.divf %28, %29 : vector<8x128xf32>
    %31 = arith.mulf %22, %10 : vector<8x128xf32>
    %32 = arith.mulf %16, %24 : vector<8x128xf32>
    %33 = arith.addf %31, %32 : vector<8x128xf32>
    %34 = math.tanh %33 : vector<8x128xf32>
    %35 = arith.mulf %30, %34 : vector<8x128xf32>
    %c0_12 = arith.constant 0 : index
    %c0_13 = arith.constant 0 : index
    %36 = vector.load %arg6[%c0_12, %c0_13] : memref<8x128xf32, #tpu.memory_space<vmem>>, vector<8x128xf32>
    tpu.vector_store %arg6[%c0_12, %c0_13], %35 {strides = array<i32>} : memref<8x128xf32, #tpu.memory_space<vmem>>, vector<8x128xf32>,
    %c0_14 = arith.constant 0 : index
    %c0_15 = arith.constant 0 : index
    %37 = vector.load %arg7[%c0_14, %c0_15] : memref<8x128xf32, #tpu.memory_space<vmem>>, vector<8x128xf32>
    tpu.vector_store %arg7[%c0_14, %c0_15], %33 {strides = array<i32>} : memref<8x128xf32, #tpu.memory_space<vmem>>, vector<8x128xf32>,
    %c1_i32 = arith.constant 1 : i32
    %38 = arith.index_cast %c1_i32 : i32 to index
    %c0_16 = arith.constant 0 : index
    %c0_17 = arith.constant 0 : index
    %39 = vector.load %arg1[%38, %c0_16, %c0_17] : memref<8x8x512xf32, #tpu.memory_space<vmem>>, vector<1x8x512xf32>
    %40 = vector.shape_cast %39 : vector<1x8x512xf32> to vector<8x512xf32>
    %c0_18 = arith.constant 0 : index
    %c0_19 = arith.constant 0 : index
    %41 = vector.load %arg6[%c0_18, %c0_19] : memref<8x128xf32, #tpu.memory_space<vmem>>, vector<8x128xf32>
    %cst_20 = arith.constant dense<0.000000e+00> : vector<8x512xf32>
    %42 = tpu.matmul %41, %3, %cst_20 {dimension_numbers = #tpu.dot_dimension_numbers<[1], [0], [0], [1], [0, 0, 1, 1], [], []>} : vector<8x128xf32>, vector<128x512xf32>, vector<8x512xf32> -> vector<8x512xf32>
    %43 = arith.addf %40, %42 : vector<8x512xf32>
    %c0_21 = arith.constant 0 : index
    %c0_22 = arith.constant 0 : index
    %44 = vector.load %arg7[%c0_21, %c0_22] : memref<8x128xf32, #tpu.memory_space<vmem>>, vector<8x128xf32>
    %45 = vector.extract_strided_slice %43 {offsets = [0, 0], sizes = [8, 128], strides = [1, 1]} : vector<8x512xf32> to vector<8x128xf32>
    %46 = arith.negf %45 : vector<8x128xf32>
    %47 = math.exp %46 : vector<8x128xf32>
    %cst_23 = arith.constant 1.000000e+00 : f32
    %48 = vector.broadcast %cst_23 : f32 to vector<8x128xf32>
    %49 = arith.addf %48, %47 : vector<8x128xf32>
    %50 = arith.divf %48, %49 : vector<8x128xf32>
    %51 = vector.extract_strided_slice %43 {offsets = [0, 128], sizes = [8, 128], strides = [1, 1]} : vector<8x512xf32> to vector<8x128xf32>
    %52 = arith.negf %51 : vector<8x128xf32>
    %53 = math.exp %52 : vector<8x128xf32>
    %cst_24 = arith.constant 1.000000e+00 : f32
    %54 = vector.broadcast %cst_24 : f32 to vector<8x128xf32>
    %55 = arith.addf %54, %53 : vector<8x128xf32>
    %56 = arith.divf %54, %55 : vector<8x128xf32>
    %57 = vector.extract_strided_slice %43 {offsets = [0, 256], sizes = [8, 128], strides = [1, 1]} : vector<8x512xf32> to vector<8x128xf32>
    %58 = math.tanh %57 : vector<8x128xf32>
    %59 = vector.extract_strided_slice %43 {offsets = [0, 384], sizes = [8, 128], strides = [1, 1]} : vector<8x512xf32> to vector<8x128xf32>
    %60 = arith.negf %59 : vector<8x128xf32>
    %61 = math.exp %60 : vector<8x128xf32>
    %cst_25 = arith.constant 1.000000e+00 : f32
    %62 = vector.broadcast %cst_25 : f32 to vector<8x128xf32>
    %63 = arith.addf %62, %61 : vector<8x128xf32>
    %64 = arith.divf %62, %63 : vector<8x128xf32>
    %65 = arith.mulf %56, %44 : vector<8x128xf32>
    %66 = arith.mulf %50, %58 : vector<8x128xf32>
    %67 = arith.addf %65, %66 : vector<8x128xf32>
    %68 = math.tanh %67 : vector<8x128xf32>
    %69 = arith.mulf %64, %68 : vector<8x128xf32>
    %c0_26 = arith.constant 0 : index
    %c0_27 = arith.constant 0 : index
    %70 = vector.load %arg6[%c0_26, %c0_27] : memref<8x128xf32, #tpu.memory_space<vmem>>, vector<8x128xf32>
    tpu.vector_store %arg6[%c0_26, %c0_27], %69 {strides = array<i32>} : memref<8x128xf32, #tpu.memory_space<vmem>>, vector<8x128xf32>,
    %c0_28 = arith.constant 0 : index
    %c0_29 = arith.constant 0 : index
    %71 = vector.load %arg7[%c0_28, %c0_29] : memref<8x128xf32, #tpu.memory_space<vmem>>, vector<8x128xf32>
    tpu.vector_store %arg7[%c0_28, %c0_29], %67 {strides = array<i32>} : memref<8x128xf32, #tpu.memory_space<vmem>>, vector<8x128xf32>,
    %c2_i32 = arith.constant 2 : i32
    %72 = arith.index_cast %c2_i32 : i32 to index
    %c0_30 = arith.constant 0 : index
    %c0_31 = arith.constant 0 : index
    %73 = vector.load %arg1[%72, %c0_30, %c0_31] : memref<8x8x512xf32, #tpu.memory_space<vmem>>, vector<1x8x512xf32>
    %74 = vector.shape_cast %73 : vector<1x8x512xf32> to vector<8x512xf32>
    %c0_32 = arith.constant 0 : index
    %c0_33 = arith.constant 0 : index
    %75 = vector.load %arg6[%c0_32, %c0_33] : memref<8x128xf32, #tpu.memory_space<vmem>>, vector<8x128xf32>
    %cst_34 = arith.constant dense<0.000000e+00> : vector<8x512xf32>
    %76 = tpu.matmul %75, %3, %cst_34 {dimension_numbers = #tpu.dot_dimension_numbers<[1], [0], [0], [1], [0, 0, 1, 1], [], []>} : vector<8x128xf32>, vector<128x512xf32>, vector<8x512xf32> -> vector<8x512xf32>
    %77 = arith.addf %74, %76 : vector<8x512xf32>
    %c0_35 = arith.constant 0 : index
    %c0_36 = arith.constant 0 : index
    %78 = vector.load %arg7[%c0_35, %c0_36] : memref<8x128xf32, #tpu.memory_space<vmem>>, vector<8x128xf32>
    %79 = vector.extract_strided_slice %77 {offsets = [0, 0], sizes = [8, 128], strides = [1, 1]} : vector<8x512xf32> to vector<8x128xf32>
    %80 = arith.negf %79 : vector<8x128xf32>
    %81 = math.exp %80 : vector<8x128xf32>
    %cst_37 = arith.constant 1.000000e+00 : f32
    %82 = vector.broadcast %cst_37 : f32 to vector<8x128xf32>
    %83 = arith.addf %82, %81 : vector<8x128xf32>
    %84 = arith.divf %82, %83 : vector<8x128xf32>
    %85 = vector.extract_strided_slice %77 {offsets = [0, 128], sizes = [8, 128], strides = [1, 1]} : vector<8x512xf32> to vector<8x128xf32>
    %86 = arith.negf %85 : vector<8x128xf32>
    %87 = math.exp %86 : vector<8x128xf32>
    %cst_38 = arith.constant 1.000000e+00 : f32
    %88 = vector.broadcast %cst_38 : f32 to vector<8x128xf32>
    %89 = arith.addf %88, %87 : vector<8x128xf32>
    %90 = arith.divf %88, %89 : vector<8x128xf32>
    %91 = vector.extract_strided_slice %77 {offsets = [0, 256], sizes = [8, 128], strides = [1, 1]} : vector<8x512xf32> to vector<8x128xf32>
    %92 = math.tanh %91 : vector<8x128xf32>
    %93 = vector.extract_strided_slice %77 {offsets = [0, 384], sizes = [8, 128], strides = [1, 1]} : vector<8x512xf32> to vector<8x128xf32>
    %94 = arith.negf %93 : vector<8x128xf32>
    %95 = math.exp %94 : vector<8x128xf32>
    %cst_39 = arith.constant 1.000000e+00 : f32
    %96 = vector.broadcast %cst_39 : f32 to vector<8x128xf32>
    %97 = arith.addf %96, %95 : vector<8x128xf32>
    %98 = arith.divf %96, %97 : vector<8x128xf32>
    %99 = arith.mulf %90, %78 : vector<8x128xf32>
    %100 = arith.mulf %84, %92 : vector<8x128xf32>
    %101 = arith.addf %99, %100 : vector<8x128xf32>
    %102 = math.tanh %101 : vector<8x128xf32>
    %103 = arith.mulf %98, %102 : vector<8x128xf32>
    %c0_40 = arith.constant 0 : index
    %c0_41 = arith.constant 0 : index
    %104 = vector.load %arg6[%c0_40, %c0_41] : memref<8x128xf32, #tpu.memory_space<vmem>>, vector<8x128xf32>
    tpu.vector_store %arg6[%c0_40, %c0_41], %103 {strides = array<i32>} : memref<8x128xf32, #tpu.memory_space<vmem>>, vector<8x128xf32>,
    %c0_42 = arith.constant 0 : index
    %c0_43 = arith.constant 0 : index
    %105 = vector.load %arg7[%c0_42, %c0_43] : memref<8x128xf32, #tpu.memory_space<vmem>>, vector<8x128xf32>
    tpu.vector_store %arg7[%c0_42, %c0_43], %101 {strides = array<i32>} : memref<8x128xf32, #tpu.memory_space<vmem>>, vector<8x128xf32>,
    %c3_i32 = arith.constant 3 : i32
    %106 = arith.index_cast %c3_i32 : i32 to index
    %c0_44 = arith.constant 0 : index
    %c0_45 = arith.constant 0 : index
    %107 = vector.load %arg1[%106, %c0_44, %c0_45] : memref<8x8x512xf32, #tpu.memory_space<vmem>>, vector<1x8x512xf32>
    %108 = vector.shape_cast %107 : vector<1x8x512xf32> to vector<8x512xf32>
    %c0_46 = arith.constant 0 : index
    %c0_47 = arith.constant 0 : index
    %109 = vector.load %arg6[%c0_46, %c0_47] : memref<8x128xf32, #tpu.memory_space<vmem>>, vector<8x128xf32>
    %cst_48 = arith.constant dense<0.000000e+00> : vector<8x512xf32>
    %110 = tpu.matmul %109, %3, %cst_48 {dimension_numbers = #tpu.dot_dimension_numbers<[1], [0], [0], [1], [0, 0, 1, 1], [], []>} : vector<8x128xf32>, vector<128x512xf32>, vector<8x512xf32> -> vector<8x512xf32>
    %111 = arith.addf %108, %110 : vector<8x512xf32>
    %c0_49 = arith.constant 0 : index
    %c0_50 = arith.constant 0 : index
    %112 = vector.load %arg7[%c0_49, %c0_50] : memref<8x128xf32, #tpu.memory_space<vmem>>, vector<8x128xf32>
    %113 = vector.extract_strided_slice %111 {offsets = [0, 0], sizes = [8, 128], strides = [1, 1]} : vector<8x512xf32> to vector<8x128xf32>
    %114 = arith.negf %113 : vector<8x128xf32>
    %115 = math.exp %114 : vector<8x128xf32>
    %cst_51 = arith.constant 1.000000e+00 : f32
    %116 = vector.broadcast %cst_51 : f32 to vector<8x128xf32>
    %117 = arith.addf %116, %115 : vector<8x128xf32>
    %118 = arith.divf %116, %117 : vector<8x128xf32>
    %119 = vector.extract_strided_slice %111 {offsets = [0, 128], sizes = [8, 128], strides = [1, 1]} : vector<8x512xf32> to vector<8x128xf32>
    %120 = arith.negf %119 : vector<8x128xf32>
    %121 = math.exp %120 : vector<8x128xf32>
    %cst_52 = arith.constant 1.000000e+00 : f32
    %122 = vector.broadcast %cst_52 : f32 to vector<8x128xf32>
    %123 = arith.addf %122, %121 : vector<8x128xf32>
    %124 = arith.divf %122, %123 : vector<8x128xf32>
    %125 = vector.extract_strided_slice %111 {offsets = [0, 256], sizes = [8, 128], strides = [1, 1]} : vector<8x512xf32> to vector<8x128xf32>
    %126 = math.tanh %125 : vector<8x128xf32>
    %127 = vector.extract_strided_slice %111 {offsets = [0, 384], sizes = [8, 128], strides = [1, 1]} : vector<8x512xf32> to vector<8x128xf32>
    %128 = arith.negf %127 : vector<8x128xf32>
    %129 = math.exp %128 : vector<8x128xf32>
    %cst_53 = arith.constant 1.000000e+00 : f32
    %130 = vector.broadcast %cst_53 : f32 to vector<8x128xf32>
    %131 = arith.addf %130, %129 : vector<8x128xf32>
    %132 = arith.divf %130, %131 : vector<8x128xf32>
    %133 = arith.mulf %124, %112 : vector<8x128xf32>
    %134 = arith.mulf %118, %126 : vector<8x128xf32>
    %135 = arith.addf %133, %134 : vector<8x128xf32>
    %136 = math.tanh %135 : vector<8x128xf32>
    %137 = arith.mulf %132, %136 : vector<8x128xf32>
    %c0_54 = arith.constant 0 : index
    %c0_55 = arith.constant 0 : index
    %138 = vector.load %arg6[%c0_54, %c0_55] : memref<8x128xf32, #tpu.memory_space<vmem>>, vector<8x128xf32>
    tpu.vector_store %arg6[%c0_54, %c0_55], %137 {strides = array<i32>} : memref<8x128xf32, #tpu.memory_space<vmem>>, vector<8x128xf32>,
    %c0_56 = arith.constant 0 : index
    %c0_57 = arith.constant 0 : index
    %139 = vector.load %arg7[%c0_56, %c0_57] : memref<8x128xf32, #tpu.memory_space<vmem>>, vector<8x128xf32>
    tpu.vector_store %arg7[%c0_56, %c0_57], %135 {strides = array<i32>} : memref<8x128xf32, #tpu.memory_space<vmem>>, vector<8x128xf32>,
    %c4_i32 = arith.constant 4 : i32
    %140 = arith.index_cast %c4_i32 : i32 to index
    %c0_58 = arith.constant 0 : index
    %c0_59 = arith.constant 0 : index
    %141 = vector.load %arg1[%140, %c0_58, %c0_59] : memref<8x8x512xf32, #tpu.memory_space<vmem>>, vector<1x8x512xf32>
    %142 = vector.shape_cast %141 : vector<1x8x512xf32> to vector<8x512xf32>
    %c0_60 = arith.constant 0 : index
    %c0_61 = arith.constant 0 : index
    %143 = vector.load %arg6[%c0_60, %c0_61] : memref<8x128xf32, #tpu.memory_space<vmem>>, vector<8x128xf32>
    %cst_62 = arith.constant dense<0.000000e+00> : vector<8x512xf32>
    %144 = tpu.matmul %143, %3, %cst_62 {dimension_numbers = #tpu.dot_dimension_numbers<[1], [0], [0], [1], [0, 0, 1, 1], [], []>} : vector<8x128xf32>, vector<128x512xf32>, vector<8x512xf32> -> vector<8x512xf32>
    %145 = arith.addf %142, %144 : vector<8x512xf32>
    %c0_63 = arith.constant 0 : index
    %c0_64 = arith.constant 0 : index
    %146 = vector.load %arg7[%c0_63, %c0_64] : memref<8x128xf32, #tpu.memory_space<vmem>>, vector<8x128xf32>
    %147 = vector.extract_strided_slice %145 {offsets = [0, 0], sizes = [8, 128], strides = [1, 1]} : vector<8x512xf32> to vector<8x128xf32>
    %148 = arith.negf %147 : vector<8x128xf32>
    %149 = math.exp %148 : vector<8x128xf32>
    %cst_65 = arith.constant 1.000000e+00 : f32
    %150 = vector.broadcast %cst_65 : f32 to vector<8x128xf32>
    %151 = arith.addf %150, %149 : vector<8x128xf32>
    %152 = arith.divf %150, %151 : vector<8x128xf32>
    %153 = vector.extract_strided_slice %145 {offsets = [0, 128], sizes = [8, 128], strides = [1, 1]} : vector<8x512xf32> to vector<8x128xf32>
    %154 = arith.negf %153 : vector<8x128xf32>
    %155 = math.exp %154 : vector<8x128xf32>
    %cst_66 = arith.constant 1.000000e+00 : f32
    %156 = vector.broadcast %cst_66 : f32 to vector<8x128xf32>
    %157 = arith.addf %156, %155 : vector<8x128xf32>
    %158 = arith.divf %156, %157 : vector<8x128xf32>
    %159 = vector.extract_strided_slice %145 {offsets = [0, 256], sizes = [8, 128], strides = [1, 1]} : vector<8x512xf32> to vector<8x128xf32>
    %160 = math.tanh %159 : vector<8x128xf32>
    %161 = vector.extract_strided_slice %145 {offsets = [0, 384], sizes = [8, 128], strides = [1, 1]} : vector<8x512xf32> to vector<8x128xf32>
    %162 = arith.negf %161 : vector<8x128xf32>
    %163 = math.exp %162 : vector<8x128xf32>
    %cst_67 = arith.constant 1.000000e+00 : f32
    %164 = vector.broadcast %cst_67 : f32 to vector<8x128xf32>
    %165 = arith.addf %164, %163 : vector<8x128xf32>
    %166 = arith.divf %164, %165 : vector<8x128xf32>
    %167 = arith.mulf %158, %146 : vector<8x128xf32>
    %168 = arith.mulf %152, %160 : vector<8x128xf32>
    %169 = arith.addf %167, %168 : vector<8x128xf32>
    %170 = math.tanh %169 : vector<8x128xf32>
    %171 = arith.mulf %166, %170 : vector<8x128xf32>
    %c0_68 = arith.constant 0 : index
    %c0_69 = arith.constant 0 : index
    %172 = vector.load %arg6[%c0_68, %c0_69] : memref<8x128xf32, #tpu.memory_space<vmem>>, vector<8x128xf32>
    tpu.vector_store %arg6[%c0_68, %c0_69], %171 {strides = array<i32>} : memref<8x128xf32, #tpu.memory_space<vmem>>, vector<8x128xf32>,
    %c0_70 = arith.constant 0 : index
    %c0_71 = arith.constant 0 : index
    %173 = vector.load %arg7[%c0_70, %c0_71] : memref<8x128xf32, #tpu.memory_space<vmem>>, vector<8x128xf32>
    tpu.vector_store %arg7[%c0_70, %c0_71], %169 {strides = array<i32>} : memref<8x128xf32, #tpu.memory_space<vmem>>, vector<8x128xf32>,
    %c5_i32 = arith.constant 5 : i32
    %174 = arith.index_cast %c5_i32 : i32 to index
    %c0_72 = arith.constant 0 : index
    %c0_73 = arith.constant 0 : index
    %175 = vector.load %arg1[%174, %c0_72, %c0_73] : memref<8x8x512xf32, #tpu.memory_space<vmem>>, vector<1x8x512xf32>
    %176 = vector.shape_cast %175 : vector<1x8x512xf32> to vector<8x512xf32>
    %c0_74 = arith.constant 0 : index
    %c0_75 = arith.constant 0 : index
    %177 = vector.load %arg6[%c0_74, %c0_75] : memref<8x128xf32, #tpu.memory_space<vmem>>, vector<8x128xf32>
    %cst_76 = arith.constant dense<0.000000e+00> : vector<8x512xf32>
    %178 = tpu.matmul %177, %3, %cst_76 {dimension_numbers = #tpu.dot_dimension_numbers<[1], [0], [0], [1], [0, 0, 1, 1], [], []>} : vector<8x128xf32>, vector<128x512xf32>, vector<8x512xf32> -> vector<8x512xf32>
    %179 = arith.addf %176, %178 : vector<8x512xf32>
    %c0_77 = arith.constant 0 : index
    %c0_78 = arith.constant 0 : index
    %180 = vector.load %arg7[%c0_77, %c0_78] : memref<8x128xf32, #tpu.memory_space<vmem>>, vector<8x128xf32>
    %181 = vector.extract_strided_slice %179 {offsets = [0, 0], sizes = [8, 128], strides = [1, 1]} : vector<8x512xf32> to vector<8x128xf32>
    %182 = arith.negf %181 : vector<8x128xf32>
    %183 = math.exp %182 : vector<8x128xf32>
    %cst_79 = arith.constant 1.000000e+00 : f32
    %184 = vector.broadcast %cst_79 : f32 to vector<8x128xf32>
    %185 = arith.addf %184, %183 : vector<8x128xf32>
    %186 = arith.divf %184, %185 : vector<8x128xf32>
    %187 = vector.extract_strided_slice %179 {offsets = [0, 128], sizes = [8, 128], strides = [1, 1]} : vector<8x512xf32> to vector<8x128xf32>
    %188 = arith.negf %187 : vector<8x128xf32>
    %189 = math.exp %188 : vector<8x128xf32>
    %cst_80 = arith.constant 1.000000e+00 : f32
    %190 = vector.broadcast %cst_80 : f32 to vector<8x128xf32>
    %191 = arith.addf %190, %189 : vector<8x128xf32>
    %192 = arith.divf %190, %191 : vector<8x128xf32>
    %193 = vector.extract_strided_slice %179 {offsets = [0, 256], sizes = [8, 128], strides = [1, 1]} : vector<8x512xf32> to vector<8x128xf32>
    %194 = math.tanh %193 : vector<8x128xf32>
    %195 = vector.extract_strided_slice %179 {offsets = [0, 384], sizes = [8, 128], strides = [1, 1]} : vector<8x512xf32> to vector<8x128xf32>
    %196 = arith.negf %195 : vector<8x128xf32>
    %197 = math.exp %196 : vector<8x128xf32>
    %cst_81 = arith.constant 1.000000e+00 : f32
    %198 = vector.broadcast %cst_81 : f32 to vector<8x128xf32>
    %199 = arith.addf %198, %197 : vector<8x128xf32>
    %200 = arith.divf %198, %199 : vector<8x128xf32>
    %201 = arith.mulf %192, %180 : vector<8x128xf32>
    %202 = arith.mulf %186, %194 : vector<8x128xf32>
    %203 = arith.addf %201, %202 : vector<8x128xf32>
    %204 = math.tanh %203 : vector<8x128xf32>
    %205 = arith.mulf %200, %204 : vector<8x128xf32>
    %c0_82 = arith.constant 0 : index
    %c0_83 = arith.constant 0 : index
    %206 = vector.load %arg6[%c0_82, %c0_83] : memref<8x128xf32, #tpu.memory_space<vmem>>, vector<8x128xf32>
    tpu.vector_store %arg6[%c0_82, %c0_83], %205 {strides = array<i32>} : memref<8x128xf32, #tpu.memory_space<vmem>>, vector<8x128xf32>,
    %c0_84 = arith.constant 0 : index
    %c0_85 = arith.constant 0 : index
    %207 = vector.load %arg7[%c0_84, %c0_85] : memref<8x128xf32, #tpu.memory_space<vmem>>, vector<8x128xf32>
    tpu.vector_store %arg7[%c0_84, %c0_85], %203 {strides = array<i32>} : memref<8x128xf32, #tpu.memory_space<vmem>>, vector<8x128xf32>,
    %c6_i32 = arith.constant 6 : i32
    %208 = arith.index_cast %c6_i32 : i32 to index
    %c0_86 = arith.constant 0 : index
    %c0_87 = arith.constant 0 : index
    %209 = vector.load %arg1[%208, %c0_86, %c0_87] : memref<8x8x512xf32, #tpu.memory_space<vmem>>, vector<1x8x512xf32>
    %210 = vector.shape_cast %209 : vector<1x8x512xf32> to vector<8x512xf32>
    %c0_88 = arith.constant 0 : index
    %c0_89 = arith.constant 0 : index
    %211 = vector.load %arg6[%c0_88, %c0_89] : memref<8x128xf32, #tpu.memory_space<vmem>>, vector<8x128xf32>
    %cst_90 = arith.constant dense<0.000000e+00> : vector<8x512xf32>
    %212 = tpu.matmul %211, %3, %cst_90 {dimension_numbers = #tpu.dot_dimension_numbers<[1], [0], [0], [1], [0, 0, 1, 1], [], []>} : vector<8x128xf32>, vector<128x512xf32>, vector<8x512xf32> -> vector<8x512xf32>
    %213 = arith.addf %210, %212 : vector<8x512xf32>
    %c0_91 = arith.constant 0 : index
    %c0_92 = arith.constant 0 : index
    %214 = vector.load %arg7[%c0_91, %c0_92] : memref<8x128xf32, #tpu.memory_space<vmem>>, vector<8x128xf32>
    %215 = vector.extract_strided_slice %213 {offsets = [0, 0], sizes = [8, 128], strides = [1, 1]} : vector<8x512xf32> to vector<8x128xf32>
    %216 = arith.negf %215 : vector<8x128xf32>
    %217 = math.exp %216 : vector<8x128xf32>
    %cst_93 = arith.constant 1.000000e+00 : f32
    %218 = vector.broadcast %cst_93 : f32 to vector<8x128xf32>
    %219 = arith.addf %218, %217 : vector<8x128xf32>
    %220 = arith.divf %218, %219 : vector<8x128xf32>
    %221 = vector.extract_strided_slice %213 {offsets = [0, 128], sizes = [8, 128], strides = [1, 1]} : vector<8x512xf32> to vector<8x128xf32>
    %222 = arith.negf %221 : vector<8x128xf32>
    %223 = math.exp %222 : vector<8x128xf32>
    %cst_94 = arith.constant 1.000000e+00 : f32
    %224 = vector.broadcast %cst_94 : f32 to vector<8x128xf32>
    %225 = arith.addf %224, %223 : vector<8x128xf32>
    %226 = arith.divf %224, %225 : vector<8x128xf32>
    %227 = vector.extract_strided_slice %213 {offsets = [0, 256], sizes = [8, 128], strides = [1, 1]} : vector<8x512xf32> to vector<8x128xf32>
    %228 = math.tanh %227 : vector<8x128xf32>
    %229 = vector.extract_strided_slice %213 {offsets = [0, 384], sizes = [8, 128], strides = [1, 1]} : vector<8x512xf32> to vector<8x128xf32>
    %230 = arith.negf %229 : vector<8x128xf32>
    %231 = math.exp %230 : vector<8x128xf32>
    %cst_95 = arith.constant 1.000000e+00 : f32
    %232 = vector.broadcast %cst_95 : f32 to vector<8x128xf32>
    %233 = arith.addf %232, %231 : vector<8x128xf32>
    %234 = arith.divf %232, %233 : vector<8x128xf32>
    %235 = arith.mulf %226, %214 : vector<8x128xf32>
    %236 = arith.mulf %220, %228 : vector<8x128xf32>
    %237 = arith.addf %235, %236 : vector<8x128xf32>
    %238 = math.tanh %237 : vector<8x128xf32>
    %239 = arith.mulf %234, %238 : vector<8x128xf32>
    %c0_96 = arith.constant 0 : index
    %c0_97 = arith.constant 0 : index
    %240 = vector.load %arg6[%c0_96, %c0_97] : memref<8x128xf32, #tpu.memory_space<vmem>>, vector<8x128xf32>
    tpu.vector_store %arg6[%c0_96, %c0_97], %239 {strides = array<i32>} : memref<8x128xf32, #tpu.memory_space<vmem>>, vector<8x128xf32>,
    %c0_98 = arith.constant 0 : index
    %c0_99 = arith.constant 0 : index
    %241 = vector.load %arg7[%c0_98, %c0_99] : memref<8x128xf32, #tpu.memory_space<vmem>>, vector<8x128xf32>
    tpu.vector_store %arg7[%c0_98, %c0_99], %237 {strides = array<i32>} : memref<8x128xf32, #tpu.memory_space<vmem>>, vector<8x128xf32>,
    %c7_i32 = arith.constant 7 : i32
    %242 = arith.index_cast %c7_i32 : i32 to index
    %c0_100 = arith.constant 0 : index
    %c0_101 = arith.constant 0 : index
    %243 = vector.load %arg1[%242, %c0_100, %c0_101] : memref<8x8x512xf32, #tpu.memory_space<vmem>>, vector<1x8x512xf32>
    %244 = vector.shape_cast %243 : vector<1x8x512xf32> to vector<8x512xf32>
    %c0_102 = arith.constant 0 : index
    %c0_103 = arith.constant 0 : index
    %245 = vector.load %arg6[%c0_102, %c0_103] : memref<8x128xf32, #tpu.memory_space<vmem>>, vector<8x128xf32>
    %cst_104 = arith.constant dense<0.000000e+00> : vector<8x512xf32>
    %246 = tpu.matmul %245, %3, %cst_104 {dimension_numbers = #tpu.dot_dimension_numbers<[1], [0], [0], [1], [0, 0, 1, 1], [], []>} : vector<8x128xf32>, vector<128x512xf32>, vector<8x512xf32> -> vector<8x512xf32>
    %247 = arith.addf %244, %246 : vector<8x512xf32>
    %c0_105 = arith.constant 0 : index
    %c0_106 = arith.constant 0 : index
    %248 = vector.load %arg7[%c0_105, %c0_106] : memref<8x128xf32, #tpu.memory_space<vmem>>, vector<8x128xf32>
    %249 = vector.extract_strided_slice %247 {offsets = [0, 0], sizes = [8, 128], strides = [1, 1]} : vector<8x512xf32> to vector<8x128xf32>
    %250 = arith.negf %249 : vector<8x128xf32>
    %251 = math.exp %250 : vector<8x128xf32>
    %cst_107 = arith.constant 1.000000e+00 : f32
    %252 = vector.broadcast %cst_107 : f32 to vector<8x128xf32>
    %253 = arith.addf %252, %251 : vector<8x128xf32>
    %254 = arith.divf %252, %253 : vector<8x128xf32>
    %255 = vector.extract_strided_slice %247 {offsets = [0, 128], sizes = [8, 128], strides = [1, 1]} : vector<8x512xf32> to vector<8x128xf32>
    %256 = arith.negf %255 : vector<8x128xf32>
    %257 = math.exp %256 : vector<8x128xf32>
    %cst_108 = arith.constant 1.000000e+00 : f32
    %258 = vector.broadcast %cst_108 : f32 to vector<8x128xf32>
    %259 = arith.addf %258, %257 : vector<8x128xf32>
    %260 = arith.divf %258, %259 : vector<8x128xf32>
    %261 = vector.extract_strided_slice %247 {offsets = [0, 256], sizes = [8, 128], strides = [1, 1]} : vector<8x512xf32> to vector<8x128xf32>
    %262 = math.tanh %261 : vector<8x128xf32>
    %263 = vector.extract_strided_slice %247 {offsets = [0, 384], sizes = [8, 128], strides = [1, 1]} : vector<8x512xf32> to vector<8x128xf32>
    %264 = arith.negf %263 : vector<8x128xf32>
    %265 = math.exp %264 : vector<8x128xf32>
    %cst_109 = arith.constant 1.000000e+00 : f32
    %266 = vector.broadcast %cst_109 : f32 to vector<8x128xf32>
    %267 = arith.addf %266, %265 : vector<8x128xf32>
    %268 = arith.divf %266, %267 : vector<8x128xf32>
    %269 = arith.mulf %260, %248 : vector<8x128xf32>
    %270 = arith.mulf %254, %262 : vector<8x128xf32>
    %271 = arith.addf %269, %270 : vector<8x128xf32>
    %272 = math.tanh %271 : vector<8x128xf32>
    %273 = arith.mulf %268, %272 : vector<8x128xf32>
    %c0_110 = arith.constant 0 : index
    %c0_111 = arith.constant 0 : index
    %274 = vector.load %arg6[%c0_110, %c0_111] : memref<8x128xf32, #tpu.memory_space<vmem>>, vector<8x128xf32>
    tpu.vector_store %arg6[%c0_110, %c0_111], %273 {strides = array<i32>} : memref<8x128xf32, #tpu.memory_space<vmem>>, vector<8x128xf32>,
    %c0_112 = arith.constant 0 : index
    %c0_113 = arith.constant 0 : index
    %275 = vector.load %arg7[%c0_112, %c0_113] : memref<8x128xf32, #tpu.memory_space<vmem>>, vector<8x128xf32>
    tpu.vector_store %arg7[%c0_112, %c0_113], %271 {strides = array<i32>} : memref<8x128xf32, #tpu.memory_space<vmem>>, vector<8x128xf32>,
    %c8_i32 = arith.constant 8 : i32
    %c0_i32_114 = arith.constant 0 : i32
    %276 = arith.cmpi eq, %arg0, %c0_i32_114 : i32
    %277 = arith.extui %276 : i1 to i32
    %c0_i32_115 = arith.constant 0 : i32
    %278 = arith.cmpi ne, %277, %c0_i32_115 : i32
    scf.if %278 {
      %c0_116 = arith.constant 0 : index
      %c0_117 = arith.constant 0 : index
      %279 = vector.load %arg6[%c0_116, %c0_117] : memref<8x128xf32, #tpu.memory_space<vmem>>, vector<8x128xf32>
      %c0_118 = arith.constant 0 : index
      %c0_119 = arith.constant 0 : index
      %280 = vector.load %arg3[%c0_118, %c0_119] : memref<1x128xf32, #tpu.memory_space<vmem>>, vector<1x128xf32>
      %281 = vector.broadcast %280 : vector<1x128xf32> to vector<8x128xf32>
      %282 = arith.mulf %279, %281 : vector<8x128xf32>
      %cst_120 = arith.constant dense<0.000000e+00> : vector<8xf32>
      %283 = vector.multi_reduction <add>, %282, %cst_120 [1] : vector<8x128xf32> to vector<8xf32>
      %284 = vector.shape_cast %283 : vector<8xf32> to vector<8x1xf32>
      %c0_121 = arith.constant 0 : index
      %c0_122 = arith.constant 0 : index
      %285 = vector.load %arg4[%c0_121, %c0_122] : memref<1x1xf32, #tpu.memory_space<vmem>>, vector<1x1xf32>
      %286 = vector.broadcast %285 : vector<1x1xf32> to vector<8x1xf32>
      %287 = arith.addf %284, %286 : vector<8x1xf32>
      %c0_123 = arith.constant 0 : index
      %c0_124 = arith.constant 0 : index
      %288 = vector.load %arg5[%c0_123, %c0_124] : memref<8x1xf32, #tpu.memory_space<vmem>>, vector<8x1xf32>
      tpu.vector_store %arg5[%c0_123, %c0_124], %287 {strides = array<i32>} : memref<8x1xf32, #tpu.memory_space<vmem>>, vector<8x1xf32>,
    } else {
    }
    return
  }
  func.func @transform_0(%arg0: i32) -> (i32, i32, i32) {
    %c0_i32 = arith.constant 0 : i32
    %c0_i32_0 = arith.constant 0 : i32
    %c0_i32_1 = arith.constant 0 : i32
    return %arg0, %c0_i32, %c0_i32_0 : i32, i32, i32
  }
  func.func @transform_1(%arg0: i32) -> (i32, i32) {
    %c0_i32 = arith.constant 0 : i32
    %c0_i32_0 = arith.constant 0 : i32
    %c0_i32_1 = arith.constant 0 : i32
    return %c0_i32, %c0_i32_0 : i32, i32
  }
  func.func @transform_2(%arg0: i32) -> (i32, i32) {
    %c0_i32 = arith.constant 0 : i32
    %c0_i32_0 = arith.constant 0 : i32
    %c0_i32_1 = arith.constant 0 : i32
    return %c0_i32, %c0_i32_0 : i32, i32
  }
  func.func @transform_3(%arg0: i32) -> (i32, i32) {
    %c0_i32 = arith.constant 0 : i32
    %c0_i32_0 = arith.constant 0 : i32
    %c0_i32_1 = arith.constant 0 : i32
    return %c0_i32, %c0_i32_0 : i32, i32
  }
  func.func @transform_4(%arg0: i32) -> (i32, i32) {
    %c0_i32 = arith.constant 0 : i32
    %c0_i32_0 = arith.constant 0 : i32
    %c0_i32_1 = arith.constant 0 : i32
    return %c0_i32, %c0_i32_0 : i32, i32
  }
}

</mosaic_0001>

<bundles_post_ra>
// kernel: lstm_model_forward.4
= control target key start
LH: loop header
LB: loop body
LE: loop exit
PB: predicated region body
PF: predicated region fallthrough
CT: control target
= control target key end

     0   :  { %8 = vsyncpa [#allocation3], 0  ;;  %s396_s12 = smov [#allocation2]   ;;  %s602_s0 = inlined_call_operand.vmem [shape: f32[64,16], index: 0, kind: input, shape index: {}]   ;;  %s603_s1 = inlined_call_operand.hbm [shape: f32[16,512], index: 1, kind: input, shape index: {}]   ;;  %s604_s2 = inlined_call_operand.vmem [shape: f32[1,512], index: 2, kind: input, shape index: {}]   ;;  %s605_s3 = inlined_call_operand.vmem [shape: f32[64,512], index: 3, kind: output, shape index: {}]  }
   0x1   :  { %s16_s13 = sshll.u32 %s396_s12, 4  ;;  %s17_s13 = int_to_ptr.vmem [resolvable:$true] %s16_s13 }
   0x2   :  { %s382_s14 = scalar_lea.vmem %s17_s13, 1024  ;;  %p387_p1 = scmp.lt.s32.totalorder %s17_s13, %s17_s13 }
   0x3   :  { %p383_p0 = scmp.ne.s32.totalorder %s17_s13, %s382_s14  ;;  %p388_p2 = scmp.lt.s32.totalorder %s382_s14, %s382_s14 }
   0x5   :  { %p389_p3 = por %p388_p2, %p387_p1 }
   0x7   :  { %p390_p4 = pnand %p389_p3, %p383_p0 }
   0x9   :  { %393 = shalt.err (!%p390_p4)
}
   0xa   :  { %s397_s15 = smov 512   ;;  %s398_s16 = smov 32  }
   0xb   :  { %22 = dma.hbm_to_vmem [thread:$0]  %s603_s1, 1024, %s17_s13, [#allocation3], %s397_s15, %s397_s15, %s398_s16  }
   0xc   :  { %394 = dma.done.wait [#allocation3], 1024  }
   0xd   :  { %395 = vsyncadd [#allocation3], 4294966272  ;;  %v399_v0 = vmov 0.0   ;;  %v41_v1 = vld [vmem:[#allocation2 + $0x28] sm:$0xff]  ;;  %v43_v2 = vld [vmem:[#allocation2 + $0x38] sm:$0xff]  ;;  %vm66_vm0 = vcmask 130048   ;;  %v46_v17 = vlaneseq }
   0xe   :  { %155 = vmatprep.mubr.f32.mxu0 %v399_v0  ;;  %268 = vmatprep.mubr.f32.mxu1 %v399_v0  ;;  %v40_v3 = vld [vmem:[#allocation2 + $0x20] sm:$0xff]  ;;  %v42_v4 = vld [vmem:[#allocation2 + $0x30] sm:$0xff]  ;;  %v37_v5 = vld [vmem:[#allocation2 + $0x8] sm:$0xff] }
   0xf   :  { %119 = vmatprep.subr.mxu0 %v41_v1  ;;  %232 = vmatprep.subr.mxu1 %v43_v2  ;;  %v39_v6 = vld [vmem:[#allocation2 + $0x18] sm:$0xff]  ;;  %v36_v7 = vld [vmem:[#allocation2] sm:$0xff]  ;;  %v38_v8 = vld [vmem:[#allocation2 + $0x10] sm:$0xff]  ;;  %v47_v18 = vshrl.u32 %v46_v17, 7 }
  0x10   :  { %120 = vmatpush1.msra.mxu0 %v40_v3  ;;  %233 = vmatpush1.msra.mxu1 %v42_v4  ;;  %v28_v9 = vld [vmem:[%s602_s0] sm:$0xff]  ;;  %v29_v10 = vld [vmem:[%s602_s0 + $0x8] sm:$0xff]  ;;  %v30_v11 = vld [vmem:[%s602_s0 + $0x10] sm:$0xff] }
  0x11   :  { %121 = vmatprep.subr.mxu0 %v37_v5  ;;  %234 = vmatprep.subr.mxu1 %v39_v6  ;;  %v31_v12 = vld [vmem:[%s602_s0 + $0x18] sm:$0xff]  ;;  %v32_v13 = vld [vmem:[%s602_s0 + $0x20] sm:$0xff]  ;;  %v33_v14 = vld [vmem:[%s602_s0 + $0x28] sm:$0xff]  ;;  %v48_v19 = vsub.s32 0, %v47_v18  ;;  %v56_v20 = vsub.s32 2, %v47_v18  ;;  %v52_v22 = vsub.s32 1, %v47_v18 }
  0x12   :  { %122 = vmatpush1.msra.mxu0 %v36_v7  ;;  %235 = vmatpush1.msra.mxu1 %v38_v8  ;;  %v34_v15 = vld [vmem:[%s602_s0 + $0x30] sm:$0xff]  ;;  %v35_v16 = vld [vmem:[%s602_s0 + $0x38] sm:$0xff]  ;;  %v44_v21 = vld [vmem:[%s604_s2] sm:$0xf]  ;;  %v60_v23 = vsub.s32 3, %v47_v18 }
  0x13   :  { %354 = vmatmul.mubr.msk.f32.vlgmr.msra.gmra.mxu0 %vm66_vm0, %v28_v9  ;;  %362 = vmatmul.mubr.msk.f32.vlgmr.msra.gmra.mxu1 %vm66_vm0, %v28_v9  ;;  %v466_v24 = vrot.slane %v44_v21, %v48_v19  ;;  %v468_v25 = vrot.slane %v44_v21, %v56_v20  ;;  %v470_v26 = vrot.slane %v44_v21, %v52_v22 }
  0x14   :  { %161 = vmatprep.mubr.f32.mxu0 %v399_v0  ;;  %274 = vmatprep.mubr.f32.mxu1 %v399_v0  ;;  %v472_v27 = vrot.slane %v44_v21, %v60_v23 }
  0x17   :  { %355 = vmatmul.mubr.msk.f32.gmra.mxu0 %vm66_vm0, %v29_v10  ;;  %363 = vmatmul.mubr.msk.f32.gmra.mxu1 %vm66_vm0, %v29_v10 }
  0x18   :  { %167 = vmatprep.mubr.f32.mxu0 %v399_v0  ;;  %280 = vmatprep.mubr.f32.mxu1 %v399_v0 }
  0x1b   :  { %356 = vmatmul.mubr.msk.f32.gmra.mxu0 %vm66_vm0, %v30_v11  ;;  %364 = vmatmul.mubr.msk.f32.gmra.mxu1 %vm66_vm0, %v30_v11 }
  0x1c   :  { %173 = vmatprep.mubr.f32.mxu0 %v399_v0  ;;  %286 = vmatprep.mubr.f32.mxu1 %v399_v0 }
  0x1f   :  { %357 = vmatmul.mubr.msk.f32.gmra.mxu0 %vm66_vm0, %v31_v12  ;;  %365 = vmatmul.mubr.msk.f32.gmra.mxu1 %vm66_vm0, %v31_v12 }
  0x20   :  { %179 = vmatprep.mubr.f32.mxu0 %v399_v0  ;;  %292 = vmatprep.mubr.f32.mxu1 %v399_v0 }
  0x23   :  { %358 = vmatmul.mubr.msk.f32.gmra.mxu0 %vm66_vm0, %v32_v13  ;;  %366 = vmatmul.mubr.msk.f32.gmra.mxu1 %vm66_vm0, %v32_v13 }
  0x24   :  { %185 = vmatprep.mubr.f32.mxu0 %v399_v0  ;;  %298 = vmatprep.mubr.f32.mxu1 %v399_v0 }
  0x27   :  { %359 = vmatmul.mubr.msk.f32.gmra.mxu0 %vm66_vm0, %v33_v14  ;;  %367 = vmatmul.mubr.msk.f32.gmra.mxu1 %vm66_vm0, %v33_v14 }
  0x28   :  { %191 = vmatprep.mubr.f32.mxu0 %v399_v0  ;;  %304 = vmatprep.mubr.f32.mxu1 %v399_v0 }
  0x2b   :  { %360 = vmatmul.mubr.msk.f32.gmra.mxu0 %vm66_vm0, %v34_v15  ;;  %368 = vmatmul.mubr.msk.f32.gmra.mxu1 %vm66_vm0, %v34_v15 }
  0x2c   :  { %197 = vmatprep.mubr.f32.mxu0 %v399_v0  ;;  %310 = vmatprep.mubr.f32.mxu1 %v399_v0 }
  0x2f   :  { %361 = vmatmul.mubr.msk.f32.gmra.mxu0 %vm66_vm0, %v35_v16  ;;  %369 = vmatmul.mubr.msk.f32.gmra.mxu1 %vm66_vm0, %v35_v16 }
  0xd3   :  { %v157_v28 = vpop.f32.mrf.mxu0  ;;  %v270_v29 = vpop.f32.mrf.mxu1 }
  0xd4   :  { %v158_v30 = vadd.f32 %v157_v28, %v466_v24  ;;  %v271_v31 = vadd.f32 %v270_v29, %v468_v25 }
  0xd5   :  { %v159_v32 = vpop.f32.mrf.mxu0  ;;  %v272_v33 = vpop.f32.mrf.mxu1 }
  0xd6   :  { %317 = vst [vmem:[%s605_s3] sm:$0xff] %v158_v30  ;;  %319 = vst [vmem:[%s605_s3 + $0x10] sm:$0xff] %v271_v31  ;;  %v160_v34 = vadd.f32 %v159_v32, %v470_v26  ;;  %v273_v35 = vadd.f32 %v272_v33, %v472_v27 }
  0xd7   :  { %v163_v36 = vpop.f32.mrf.mxu0  ;;  %v276_v37 = vpop.f32.mrf.mxu1 }
  0xd8   :  { %318 = vst [vmem:[%s605_s3 + $0x8] sm:$0xff] %v160_v34  ;;  %320 = vst [vmem:[%s605_s3 + $0x18] sm:$0xff] %v273_v35  ;;  %v164_v38 = vadd.f32 %v163_v36, %v466_v24  ;;  %v277_v39 = vadd.f32 %v276_v37, %v468_v25 }
  0xd9   :  { %v165_v40 = vpop.f32.mrf.mxu0  ;;  %v278_v41 = vpop.f32.mrf.mxu1 }
  0xda   :  { %321 = vst [vmem:[%s605_s3 + $0x20] sm:$0xff] %v164_v38  ;;  %323 = vst [vmem:[%s605_s3 + $0x30] sm:$0xff] %v277_v39  ;;  %v166_v42 = vadd.f32 %v165_v40, %v470_v26  ;;  %v279_v43 = vadd.f32 %v278_v41, %v472_v27 }
  0xdb   :  { %v169_v44 = vpop.f32.mrf.mxu0  ;;  %v282_v45 = vpop.f32.mrf.mxu1 }
  0xdc   :  { %322 = vst [vmem:[%s605_s3 + $0x28] sm:$0xff] %v166_v42  ;;  %324 = vst [vmem:[%s605_s3 + $0x38] sm:$0xff] %v279_v43  ;;  %v170_v46 = vadd.f32 %v169_v44, %v466_v24  ;;  %v283_v47 = vadd.f32 %v282_v45, %v468_v25 }
  0xdd   :  { %v171_v48 = vpop.f32.mrf.mxu0  ;;  %v284_v49 = vpop.f32.mrf.mxu1 }
  0xde   :  { %325 = vst [vmem:[%s605_s3 + $0x40] sm:$0xff] %v170_v46  ;;  %327 = vst [vmem:[%s605_s3 + $0x50] sm:$0xff] %v283_v47  ;;  %v172_v50 = vadd.f32 %v171_v48, %v470_v26  ;;  %v285_v51 = vadd.f32 %v284_v49, %v472_v27 }
  0xdf   :  { %v175_v52 = vpop.f32.mrf.mxu0  ;;  %v288_v53 = vpop.f32.mrf.mxu1 }
  0xe0   :  { %326 = vst [vmem:[%s605_s3 + $0x48] sm:$0xff] %v172_v50  ;;  %328 = vst [vmem:[%s605_s3 + $0x58] sm:$0xff] %v285_v51  ;;  %v176_v54 = vadd.f32 %v175_v52, %v466_v24  ;;  %v289_v55 = vadd.f32 %v288_v53, %v468_v25 }
  0xe1   :  { %v177_v56 = vpop.f32.mrf.mxu0  ;;  %v290_v57 = vpop.f32.mrf.mxu1 }
  0xe2   :  { %329 = vst [vmem:[%s605_s3 + $0x60] sm:$0xff] %v176_v54  ;;  %331 = vst [vmem:[%s605_s3 + $0x70] sm:$0xff] %v289_v55  ;;  %v178_v58 = vadd.f32 %v177_v56, %v470_v26  ;;  %v291_v59 = vadd.f32 %v290_v57, %v472_v27 }
  0xe3   :  { %v181_v60 = vpop.f32.mrf.mxu0  ;;  %v294_v61 = vpop.f32.mrf.mxu1 }
  0xe4   :  { %330 = vst [vmem:[%s605_s3 + $0x68] sm:$0xff] %v178_v58  ;;  %332 = vst [vmem:[%s605_s3 + $0x78] sm:$0xff] %v291_v59  ;;  %v182_v62 = vadd.f32 %v181_v60, %v466_v24  ;;  %v295_v63 = vadd.f32 %v294_v61, %v468_v25 }
  0xe5   :  { %v183_v0 = vpop.f32.mrf.mxu0  ;;  %v296_v1 = vpop.f32.mrf.mxu1 }
  0xe6   :  { %333 = vst [vmem:[%s605_s3 + $0x80] sm:$0xff] %v182_v62  ;;  %335 = vst [vmem:[%s605_s3 + $0x90] sm:$0xff] %v295_v63  ;;  %v184_v2 = vadd.f32 %v183_v0, %v470_v26  ;;  %v297_v3 = vadd.f32 %v296_v1, %v472_v27 }
  0xe7   :  { %v187_v4 = vpop.f32.mrf.mxu0  ;;  %v300_v5 = vpop.f32.mrf.mxu1 }
  0xe8   :  { %334 = vst [vmem:[%s605_s3 + $0x88] sm:$0xff] %v184_v2  ;;  %336 = vst [vmem:[%s605_s3 + $0x98] sm:$0xff] %v297_v3  ;;  %v188_v6 = vadd.f32 %v187_v4, %v466_v24  ;;  %v301_v7 = vadd.f32 %v300_v5, %v468_v25 }
  0xe9   :  { %v189_v8 = vpop.f32.mrf.mxu0  ;;  %v302_v9 = vpop.f32.mrf.mxu1 }
  0xea   :  { %337 = vst [vmem:[%s605_s3 + $0xa0] sm:$0xff] %v188_v6  ;;  %339 = vst [vmem:[%s605_s3 + $0xb0] sm:$0xff] %v301_v7  ;;  %v190_v10 = vadd.f32 %v189_v8, %v470_v26  ;;  %v303_v11 = vadd.f32 %v302_v9, %v472_v27 }
  0xeb   :  { %v193_v12 = vpop.f32.mrf.mxu0  ;;  %v306_v13 = vpop.f32.mrf.mxu1 }
  0xec   :  { %338 = vst [vmem:[%s605_s3 + $0xa8] sm:$0xff] %v190_v10  ;;  %340 = vst [vmem:[%s605_s3 + $0xb8] sm:$0xff] %v303_v11  ;;  %v194_v14 = vadd.f32 %v193_v12, %v466_v24  ;;  %v307_v15 = vadd.f32 %v306_v13, %v468_v25 }
  0xed   :  { %v195_v16 = vpop.f32.mrf.mxu0  ;;  %v308_v17 = vpop.f32.mrf.mxu1 }
  0xee   :  { %341 = vst [vmem:[%s605_s3 + $0xc0] sm:$0xff] %v194_v14  ;;  %343 = vst [vmem:[%s605_s3 + $0xd0] sm:$0xff] %v307_v15  ;;  %v196_v18 = vadd.f32 %v195_v16, %v470_v26  ;;  %v309_v19 = vadd.f32 %v308_v17, %v472_v27 }
  0xef   :  { %v199_v20 = vpop.f32.mrf.mxu0  ;;  %v312_v21 = vpop.f32.mrf.mxu1 }
  0xf0   :  { %342 = vst [vmem:[%s605_s3 + $0xc8] sm:$0xff] %v196_v18  ;;  %344 = vst [vmem:[%s605_s3 + $0xd8] sm:$0xff] %v309_v19  ;;  %v200_v22 = vadd.f32 %v199_v20, %v466_v24  ;;  %v313_v23 = vadd.f32 %v312_v21, %v468_v25 }
  0xf1   :  { %v201_v28 = vpop.f32.mrf.mxu0  ;;  %v314_v29 = vpop.f32.mrf.mxu1 }
  0xf2   :  { %345 = vst [vmem:[%s605_s3 + $0xe0] sm:$0xff] %v200_v22  ;;  %347 = vst [vmem:[%s605_s3 + $0xf0] sm:$0xff] %v313_v23  ;;  %v202_v30 = vadd.f32 %v201_v28, %v470_v26  ;;  %v315_v31 = vadd.f32 %v314_v29, %v472_v27 }
  0xf4   :  { %346 = vst [vmem:[%s605_s3 + $0xe8] sm:$0xff] %v202_v30  ;;  %348 = vst [vmem:[%s605_s3 + $0xf8] sm:$0xff] %v315_v31 }
  0xf5   :  { %353 = vsyncpa [#allocation3], 1 }

// kernel: lstm_model_forward.5
= control target key start
LH: loop header
LB: loop body
LE: loop exit
PB: predicated region body
PF: predicated region fallthrough
CT: control target
= control target key end

     0   :  { %v3118_v3 = vmov 0.0   ;;  %s3113_s1 = inlined_call_operand.vmem [shape: f32[128,512], index: 1, kind: input, shape index: {}]   ;;  %s3114_s0 = inlined_call_operand.vmem [shape: f32[8,8,512], index: 0, kind: input, shape index: {}]   ;;  %s3115_s2 = inlined_call_operand.vmem [shape: f32[8,8,128], index: 2, kind: output, shape index: {}]  }
   0x1   :  { %v1802_v0 = vld [vmem:[%s3113_s1 + $0x1e8] sm:$0xff]  ;;  %v1807_v1 = vld [vmem:[%s3113_s1 + $0x1e0] sm:$0xff]  ;;  %150 = vmatprep.mubr.f32.mxu0 %v3118_v3  ;;  %221 = vmatprep.mubr.f32.mxu1 %v3118_v3  ;;  %v1849_v9 = vld [vmem:[%s3113_s1 + $0x1f8] sm:$0xff] }
   0x2   :  { %3185 = vst [vmem:[#allocation4_spill] sm:$0xff] %v1802_v0  ;;  %v1812_v2 = vld [vmem:[%s3113_s1 + $0x1c8] sm:$0xff]  ;;  %86 = vmatprep.subr.mxu0 %v1802_v0  ;;  %v1820_v4 = vld [vmem:[%s3113_s1 + $0x1c0] sm:$0xff]  ;;  %3186 = vst [vmem:[#allocation5_spill] sm:$0xff] %v1849_v9  ;;  %157 = vmatprep.subr.mxu1 %v1849_v9 }
   0x3   :  { %87 = vmatpush1.msra.mxu0 %v1807_v1  ;;  %v1826_v5 = vld [vmem:[%s3113_s1 + $0x1a8] sm:$0xff]  ;;  %v1832_v6 = vld [vmem:[%s3113_s1 + $0x1a0] sm:$0xff]  ;;  %v1861_v11 = vld [vmem:[%s3113_s1 + $0x1f0] sm:$0xff] }
   0x4   :  { %88 = vmatprep.subr.mxu0 %v1812_v2  ;;  %v1838_v7 = vld [vmem:[%s3113_s1 + $0x188] sm:$0xff]  ;;  %v1844_v8 = vld [vmem:[%s3113_s1 + $0x180] sm:$0xff]  ;;  %158 = vmatpush1.msra.mxu1 %v1861_v11  ;;  %v1873_v13 = vld [vmem:[%s3113_s1 + $0x1d8] sm:$0xff] }
   0x5   :  { %89 = vmatpush1.msra.mxu0 %v1820_v4  ;;  %v1855_v10 = vld [vmem:[%s3113_s1 + $0x168] sm:$0xff]  ;;  %v1867_v12 = vld [vmem:[%s3113_s1 + $0x160] sm:$0xff]  ;;  %v1878_v14 = vld [vmem:[%s3113_s1 + $0x1d0] sm:$0xff]  ;;  %159 = vmatprep.subr.mxu1 %v1873_v13 }
   0x6   :  { %90 = vmatprep.subr.mxu0 %v1826_v5  ;;  %v1884_v15 = vld [vmem:[%s3113_s1 + $0x148] sm:$0xff]  ;;  %v1890_v16 = vld [vmem:[%s3113_s1 + $0x1b8] sm:$0xff]  ;;  %v1896_v17 = vld [vmem:[%s3113_s1 + $0x140] sm:$0xff]  ;;  %160 = vmatpush1.msra.mxu1 %v1878_v14 }
   0x7   :  { %91 = vmatpush1.msra.mxu0 %v1832_v6  ;;  %v1902_v18 = vld [vmem:[%s3113_s1 + $0x1b0] sm:$0xff]  ;;  %v1907_v19 = vld [vmem:[%s3113_s1 + $0x198] sm:$0xff]  ;;  %v1913_v20 = vld [vmem:[%s3113_s1 + $0x128] sm:$0xff]  ;;  %161 = vmatprep.subr.mxu1 %v1890_v16 }
   0x8   :  { %92 = vmatprep.subr.mxu0 %v1838_v7  ;;  %v1919_v21 = vld [vmem:[%s3113_s1 + $0x190] sm:$0xff]  ;;  %v1925_v22 = vld [vmem:[%s3113_s1 + $0x120] sm:$0xff]  ;;  %162 = vmatpush1.msra.mxu1 %v1902_v18  ;;  %v1931_v23 = vld [vmem:[%s3113_s1 + $0x178] sm:$0xff] }
   0x9   :  { %93 = vmatpush1.msra.mxu0 %v1844_v8  ;;  %v1937_v24 = vld [vmem:[%s3113_s1 + $0x108] sm:$0xff]  ;;  %163 = vmatprep.subr.mxu1 %v1907_v19  ;;  %v1943_v25 = vld [vmem:[%s3113_s1 + $0x170] sm:$0xff]  ;;  %v1949_v26 = vld [vmem:[%s3113_s1 + $0x100] sm:$0xff] }
   0xa   :  { %94 = vmatprep.subr.mxu0 %v1855_v10  ;;  %164 = vmatpush1.msra.mxu1 %v1919_v21  ;;  %v1955_v27 = vld [vmem:[%s3113_s1 + $0x158] sm:$0xff]  ;;  %v1961_v28 = vld [vmem:[%s3113_s1 + $0xe8] sm:$0xff]  ;;  %v1967_v29 = vld [vmem:[%s3113_s1 + $0x150] sm:$0xff] }
   0xb   :  { %95 = vmatpush1.msra.mxu0 %v1867_v12  ;;  %165 = vmatprep.subr.mxu1 %v1931_v23  ;;  %v1973_v30 = vld [vmem:[%s3113_s1 + $0xe0] sm:$0xff]  ;;  %v1979_v31 = vld [vmem:[%s3113_s1 + $0x138] sm:$0xff]  ;;  %v1985_v32 = vld [vmem:[%s3113_s1 + $0xc8] sm:$0xff] }
   0xc   :  { %96 = vmatprep.subr.mxu0 %v1884_v15  ;;  %166 = vmatpush1.msra.mxu1 %v1943_v25  ;;  %v1991_v33 = vld [vmem:[%s3113_s1 + $0x130] sm:$0xff]  ;;  %v1997_v34 = vld [vmem:[%s3113_s1 + $0xc0] sm:$0xff]  ;;  %v2003_v35 = vld [vmem:[%s3113_s1 + $0x118] sm:$0xff] }
   0xd   :  { %97 = vmatpush1.msra.mxu0 %v1896_v17  ;;  %167 = vmatprep.subr.mxu1 %v1955_v27  ;;  %v2009_v36 = vld [vmem:[%s3113_s1 + $0xa8] sm:$0xff]  ;;  %v2015_v37 = vld [vmem:[%s3113_s1 + $0x110] sm:$0xff]  ;;  %v2021_v38 = vld [vmem:[%s3113_s1 + $0xa0] sm:$0xff] }
   0xe   :  { %98 = vmatprep.subr.mxu0 %v1913_v20  ;;  %168 = vmatpush1.msra.mxu1 %v1967_v29  ;;  %v2027_v39 = vld [vmem:[%s3113_s1 + $0xf8] sm:$0xff]  ;;  %v2033_v40 = vld [vmem:[%s3113_s1 + $0x88] sm:$0xff]  ;;  %v2039_v41 = vld [vmem:[%s3113_s1 + $0xf0] sm:$0xff] }
   0xf   :  { %99 = vmatpush1.msra.mxu0 %v1925_v22  ;;  %169 = vmatprep.subr.mxu1 %v1979_v31  ;;  %v2045_v42 = vld [vmem:[%s3113_s1 + $0x80] sm:$0xff]  ;;  %v2051_v43 = vld [vmem:[%s3113_s1 + $0xd8] sm:$0xff]  ;;  %v2057_v44 = vld [vmem:[%s3113_s1 + $0x68] sm:$0xff] }
  0x10   :  { %100 = vmatprep.subr.mxu0 %v1937_v24  ;;  %170 = vmatpush1.msra.mxu1 %v1991_v33  ;;  %3187 = vst [vmem:[#allocation6_spill] sm:$0xff] %v2057_v44  ;;  %v2063_v45 = vld [vmem:[%s3113_s1 + $0xd0] sm:$0xff]  ;;  %v2069_v46 = vld [vmem:[%s3113_s1 + $0x60] sm:$0xff]  ;;  %v2075_v47 = vld [vmem:[%s3113_s1 + $0xb8] sm:$0xff] }
  0x11   :  { %101 = vmatpush1.msra.mxu0 %v1949_v26  ;;  %171 = vmatprep.subr.mxu1 %v2003_v35  ;;  %3188 = vst [vmem:[#allocation7_spill] sm:$0xff] %v2069_v46  ;;  %v2081_v48 = vld [vmem:[%s3113_s1 + $0x48] sm:$0xff]  ;;  %v2087_v49 = vld [vmem:[%s3113_s1 + $0xb0] sm:$0xff]  ;;  %v2093_v50 = vld [vmem:[%s3113_s1 + $0x40] sm:$0xff] }
  0x12   :  { %102 = vmatprep.subr.mxu0 %v1961_v28  ;;  %172 = vmatpush1.msra.mxu1 %v2015_v37  ;;  %3189 = vst [vmem:[#allocation8_spill] sm:$0xff] %v2081_v48  ;;  %3190 = vst [vmem:[#allocation9_spill] sm:$0xff] %v2093_v50  ;;  %v2099_v51 = vld [vmem:[%s3113_s1 + $0x98] sm:$0xff]  ;;  %v2105_v52 = vld [vmem:[%s3113_s1 + $0x28] sm:$0xff] }
  0x13   :  { %103 = vmatpush1.msra.mxu0 %v1973_v30  ;;  %173 = vmatprep.subr.mxu1 %v2027_v39  ;;  %3191 = vst [vmem:[#allocation10_spill] sm:$0xff] %v2105_v52  ;;  %v2111_v53 = vld [vmem:[%s3113_s1 + $0x90] sm:$0xff]  ;;  %v2117_v54 = vld [vmem:[%s3113_s1 + $0x20] sm:$0xff]  ;;  %v2123_v55 = vld [vmem:[%s3113_s1 + $0x78] sm:$0xff] }
  0x14   :  { %104 = vmatprep.subr.mxu0 %v1985_v32  ;;  %174 = vmatpush1.msra.mxu1 %v2039_v41  ;;  %3192 = vst [vmem:[#allocation11_spill] sm:$0xff] %v2111_v53  ;;  %3193 = vst [vmem:[#allocation12_spill] sm:$0xff] %v2117_v54  ;;  %v2129_v56 = vld [vmem:[%s3113_s1 + $0x8] sm:$0xff]  ;;  %v2135_v57 = vld [vmem:[%s3113_s1 + $0x70] sm:$0xff] }
  0x15   :  { %105 = vmatpush1.msra.mxu0 %v1997_v34  ;;  %175 = vmatprep.subr.mxu1 %v2051_v43  ;;  %3194 = vst [vmem:[#allocation13_spill] sm:$0xff] %v2123_v55  ;;  %3195 = vst [vmem:[#allocation14_spill] sm:$0xff] %v2129_v56  ;;  %v2141_v58 = vld [vmem:[%s3113_s1] sm:$0xff]  ;;  %v2147_v59 = vld [vmem:[%s3113_s1 + $0x58] sm:$0xff] }
  0x16   :  { %106 = vmatprep.subr.mxu0 %v2009_v36  ;;  %176 = vmatpush1.msra.mxu1 %v2063_v45  ;;  %3196 = vst [vmem:[#allocation15_spill] sm:$0xff] %v2135_v57  ;;  %3197 = vst [vmem:[#allocation16_spill] sm:$0xff] %v2141_v58  ;;  %v2154_v60 = vld [vmem:[%s3113_s1 + $0x50] sm:$0xff]  ;;  %v2161_v61 = vld [vmem:[%s3113_s1 + $0x38] sm:$0xff] }
  0x17   :  { %107 = vmatpush1.msra.mxu0 %v2021_v38  ;;  %177 = vmatprep.subr.mxu1 %v2075_v47  ;;  %3198 = vst [vmem:[#allocation17_spill] sm:$0xff] %v2147_v59  ;;  %3199 = vst [vmem:[#allocation18_spill] sm:$0xff] %v2154_v60  ;;  %v2168_v62 = vld [vmem:[%s3113_s1 + $0x30] sm:$0xff]  ;;  %v2175_v63 = vld [vmem:[%s3113_s1 + $0x18] sm:$0xff] }
  0x18   :  { %108 = vmatprep.subr.mxu0 %v2033_v40  ;;  %178 = vmatpush1.msra.mxu1 %v2087_v49  ;;  %3200 = vst [vmem:[#allocation19_spill] sm:$0xff] %v2161_v61  ;;  %3201 = vst [vmem:[#allocation20_spill] sm:$0xff] %v2168_v62 }
  0x19   :  { %109 = vmatpush1.msra.mxu0 %v2045_v42  ;;  %179 = vmatprep.subr.mxu1 %v2099_v51  ;;  %3202 = vst [vmem:[#allocation21_spill] sm:$0xff] %v2175_v63 }
  0x1a   :  { %110 = vmatprep.subr.mxu0 %v2057_v44  ;;  %180 = vmatpush1.msra.mxu1 %v2111_v53 }
  0x1b   :  { %111 = vmatpush1.msra.mxu0 %v2069_v46  ;;  %181 = vmatprep.subr.mxu1 %v2123_v55 }
  0x1c   :  { %112 = vmatprep.subr.mxu0 %v2081_v48  ;;  %182 = vmatpush1.msra.mxu1 %v2135_v57 }
  0x1d   :  { %113 = vmatpush1.msra.mxu0 %v2093_v50  ;;  %183 = vmatprep.subr.mxu1 %v2147_v59 }
  0x1e   :  { %114 = vmatprep.subr.mxu0 %v2105_v52  ;;  %184 = vmatpush1.msra.mxu1 %v2154_v60 }
  0x1f   :  { %115 = vmatpush1.msra.mxu0 %v2117_v54  ;;  %185 = vmatprep.subr.mxu1 %v2161_v61 }
  0x20   :  { %116 = vmatprep.subr.mxu0 %v2129_v56  ;;  %186 = vmatpush1.msra.mxu1 %v2168_v62 }
  0x21   :  { %117 = vmatpush1.msra.mxu0 %v2141_v58  ;;  %v2181_v58 = vld [vmem:[%s3113_s1 + $0x10] sm:$0xff]  ;;  %187 = vmatprep.subr.mxu1 %v2175_v63 }
  0x22   :  { %151 = vmatmul.mubr.f32.vlgmr.msra.gmra.mxu0 %v3118_v3  ;;  %3203 = vst [vmem:[#allocation22_spill] sm:$0xff] %v2181_v58  ;;  %266 = vmatprep.subr.mxu0 %v1802_v0 }
  0x23   :  { %267 = vmatpush1.msra.mxu0 %v1807_v1  ;;  %188 = vmatpush1.msra.mxu1 %v2181_v58 }
  0x24   :  { %268 = vmatprep.subr.mxu0 %v1812_v2  ;;  %222 = vmatmul.mubr.f32.vlgmr.msra.gmra.mxu1 %v3118_v3  ;;  %v3204_v3 = vld [vmem:[#allocation16_spill] sm:$0xff] }
  0x25   :  { %269 = vmatpush1.msra.mxu0 %v1820_v4  ;;  %337 = vmatprep.subr.mxu1 %v1849_v9 }
  0x26   :  { %338 = vmatpush1.msra.mxu1 %v1861_v11  ;;  %270 = vmatprep.subr.mxu0 %v1826_v5 }
  0x27   :  { %339 = vmatprep.subr.mxu1 %v1873_v13  ;;  %271 = vmatpush1.msra.mxu0 %v1832_v6 }
  0x28   :  { %340 = vmatpush1.msra.mxu1 %v1878_v14  ;;  %272 = vmatprep.subr.mxu0 %v1838_v7 }
  0x29   :  { %341 = vmatprep.subr.mxu1 %v1890_v16  ;;  %273 = vmatpush1.msra.mxu0 %v1844_v8 }
  0x2a   :  { %342 = vmatpush1.msra.mxu1 %v1902_v18  ;;  %274 = vmatprep.subr.mxu0 %v1855_v10 }
  0x2b   :  { %343 = vmatprep.subr.mxu1 %v1907_v19  ;;  %275 = vmatpush1.msra.mxu0 %v1867_v12 }
  0x2c   :  { %344 = vmatpush1.msra.mxu1 %v1919_v21  ;;  %276 = vmatprep.subr.mxu0 %v1884_v15 }
  0x2d   :  { %345 = vmatprep.subr.mxu1 %v1931_v23  ;;  %277 = vmatpush1.msra.mxu0 %v1896_v17 }
  0x2e   :  { %346 = vmatpush1.msra.mxu1 %v1943_v25  ;;  %278 = vmatprep.subr.mxu0 %v1913_v20 }
  0x2f   :  { %347 = vmatprep.subr.mxu1 %v1955_v27  ;;  %279 = vmatpush1.msra.mxu0 %v1925_v22 }
  0x30   :  { %348 = vmatpush1.msra.mxu1 %v1967_v29  ;;  %280 = vmatprep.subr.mxu0 %v1937_v24 }
  0x31   :  { %349 = vmatprep.subr.mxu1 %v1979_v31  ;;  %281 = vmatpush1.msra.mxu0 %v1949_v26 }
  0x32   :  { %350 = vmatpush1.msra.mxu1 %v1991_v33  ;;  %282 = vmatprep.subr.mxu0 %v1961_v28 }
  0x33   :  { %351 = vmatprep.subr.mxu1 %v2003_v35  ;;  %283 = vmatpush1.msra.mxu0 %v1973_v30 }
  0x34   :  { %352 = vmatpush1.msra.mxu1 %v2015_v37  ;;  %284 = vmatprep.subr.mxu0 %v1985_v32 }
  0x35   :  { %353 = vmatprep.subr.mxu1 %v2027_v39  ;;  %285 = vmatpush1.msra.mxu0 %v1997_v34 }
  0x36   :  { %354 = vmatpush1.msra.mxu1 %v2039_v41  ;;  %286 = vmatprep.subr.mxu0 %v2009_v36 }
  0x37   :  { %355 = vmatprep.subr.mxu1 %v2051_v43  ;;  %287 = vmatpush1.msra.mxu0 %v2021_v38 }
  0x38   :  { %356 = vmatpush1.msra.mxu1 %v2063_v45  ;;  %288 = vmatprep.subr.mxu0 %v2033_v40 }
  0x39   :  { %357 = vmatprep.subr.mxu1 %v2075_v47  ;;  %289 = vmatpush1.msra.mxu0 %v2045_v42 }
  0x3a   :  { %358 = vmatpush1.msra.mxu1 %v2087_v49  ;;  %290 = vmatprep.subr.mxu0 %v2057_v44 }
  0x3b   :  { %359 = vmatprep.subr.mxu1 %v2099_v51  ;;  %291 = vmatpush1.msra.mxu0 %v2069_v46 }
  0x3c   :  { %360 = vmatpush1.msra.mxu1 %v2111_v53  ;;  %292 = vmatprep.subr.mxu0 %v2081_v48  ;;  %v3205_v48 = vmov 0.0  }
  0x3d   :  { %361 = vmatprep.subr.mxu1 %v2123_v55  ;;  %293 = vmatpush1.msra.mxu0 %v2093_v50 }
  0x3e   :  { %362 = vmatpush1.msra.mxu1 %v2135_v57  ;;  %294 = vmatprep.subr.mxu0 %v2105_v52 }
  0x3f   :  { %363 = vmatprep.subr.mxu1 %v2147_v59  ;;  %295 = vmatpush1.msra.mxu0 %v2117_v54 }
  0x40   :  { %364 = vmatpush1.msra.mxu1 %v2154_v60  ;;  %296 = vmatprep.subr.mxu0 %v2129_v56  ;;  %v81_v56 = vld [vmem:[%s3114_s0] sm:$0xff]  ;;  %v83_v60 = vld [vmem:[%s3114_s0 + $0x10] sm:$0xff] }
  0x41   :  { %365 = vmatprep.subr.mxu1 %v2161_v61  ;;  %297 = vmatpush1.msra.mxu0 %v3204_v3  ;;  %v82_v3 = vld [vmem:[%s3114_s0 + $0x8] sm:$0xff] }
  0x42   :  { %366 = vmatpush1.msra.mxu1 %v2168_v62  ;;  %330 = vmatprep.mubr.f32.mxu0 %v3205_v48 }
  0x43   :  { %367 = vmatprep.subr.mxu1 %v2175_v63  ;;  %401 = vmatprep.mubr.f32.mxu1 %v3205_v48 }
  0x44   :  { %368 = vmatpush1.msra.mxu1 %v2181_v58  ;;  %447 = vmatprep.subr.mxu0 %v1802_v0 }
  0x45   :  { %518 = vmatprep.subr.mxu1 %v1849_v9  ;;  %v84_v9 = vld [vmem:[%s3114_s0 + $0x18] sm:$0xff] }
  0xe2   :  { %v152_v54 = vpop.f32.mrf.mxu0 }
  0xe3   :  { %v228_v62 = vadd.f32 %v152_v54, %v81_v56 }
  0xe4   :  { %v154_v61 = vpop.f32.mrf.mxu0  ;;  %v223_v58 = vpop.f32.mrf.mxu1 }
  0xe5   :  { %v1531_v63 = vmul.f32 -1.442695, %v228_v62  ;;  %v229_v52 = vadd.f32 %v154_v61, %v82_v3  ;;  %v230_v59 = vadd.f32 %v223_v58, %v83_v60  ;;  %v3210_v58 = vld [vmem:[#allocation15_spill] sm:$0xff]  ;;  %v3212_v60 = vld [vmem:[#allocation17_spill] sm:$0xff] }
  0xe6   :  { %v225_v0 = vpop.f32.mrf.mxu1 }
  0xe7   :  { %1591 = vpow2.f32 %v1531_v63  ;;  %v1532_v48 = vmul.f32 -1.442695, %v229_v52  ;;  %v231_v50 = vadd.f32 %v225_v0, %v84_v9 }
  0xe9   :  { %1593 = vpow2.f32 %v1532_v48  ;;  %v1533_v57 = vmul.f32 -1.442695, %v231_v50 }
  0xea   :  { %1595 = vtanh.f32 %v230_v59  ;;  %v3211_v59 = vld [vmem:[#allocation8_spill] sm:$0xff] }
  0xeb   :  { %1597 = vpow2.f32 %v1533_v57  ;;  %v3209_v57 = vld [vmem:[#allocation7_spill] sm:$0xff] }
  0xf4   :  { %v1592_v54 = vpop.eup %1591 }
  0xf5   :  { %v236_v56 = vadd.f32 1.0, %v1592_v54  ;;  %v3213_v54 = vld [vmem:[#allocation9_spill] sm:$0xff] }
  0xf6   :  { %v1594_v3 = vpop.eup %1593 }
  0xf7   :  { %1599 = vrcp.f32 %v236_v56  ;;  %v242_v52 = vadd.f32 1.0, %v1594_v3  ;;  %v1596_v48 = vpop.eup %1595  ;;  %v3214_v56 = vld [vmem:[#allocation18_spill] sm:$0xff] }
  0xf8   :  { %v1598_v61 = vpop.eup %1597  ;;  %v3215_v3 = vld [vmem:[#allocation10_spill] sm:$0xff] }
  0xf9   :  { %1601 = vrcp.f32 %v242_v52  ;;  %v249_v46 = vadd.f32 1.0, %v1598_v61  ;;  %v3216_v52 = vld [vmem:[#allocation19_spill] sm:$0xff]  ;;  %v3218_v61 = vld [vmem:[#allocation20_spill] sm:$0xff] }
  0xfb   :  { %1603 = vrcp.f32 %v249_v46  ;;  %v3207_v46 = vld [vmem:[#allocation6_spill] sm:$0xff] }
 0x104   :  { %v1600_v62 = vpop.eup %1599 }
 0x105   :  { %v253_v44 = vmul.f32 %v1600_v62, %v1596_v48  ;;  %v3217_v48 = vld [vmem:[#allocation12_spill] sm:$0xff]  ;;  %v3219_v62 = vld [vmem:[#allocation14_spill] sm:$0xff] }
 0x106   :  { %v1602_v63 = vpop.eup %1601 }
 0x107   :  { %v252_v55 = vmul.f32 0.0, %v1602_v63  ;;  %v3220_v63 = vld [vmem:[#allocation21_spill] sm:$0xff] }
 0x108   :  { %v1604_v0 = vpop.eup %1603 }
 0x109   :  { %v2267_v53 = vadd.f32 %v253_v44, %v252_v55  ;;  %v3206_v44 = vld [vmem:[#allocation11_spill] sm:$0xff]  ;;  %v3208_v55 = vld [vmem:[#allocation13_spill] sm:$0xff] }
 0x10b   :  { %1605 = vtanh.f32 %v2267_v53 }
 0x118   :  { %v1606_v9 = vpop.eup %1605 }
 0x119   :  { %v256_v50 = vmul.f32 %v1606_v9, %v1604_v0  ;;  %v3221_v0 = vld [vmem:[#allocation16_spill] sm:$0xff]  ;;  %v3222_v9 = vmov 0.0  }
 0x11b   :  { %259 = vst [vmem:[%s3115_s2] sm:$0xff] %v256_v50  ;;  %331 = vmatmul.mubr.f32.vlgmr.msra.gmra.mxu0 %v256_v50  ;;  %402 = vmatmul.mubr.f32.vlgmr.msra.gmra.mxu1 %v256_v50  ;;  %v3223_v50 = vld [vmem:[#allocation22_spill] sm:$0xff] }
 0x11c   :  { %448 = vmatpush1.msra.mxu0 %v1807_v1  ;;  %519 = vmatpush1.msra.mxu1 %v1861_v11 }
 0x11d   :  { %449 = vmatprep.subr.mxu0 %v1812_v2  ;;  %520 = vmatprep.subr.mxu1 %v1873_v13 }
 0x11e   :  { %450 = vmatpush1.msra.mxu0 %v1820_v4  ;;  %521 = vmatpush1.msra.mxu1 %v1878_v14 }
 0x11f   :  { %451 = vmatprep.subr.mxu0 %v1826_v5  ;;  %522 = vmatprep.subr.mxu1 %v1890_v16 }
 0x120   :  { %452 = vmatpush1.msra.mxu0 %v1832_v6  ;;  %523 = vmatpush1.msra.mxu1 %v1902_v18 }
 0x121   :  { %453 = vmatprep.subr.mxu0 %v1838_v7  ;;  %524 = vmatprep.subr.mxu1 %v1907_v19 }
 0x122   :  { %454 = vmatpush1.msra.mxu0 %v1844_v8  ;;  %525 = vmatpush1.msra.mxu1 %v1919_v21 }
 0x123   :  { %455 = vmatprep.subr.mxu0 %v1855_v10  ;;  %526 = vmatprep.subr.mxu1 %v1931_v23 }
 0x124   :  { %456 = vmatpush1.msra.mxu0 %v1867_v12  ;;  %527 = vmatpush1.msra.mxu1 %v1943_v25 }
 0x125   :  { %457 = vmatprep.subr.mxu0 %v1884_v15  ;;  %528 = vmatprep.subr.mxu1 %v1955_v27 }
 0x126   :  { %458 = vmatpush1.msra.mxu0 %v1896_v17  ;;  %529 = vmatpush1.msra.mxu1 %v1967_v29 }
 0x127   :  { %459 = vmatprep.subr.mxu0 %v1913_v20  ;;  %530 = vmatprep.subr.mxu1 %v1979_v31 }
 0x128   :  { %460 = vmatpush1.msra.mxu0 %v1925_v22  ;;  %531 = vmatpush1.msra.mxu1 %v1991_v33 }
 0x129   :  { %461 = vmatprep.subr.mxu0 %v1937_v24  ;;  %532 = vmatprep.subr.mxu1 %v2003_v35 }
 0x12a   :  { %462 = vmatpush1.msra.mxu0 %v1949_v26  ;;  %533 = vmatpush1.msra.mxu1 %v2015_v37 }
 0x12b   :  { %463 = vmatprep.subr.mxu0 %v1961_v28  ;;  %534 = vmatprep.subr.mxu1 %v2027_v39 }
 0x12c   :  { %464 = vmatpush1.msra.mxu0 %v1973_v30  ;;  %535 = vmatpush1.msra.mxu1 %v2039_v41 }
 0x12d   :  { %465 = vmatprep.subr.mxu0 %v1985_v32  ;;  %536 = vmatprep.subr.mxu1 %v2051_v43 }
 0x12e   :  { %466 = vmatpush1.msra.mxu0 %v1997_v34  ;;  %537 = vmatpush1.msra.mxu1 %v2063_v45 }
 0x12f   :  { %467 = vmatprep.subr.mxu0 %v2009_v36  ;;  %538 = vmatprep.subr.mxu1 %v2075_v47 }
 0x130   :  { %468 = vmatpush1.msra.mxu0 %v2021_v38  ;;  %539 = vmatpush1.msra.mxu1 %v2087_v49 }
 0x131   :  { %469 = vmatprep.subr.mxu0 %v2033_v40  ;;  %540 = vmatprep.subr.mxu1 %v2099_v51 }
 0x132   :  { %470 = vmatpush1.msra.mxu0 %v2045_v42  ;;  %541 = vmatpush1.msra.mxu1 %v3206_v44 }
 0x133   :  { %471 = vmatprep.subr.mxu0 %v3207_v46  ;;  %542 = vmatprep.subr.mxu1 %v3208_v55 }
 0x134   :  { %472 = vmatpush1.msra.mxu0 %v3209_v57  ;;  %543 = vmatpush1.msra.mxu1 %v3210_v58 }
 0x135   :  { %473 = vmatprep.subr.mxu0 %v3211_v59  ;;  %544 = vmatprep.subr.mxu1 %v3212_v60  ;;  %v1536_v59 = vld [vmem:[%s3114_s0 + $0x30] sm:$0xff] }
 0x136   :  { %474 = vmatpush1.msra.mxu0 %v3213_v54  ;;  %545 = vmatpush1.msra.mxu1 %v3214_v56  ;;  %v3224_v56 = vld [vmem:[#allocation4_spill] sm:$0xff] }
 0x137   :  { %475 = vmatprep.subr.mxu0 %v3215_v3  ;;  %546 = vmatprep.subr.mxu1 %v3216_v52  ;;  %v3225_v3 = vld [vmem:[#allocation5_spill] sm:$0xff] }
 0x138   :  { %476 = vmatpush1.msra.mxu0 %v3217_v48  ;;  %547 = vmatpush1.msra.mxu1 %v3218_v61  ;;  %v1534_v61 = vld [vmem:[%s3114_s0 + $0x20] sm:$0xff] }
 0x139   :  { %477 = vmatprep.subr.mxu0 %v3219_v62  ;;  %548 = vmatprep.subr.mxu1 %v3220_v63  ;;  %v1535_v63 = vld [vmem:[%s3114_s0 + $0x28] sm:$0xff] }
 0x13a   :  { %478 = vmatpush1.msra.mxu0 %v3221_v0  ;;  %511 = vmatprep.mubr.f32.mxu0 %v3222_v9 }
 0x13b   :  { %549 = vmatpush1.msra.mxu1 %v3223_v50  ;;  %582 = vmatprep.mubr.f32.mxu1 %v3222_v9 }
 0x13c   :  { %628 = vmatprep.subr.mxu0 %v3224_v56  ;;  %699 = vmatprep.subr.mxu1 %v3225_v3  ;;  %v1537_v3 = vld [vmem:[%s3114_s0 + $0x38] sm:$0xff] }
 0x1db   :  { %v332_v48 = vpop.f32.mrf.mxu0  ;;  %v403_v50 = vpop.f32.mrf.mxu1 }
 0x1dc   :  { %v408_v0 = vadd.f32 %v1534_v61, %v332_v48  ;;  %v410_v48 = vadd.f32 %v1536_v59, %v403_v50  ;;  %v3229_v50 = vld [vmem:[#allocation15_spill] sm:$0xff] }
 0x1dd   :  { %v334_v62 = vpop.f32.mrf.mxu0  ;;  %v405_v56 = vpop.f32.mrf.mxu1 }
 0x1de   :  { %v1538_v52 = vmul.f32 -1.442695, %v408_v0  ;;  %v409_v54 = vadd.f32 %v1535_v63, %v334_v62  ;;  %v411_v60 = vadd.f32 %v1537_v3, %v405_v56 }
 0x1e0   :  { %1607 = vpow2.f32 %v1538_v52  ;;  %v1539_v9 = vmul.f32 -1.442695, %v409_v54  ;;  %v1540_v58 = vmul.f32 -1.442695, %v411_v60  ;;  %v3228_v60 = vld [vmem:[#allocation7_spill] sm:$0xff] }
 0x1e2   :  { %1609 = vpow2.f32 %v1539_v9 }
 0x1e3   :  { %1611 = vpow2.f32 %v1540_v58 }
 0x1ed   :  { %v1608_v57 = vpop.eup %1607 }
 0x1ee   :  { %v416_v61 = vadd.f32 1.0, %v1608_v57 }
 0x1ef   :  { %v1610_v0 = vpop.eup %1609 }
 0x1f0   :  { %1613 = vrcp.f32 %v416_v61  ;;  %v422_v52 = vadd.f32 1.0, %v1610_v0  ;;  %v1612_v54 = vpop.eup %1611  ;;  %v3231_v61 = vld [vmem:[#allocation17_spill] sm:$0xff] }
 0x1f1   :  { %1615 = vtanh.f32 %v410_v48  ;;  %v429_v55 = vadd.f32 1.0, %v1612_v54  ;;  %v3230_v48 = vld [vmem:[#allocation8_spill] sm:$0xff]  ;;  %v3232_v0 = vld [vmem:[#allocation9_spill] sm:$0xff]  ;;  %v3234_v54 = vld [vmem:[#allocation10_spill] sm:$0xff] }
 0x1f2   :  { %1617 = vrcp.f32 %v422_v52  ;;  %v3233_v52 = vld [vmem:[#allocation18_spill] sm:$0xff] }
 0x1f3   :  { %1619 = vrcp.f32 %v429_v55  ;;  %v3227_v55 = vld [vmem:[#allocation13_spill] sm:$0xff] }
 0x1fd   :  { %v1614_v62 = vpop.eup %1613 }
 0x1fe   :  { %v1616_v63 = vpop.eup %1615 }
 0x1ff   :  { %v1618_v9 = vpop.eup %1617  ;;  %v433_v56 = vmul.f32 %v1616_v63, %v1614_v62  ;;  %v3235_v62 = vld [vmem:[#allocation19_spill] sm:$0xff]  ;;  %v3236_v63 = vld [vmem:[#allocation12_spill] sm:$0xff] }
 0x200   :  { %v432_v3 = vmul.f32 %v1618_v9, %v2267_v53  ;;  %v1620_v57 = vpop.eup %1619  ;;  %v3226_v53 = vld [vmem:[#allocation6_spill] sm:$0xff]  ;;  %v3237_v9 = vld [vmem:[#allocation20_spill] sm:$0xff] }
 0x202   :  { %v2352_v46 = vadd.f32 %v433_v56, %v432_v3  ;;  %v3238_v56 = vld [vmem:[#allocation14_spill] sm:$0xff]  ;;  %v3239_v3 = vld [vmem:[#allocation21_spill] sm:$0xff] }
 0x204   :  { %1621 = vtanh.f32 %v2352_v46 }
 0x211   :  { %v1622_v59 = vpop.eup %1621 }
 0x212   :  { %v436_v58 = vmul.f32 %v1622_v59, %v1620_v57  ;;  %v3240_v57 = vld [vmem:[#allocation16_spill] sm:$0xff]  ;;  %v3241_v59 = vmov 0.0  }
 0x214   :  { %1541 = vst [vmem:[%s3115_s2 + $0x8] sm:$0xff] %v436_v58  ;;  %512 = vmatmul.mubr.f32.vlgmr.msra.gmra.mxu0 %v436_v58  ;;  %583 = vmatmul.mubr.f32.vlgmr.msra.gmra.mxu1 %v436_v58  ;;  %v3242_v58 = vld [vmem:[#allocation22_spill] sm:$0xff] }
 0x215   :  { %629 = vmatpush1.msra.mxu0 %v1807_v1  ;;  %700 = vmatpush1.msra.mxu1 %v1861_v11 }
 0x216   :  { %630 = vmatprep.subr.mxu0 %v1812_v2  ;;  %701 = vmatprep.subr.mxu1 %v1873_v13 }
 0x217   :  { %631 = vmatpush1.msra.mxu0 %v1820_v4  ;;  %702 = vmatpush1.msra.mxu1 %v1878_v14 }
 0x218   :  { %632 = vmatprep.subr.mxu0 %v1826_v5  ;;  %703 = vmatprep.subr.mxu1 %v1890_v16 }
 0x219   :  { %633 = vmatpush1.msra.mxu0 %v1832_v6  ;;  %704 = vmatpush1.msra.mxu1 %v1902_v18 }
 0x21a   :  { %634 = vmatprep.subr.mxu0 %v1838_v7  ;;  %705 = vmatprep.subr.mxu1 %v1907_v19 }
 0x21b   :  { %635 = vmatpush1.msra.mxu0 %v1844_v8  ;;  %706 = vmatpush1.msra.mxu1 %v1919_v21 }
 0x21c   :  { %636 = vmatprep.subr.mxu0 %v1855_v10  ;;  %707 = vmatprep.subr.mxu1 %v1931_v23 }
 0x21d   :  { %637 = vmatpush1.msra.mxu0 %v1867_v12  ;;  %708 = vmatpush1.msra.mxu1 %v1943_v25 }
 0x21e   :  { %638 = vmatprep.subr.mxu0 %v1884_v15  ;;  %709 = vmatprep.subr.mxu1 %v1955_v27 }
 0x21f   :  { %639 = vmatpush1.msra.mxu0 %v1896_v17  ;;  %710 = vmatpush1.msra.mxu1 %v1967_v29 }
 0x220   :  { %640 = vmatprep.subr.mxu0 %v1913_v20  ;;  %711 = vmatprep.subr.mxu1 %v1979_v31 }
 0x221   :  { %641 = vmatpush1.msra.mxu0 %v1925_v22  ;;  %712 = vmatpush1.msra.mxu1 %v1991_v33 }
 0x222   :  { %642 = vmatprep.subr.mxu0 %v1937_v24  ;;  %713 = vmatprep.subr.mxu1 %v2003_v35 }
 0x223   :  { %643 = vmatpush1.msra.mxu0 %v1949_v26  ;;  %714 = vmatpush1.msra.mxu1 %v2015_v37 }
 0x224   :  { %644 = vmatprep.subr.mxu0 %v1961_v28  ;;  %715 = vmatprep.subr.mxu1 %v2027_v39 }
 0x225   :  { %645 = vmatpush1.msra.mxu0 %v1973_v30  ;;  %716 = vmatpush1.msra.mxu1 %v2039_v41 }
 0x226   :  { %646 = vmatprep.subr.mxu0 %v1985_v32  ;;  %717 = vmatprep.subr.mxu1 %v2051_v43 }
 0x227   :  { %647 = vmatpush1.msra.mxu0 %v1997_v34  ;;  %718 = vmatpush1.msra.mxu1 %v2063_v45 }
 0x228   :  { %648 = vmatprep.subr.mxu0 %v2009_v36  ;;  %719 = vmatprep.subr.mxu1 %v2075_v47 }
 0x229   :  { %649 = vmatpush1.msra.mxu0 %v2021_v38  ;;  %720 = vmatpush1.msra.mxu1 %v2087_v49 }
 0x22a   :  { %650 = vmatprep.subr.mxu0 %v2033_v40  ;;  %721 = vmatprep.subr.mxu1 %v2099_v51 }
 0x22b   :  { %651 = vmatpush1.msra.mxu0 %v2045_v42  ;;  %722 = vmatpush1.msra.mxu1 %v3206_v44 }
 0x22c   :  { %652 = vmatprep.subr.mxu0 %v3226_v53  ;;  %723 = vmatprep.subr.mxu1 %v3227_v55 }
 0x22d   :  { %653 = vmatpush1.msra.mxu0 %v3228_v60  ;;  %724 = vmatpush1.msra.mxu1 %v3229_v50 }
 0x22e   :  { %654 = vmatprep.subr.mxu0 %v3230_v48  ;;  %725 = vmatprep.subr.mxu1 %v3231_v61  ;;  %v1544_v48 = vld [vmem:[%s3114_s0 + $0x50] sm:$0xff] }
 0x22f   :  { %655 = vmatpush1.msra.mxu0 %v3232_v0  ;;  %726 = vmatpush1.msra.mxu1 %v3233_v52  ;;  %v3243_v52 = vld [vmem:[#allocation4_spill] sm:$0xff] }
 0x230   :  { %656 = vmatprep.subr.mxu0 %v3234_v54  ;;  %727 = vmatprep.subr.mxu1 %v3235_v62  ;;  %v3244_v54 = vld [vmem:[#allocation5_spill] sm:$0xff] }
 0x231   :  { %657 = vmatpush1.msra.mxu0 %v3236_v63  ;;  %728 = vmatpush1.msra.mxu1 %v3237_v9  ;;  %v1542_v9 = vld [vmem:[%s3114_s0 + $0x40] sm:$0xff] }
 0x232   :  { %658 = vmatprep.subr.mxu0 %v3238_v56  ;;  %729 = vmatprep.subr.mxu1 %v3239_v3  ;;  %v1543_v3 = vld [vmem:[%s3114_s0 + $0x48] sm:$0xff] }
 0x233   :  { %659 = vmatpush1.msra.mxu0 %v3240_v57  ;;  %692 = vmatprep.mubr.f32.mxu0 %v3241_v59 }
 0x234   :  { %730 = vmatpush1.msra.mxu1 %v3242_v58  ;;  %763 = vmatprep.mubr.f32.mxu1 %v3241_v59 }
 0x235   :  { %809 = vmatprep.subr.mxu0 %v3243_v52  ;;  %880 = vmatprep.subr.mxu1 %v3244_v54  ;;  %v1545_v52 = vld [vmem:[%s3114_s0 + $0x58] sm:$0xff] }
 0x2d4   :  { %v513_v63 = vpop.f32.mrf.mxu0  ;;  %v584_v58 = vpop.f32.mrf.mxu1 }
 0x2d5   :  { %v589_v57 = vadd.f32 %v1542_v9, %v513_v63  ;;  %v591_v63 = vadd.f32 %v1544_v48, %v584_v58 }
 0x2d6   :  { %v515_v56 = vpop.f32.mrf.mxu0  ;;  %v586_v54 = vpop.f32.mrf.mxu1 }
 0x2d7   :  { %v1546_v62 = vmul.f32 -1.442695, %v589_v57  ;;  %v590_v0 = vadd.f32 %v1543_v3, %v515_v56  ;;  %v592_v61 = vadd.f32 %v1545_v52, %v586_v54 }
 0x2d9   :  { %1623 = vpow2.f32 %v1546_v62  ;;  %v1547_v59 = vmul.f32 -1.442695, %v590_v0  ;;  %v1548_v50 = vmul.f32 -1.442695, %v592_v61 }
 0x2db   :  { %1625 = vpow2.f32 %v1547_v59 }
 0x2dc   :  { %1627 = vpow2.f32 %v1548_v50 }
 0x2e6   :  { %v1624_v60 = vpop.eup %1623 }
 0x2e7   :  { %v597_v9 = vadd.f32 1.0, %v1624_v60 }
 0x2e8   :  { %v1626_v57 = vpop.eup %1625 }
 0x2e9   :  { %1629 = vrcp.f32 %v597_v9  ;;  %v603_v62 = vadd.f32 1.0, %v1626_v57  ;;  %v1628_v0 = vpop.eup %1627  ;;  %v2536_v9 = vld [vmem:[%s3113_s1 + $0x1e0] sm:$0xff]  ;;  %v2548_v57 = vld [vmem:[%s3113_s1 + $0x1c8] sm:$0xff] }
 0x2ea   :  { %1631 = vtanh.f32 %v591_v63  ;;  %v610_v55 = vadd.f32 1.0, %v1628_v0  ;;  %v2560_v0 = vld [vmem:[%s3113_s1 + $0x1c0] sm:$0xff] }
 0x2eb   :  { %1633 = vrcp.f32 %v603_v62  ;;  %v2554_v62 = vld [vmem:[%s3113_s1 + $0x1d8] sm:$0xff] }
 0x2ec   :  { %1635 = vrcp.f32 %v610_v55 }
 0x2f6   :  { %v1630_v56 = vpop.eup %1629 }
 0x2f7   :  { %v1632_v3 = vpop.eup %1631 }
 0x2f8   :  { %v1634_v59 = vpop.eup %1633  ;;  %v614_v54 = vmul.f32 %v1632_v3, %v1630_v56  ;;  %v2566_v56 = vld [vmem:[%s3113_s1 + $0x1d0] sm:$0xff]  ;;  %v2572_v3 = vld [vmem:[%s3113_s1 + $0x1a8] sm:$0xff] }
 0x2f9   :  { %v613_v52 = vmul.f32 %v1634_v59, %v2352_v46  ;;  %v1636_v60 = vpop.eup %1635  ;;  %v2578_v59 = vld [vmem:[%s3113_s1 + $0x1b8] sm:$0xff] }
 0x2fb   :  { %v2437_v53 = vadd.f32 %v614_v54, %v613_v52  ;;  %v2584_v54 = vld [vmem:[%s3113_s1 + $0x1a0] sm:$0xff]  ;;  %v2590_v52 = vld [vmem:[%s3113_s1 + $0x1b0] sm:$0xff] }
 0x2fd   :  { %1637 = vtanh.f32 %v2437_v53 }
 0x30a   :  { %v1638_v48 = vpop.eup %1637 }
 0x30b   :  { %v617_v50 = vmul.f32 %v1638_v48, %v1636_v60  ;;  %v2596_v60 = vld [vmem:[%s3113_s1 + $0x188] sm:$0xff]  ;;  %v2602_v48 = vld [vmem:[%s3113_s1 + $0x198] sm:$0xff] }
 0x30d   :  { %1549 = vst [vmem:[%s3115_s2 + $0x10] sm:$0xff] %v617_v50  ;;  %693 = vmatmul.mubr.f32.vlgmr.msra.gmra.mxu0 %v617_v50  ;;  %764 = vmatmul.mubr.f32.vlgmr.msra.gmra.mxu1 %v617_v50  ;;  %v2608_v50 = vld [vmem:[%s3113_s1 + $0x180] sm:$0xff] }
 0x30e   :  { %810 = vmatpush1.msra.mxu0 %v1807_v1  ;;  %881 = vmatpush1.msra.mxu1 %v1861_v11  ;;  %v3245_v1 = vld [vmem:[#allocation6_spill] sm:$0xff] }
 0x30f   :  { %811 = vmatprep.subr.mxu0 %v1812_v2  ;;  %882 = vmatprep.subr.mxu1 %v1873_v13  ;;  %v3246_v2 = vld [vmem:[#allocation13_spill] sm:$0xff]  ;;  %v3253_v11 = vld [vmem:[#allocation10_spill] sm:$0xff]  ;;  %v3255_v13 = vld [vmem:[#allocation12_spill] sm:$0xff] }
 0x310   :  { %812 = vmatpush1.msra.mxu0 %v1820_v4  ;;  %883 = vmatpush1.msra.mxu1 %v1878_v14  ;;  %v3247_v4 = vld [vmem:[#allocation7_spill] sm:$0xff]  ;;  %v3256_v14 = vld [vmem:[#allocation20_spill] sm:$0xff] }
 0x311   :  { %813 = vmatprep.subr.mxu0 %v1826_v5  ;;  %884 = vmatprep.subr.mxu1 %v1890_v16  ;;  %v3248_v5 = vld [vmem:[#allocation15_spill] sm:$0xff]  ;;  %v3258_v16 = vld [vmem:[#allocation21_spill] sm:$0xff] }
 0x312   :  { %814 = vmatpush1.msra.mxu0 %v1832_v6  ;;  %885 = vmatpush1.msra.mxu1 %v1902_v18  ;;  %v3249_v6 = vld [vmem:[#allocation8_spill] sm:$0xff]  ;;  %v3260_v18 = vmov 0.0  }
 0x313   :  { %815 = vmatprep.subr.mxu0 %v1838_v7  ;;  %886 = vmatprep.subr.mxu1 %v1907_v19  ;;  %v3250_v7 = vld [vmem:[#allocation17_spill] sm:$0xff]  ;;  %v3261_v19 = vld [vmem:[#allocation22_spill] sm:$0xff] }
 0x314   :  { %816 = vmatpush1.msra.mxu0 %v1844_v8  ;;  %887 = vmatpush1.msra.mxu1 %v1919_v21  ;;  %v3251_v8 = vld [vmem:[#allocation9_spill] sm:$0xff] }
 0x315   :  { %817 = vmatprep.subr.mxu0 %v1855_v10  ;;  %888 = vmatprep.subr.mxu1 %v1931_v23  ;;  %v3252_v10 = vld [vmem:[#allocation18_spill] sm:$0xff]  ;;  %v3263_v21 = vld [vmem:[#allocation5_spill] sm:$0xff] }
 0x316   :  { %818 = vmatpush1.msra.mxu0 %v1867_v12  ;;  %889 = vmatpush1.msra.mxu1 %v1943_v25  ;;  %v3254_v12 = vld [vmem:[#allocation19_spill] sm:$0xff] }
 0x317   :  { %819 = vmatprep.subr.mxu0 %v1884_v15  ;;  %890 = vmatprep.subr.mxu1 %v1955_v27  ;;  %v3257_v15 = vld [vmem:[#allocation14_spill] sm:$0xff] }
 0x318   :  { %820 = vmatpush1.msra.mxu0 %v1896_v17  ;;  %891 = vmatpush1.msra.mxu1 %v1967_v29  ;;  %v3259_v17 = vld [vmem:[#allocation16_spill] sm:$0xff] }
 0x319   :  { %821 = vmatprep.subr.mxu0 %v1913_v20  ;;  %892 = vmatprep.subr.mxu1 %v1979_v31  ;;  %v2510_v20 = vld [vmem:[%s3113_s1 + $0x1e8] sm:$0xff]  ;;  %v1553_v31 = vld [vmem:[%s3114_s0 + $0x78] sm:$0xff] }
 0x31a   :  { %822 = vmatpush1.msra.mxu0 %v1925_v22  ;;  %893 = vmatpush1.msra.mxu1 %v1991_v33  ;;  %3262 = vst [vmem:[#allocation11_spill] sm:$0xff] %v2510_v20  ;;  %v1550_v22 = vld [vmem:[%s3114_s0 + $0x60] sm:$0xff] }
 0x31b   :  { %823 = vmatprep.subr.mxu0 %v1937_v24  ;;  %894 = vmatprep.subr.mxu1 %v2003_v35  ;;  %v1551_v24 = vld [vmem:[%s3114_s0 + $0x68] sm:$0xff] }
 0x31c   :  { %824 = vmatpush1.msra.mxu0 %v1949_v26  ;;  %895 = vmatpush1.msra.mxu1 %v2015_v37 }
 0x31d   :  { %825 = vmatprep.subr.mxu0 %v1961_v28  ;;  %896 = vmatprep.subr.mxu1 %v2027_v39 }
 0x31e   :  { %826 = vmatpush1.msra.mxu0 %v1973_v30  ;;  %897 = vmatpush1.msra.mxu1 %v2039_v41 }
 0x31f   :  { %827 = vmatprep.subr.mxu0 %v1985_v32  ;;  %898 = vmatprep.subr.mxu1 %v2051_v43 }
 0x320   :  { %828 = vmatpush1.msra.mxu0 %v1997_v34  ;;  %899 = vmatpush1.msra.mxu1 %v2063_v45  ;;  %v1552_v34 = vld [vmem:[%s3114_s0 + $0x70] sm:$0xff] }
 0x321   :  { %829 = vmatprep.subr.mxu0 %v2009_v36  ;;  %900 = vmatprep.subr.mxu1 %v2075_v47 }
 0x322   :  { %830 = vmatpush1.msra.mxu0 %v2021_v38  ;;  %901 = vmatpush1.msra.mxu1 %v2087_v49 }
 0x323   :  { %831 = vmatprep.subr.mxu0 %v2033_v40  ;;  %902 = vmatprep.subr.mxu1 %v2099_v51 }
 0x324   :  { %832 = vmatpush1.msra.mxu0 %v2045_v42  ;;  %903 = vmatpush1.msra.mxu1 %v3206_v44 }
 0x325   :  { %833 = vmatprep.subr.mxu0 %v3245_v1  ;;  %904 = vmatprep.subr.mxu1 %v3246_v2  ;;  %v2614_v1 = vld [vmem:[%s3113_s1 + $0x190] sm:$0xff] }
 0x326   :  { %834 = vmatpush1.msra.mxu0 %v3247_v4  ;;  %905 = vmatpush1.msra.mxu1 %v3248_v5  ;;  %v2620_v4 = vld [vmem:[%s3113_s1 + $0x168] sm:$0xff] }
 0x327   :  { %835 = vmatprep.subr.mxu0 %v3249_v6  ;;  %906 = vmatprep.subr.mxu1 %v3250_v7  ;;  %v2626_v6 = vld [vmem:[%s3113_s1 + $0x178] sm:$0xff] }
 0x328   :  { %836 = vmatpush1.msra.mxu0 %v3251_v8  ;;  %907 = vmatpush1.msra.mxu1 %v3252_v10  ;;  %v2632_v8 = vld [vmem:[%s3113_s1 + $0x160] sm:$0xff] }
 0x329   :  { %837 = vmatprep.subr.mxu0 %v3253_v11  ;;  %908 = vmatprep.subr.mxu1 %v3254_v12  ;;  %v2638_v11 = vld [vmem:[%s3113_s1 + $0x170] sm:$0xff] }
 0x32a   :  { %838 = vmatpush1.msra.mxu0 %v3255_v13  ;;  %909 = vmatpush1.msra.mxu1 %v3256_v14  ;;  %v2644_v13 = vld [vmem:[%s3113_s1 + $0x148] sm:$0xff] }
 0x32b   :  { %839 = vmatprep.subr.mxu0 %v3257_v15  ;;  %910 = vmatprep.subr.mxu1 %v3258_v16  ;;  %v2650_v15 = vld [vmem:[%s3113_s1 + $0x158] sm:$0xff] }
 0x32c   :  { %840 = vmatpush1.msra.mxu0 %v3259_v17  ;;  %873 = vmatprep.mubr.f32.mxu0 %v3260_v18  ;;  %v2656_v17 = vld [vmem:[%s3113_s1 + $0x140] sm:$0xff] }
 0x32d   :  { %911 = vmatpush1.msra.mxu1 %v3261_v19  ;;  %944 = vmatprep.mubr.f32.mxu1 %v3260_v18 }
 0x32e   :  { %990 = vmatprep.subr.mxu0 %v2510_v20  ;;  %1061 = vmatprep.subr.mxu1 %v3263_v21  ;;  %v2662_v21 = vld [vmem:[%s3113_s1 + $0x150] sm:$0xff] }
 0x3cd   :  { %v694_v23 = vpop.f32.mrf.mxu0  ;;  %v765_v29 = vpop.f32.mrf.mxu1 }
 0x3ce   :  { %v770_v25 = vadd.f32 %v1550_v22, %v694_v23  ;;  %v772_v37 = vadd.f32 %v1552_v34, %v765_v29  ;;  %v2668_v22 = vld [vmem:[%s3113_s1 + $0x128] sm:$0xff]  ;;  %v2674_v23 = vld [vmem:[%s3113_s1 + $0x138] sm:$0xff]  ;;  %v2710_v29 = vld [vmem:[%s3113_s1 + $0x110] sm:$0xff] }
 0x3cf   :  { %v696_v26 = vpop.f32.mrf.mxu0  ;;  %v767_v32 = vpop.f32.mrf.mxu1  ;;  %v2740_v34 = vld [vmem:[%s3113_s1 + $0xc8] sm:$0xff] }
 0x3d0   :  { %v1554_v27 = vmul.f32 -1.442695, %v770_v25  ;;  %v771_v28 = vadd.f32 %v1551_v24, %v696_v26  ;;  %v773_v33 = vadd.f32 %v1553_v31, %v767_v32  ;;  %v2680_v24 = vld [vmem:[%s3113_s1 + $0x120] sm:$0xff]  ;;  %v2686_v25 = vld [vmem:[%s3113_s1 + $0x130] sm:$0xff]  ;;  %v2692_v26 = vld [vmem:[%s3113_s1 + $0x108] sm:$0xff] }
 0x3d1   :  { %v2722_v31 = vld [vmem:[%s3113_s1 + $0xf8] sm:$0xff]  ;;  %v2728_v32 = vld [vmem:[%s3113_s1 + $0xe0] sm:$0xff] }
 0x3d2   :  { %1639 = vpow2.f32 %v1554_v27  ;;  %v1555_v30 = vmul.f32 -1.442695, %v771_v28  ;;  %v1556_v35 = vmul.f32 -1.442695, %v773_v33  ;;  %v2698_v27 = vld [vmem:[%s3113_s1 + $0x118] sm:$0xff]  ;;  %v2704_v28 = vld [vmem:[%s3113_s1 + $0x100] sm:$0xff] }
 0x3d3   :  { %v2734_v33 = vld [vmem:[%s3113_s1 + $0xf0] sm:$0xff] }
 0x3d4   :  { %1641 = vpow2.f32 %v1555_v30  ;;  %v2716_v30 = vld [vmem:[%s3113_s1 + $0xe8] sm:$0xff] }
 0x3d5   :  { %1643 = vpow2.f32 %v1556_v35  ;;  %v2746_v35 = vld [vmem:[%s3113_s1 + $0xd8] sm:$0xff] }
 0x3df   :  { %v1640_v36 = vpop.eup %1639 }
 0x3e0   :  { %v778_v38 = vadd.f32 1.0, %v1640_v36  ;;  %v2752_v36 = vld [vmem:[%s3113_s1 + $0xc0] sm:$0xff] }
 0x3e1   :  { %v1642_v39 = vpop.eup %1641 }
 0x3e2   :  { %1645 = vrcp.f32 %v778_v38  ;;  %v784_v40 = vadd.f32 1.0, %v1642_v39  ;;  %v1644_v41 = vpop.eup %1643  ;;  %v2764_v38 = vld [vmem:[%s3113_s1 + $0xa8] sm:$0xff]  ;;  %v2770_v39 = vld [vmem:[%s3113_s1 + $0xb8] sm:$0xff] }
 0x3e3   :  { %1647 = vtanh.f32 %v772_v37  ;;  %v791_v47 = vadd.f32 1.0, %v1644_v41  ;;  %v2758_v37 = vld [vmem:[%s3113_s1 + $0xd0] sm:$0xff] }
 0x3e4   :  { %1649 = vrcp.f32 %v784_v40  ;;  %v2776_v40 = vld [vmem:[%s3113_s1 + $0xa0] sm:$0xff]  ;;  %v2782_v41 = vld [vmem:[%s3113_s1 + $0xb0] sm:$0xff] }
 0x3e5   :  { %1651 = vrcp.f32 %v791_v47 }
 0x3ef   :  { %v1646_v42 = vpop.eup %1645 }
 0x3f0   :  { %v1648_v43 = vpop.eup %1647 }
 0x3f1   :  { %v1650_v45 = vpop.eup %1649  ;;  %v795_v49 = vmul.f32 %v1648_v43, %v1646_v42  ;;  %v2788_v42 = vld [vmem:[%s3113_s1 + $0x88] sm:$0xff]  ;;  %v2795_v43 = vld [vmem:[%s3113_s1 + $0x80] sm:$0xff] }
 0x3f2   :  { %v794_v46 = vmul.f32 %v1650_v45, %v2437_v53  ;;  %v1652_v61 = vpop.eup %1651  ;;  %v2542_v53 = vld [vmem:[%s3113_s1 + $0x1f0] sm:$0xff]  ;;  %v2802_v45 = vld [vmem:[%s3113_s1 + $0x68] sm:$0xff] }
 0x3f3   :  { %3264 = vst [vmem:[#allocation4_spill] sm:$0xff] %v2802_v45 }
 0x3f4   :  { %v2527_v55 = vadd.f32 %v795_v49, %v794_v46 }
 0x3f6   :  { %1653 = vtanh.f32 %v2527_v55 }
 0x403   :  { %v1654_v58 = vpop.eup %1653 }
 0x404   :  { %v798_v63 = vmul.f32 %v1654_v58, %v1652_v61 }
 0x406   :  { %1557 = vst [vmem:[%s3115_s2 + $0x18] sm:$0xff] %v798_v63  ;;  %874 = vmatmul.mubr.f32.vlgmr.msra.gmra.mxu0 %v798_v63  ;;  %945 = vmatmul.mubr.f32.vlgmr.msra.gmra.mxu1 %v798_v63 }
 0x407   :  { %991 = vmatpush1.msra.mxu0 %v2536_v9  ;;  %1062 = vmatpush1.msra.mxu1 %v2542_v53 }
 0x408   :  { %992 = vmatprep.subr.mxu0 %v2548_v57  ;;  %1063 = vmatprep.subr.mxu1 %v2554_v62 }
 0x409   :  { %993 = vmatpush1.msra.mxu0 %v2560_v0  ;;  %1064 = vmatpush1.msra.mxu1 %v2566_v56 }
 0x40a   :  { %994 = vmatprep.subr.mxu0 %v2572_v3  ;;  %1065 = vmatprep.subr.mxu1 %v2578_v59 }
 0x40b   :  { %995 = vmatpush1.msra.mxu0 %v2584_v54  ;;  %1066 = vmatpush1.msra.mxu1 %v2590_v52 }
 0x40c   :  { %996 = vmatprep.subr.mxu0 %v2596_v60  ;;  %1067 = vmatprep.subr.mxu1 %v2602_v48 }
 0x40d   :  { %997 = vmatpush1.msra.mxu0 %v2608_v50  ;;  %1068 = vmatpush1.msra.mxu1 %v2614_v1 }
 0x40e   :  { %998 = vmatprep.subr.mxu0 %v2620_v4  ;;  %1069 = vmatprep.subr.mxu1 %v2626_v6 }
 0x40f   :  { %999 = vmatpush1.msra.mxu0 %v2632_v8  ;;  %1070 = vmatpush1.msra.mxu1 %v2638_v11 }
 0x410   :  { %1000 = vmatprep.subr.mxu0 %v2644_v13  ;;  %1071 = vmatprep.subr.mxu1 %v2650_v15 }
 0x411   :  { %1001 = vmatpush1.msra.mxu0 %v2656_v17  ;;  %1072 = vmatpush1.msra.mxu1 %v2662_v21 }
 0x412   :  { %1002 = vmatprep.subr.mxu0 %v2668_v22  ;;  %1073 = vmatprep.subr.mxu1 %v2674_v23 }
 0x413   :  { %1003 = vmatpush1.msra.mxu0 %v2680_v24  ;;  %1074 = vmatpush1.msra.mxu1 %v2686_v25 }
 0x414   :  { %1004 = vmatprep.subr.mxu0 %v2692_v26  ;;  %1075 = vmatprep.subr.mxu1 %v2698_v27 }
 0x415   :  { %1005 = vmatpush1.msra.mxu0 %v2704_v28  ;;  %1076 = vmatpush1.msra.mxu1 %v2710_v29 }
 0x416   :  { %1006 = vmatprep.subr.mxu0 %v2716_v30  ;;  %1077 = vmatprep.subr.mxu1 %v2722_v31 }
 0x417   :  { %1007 = vmatpush1.msra.mxu0 %v2728_v32  ;;  %1078 = vmatpush1.msra.mxu1 %v2734_v33 }
 0x418   :  { %1008 = vmatprep.subr.mxu0 %v2740_v34  ;;  %1079 = vmatprep.subr.mxu1 %v2746_v35 }
 0x419   :  { %1009 = vmatpush1.msra.mxu0 %v2752_v36  ;;  %1080 = vmatpush1.msra.mxu1 %v2758_v37 }
 0x41a   :  { %1010 = vmatprep.subr.mxu0 %v2764_v38  ;;  %1081 = vmatprep.subr.mxu1 %v2770_v39 }
 0x41b   :  { %1011 = vmatpush1.msra.mxu0 %v2776_v40  ;;  %1082 = vmatpush1.msra.mxu1 %v2782_v41 }
 0x41c   :  { %1012 = vmatprep.subr.mxu0 %v2788_v42  ;;  %1083 = vmatprep.subr.mxu1 %v2099_v51  ;;  %v2809_v51 = vld [vmem:[%s3113_s1 + $0x60] sm:$0xff] }
 0x41d   :  { %1013 = vmatpush1.msra.mxu0 %v2795_v43  ;;  %1084 = vmatpush1.msra.mxu1 %v3206_v44  ;;  %3265 = vst [vmem:[#allocation6_spill] sm:$0xff] %v2809_v51  ;;  %v2816_v44 = vld [vmem:[%s3113_s1 + $0x48] sm:$0xff] }
 0x41e   :  { %1014 = vmatprep.subr.mxu0 %v2802_v45  ;;  %1085 = vmatprep.subr.mxu1 %v3246_v2  ;;  %3266 = vst [vmem:[#allocation13_spill] sm:$0xff] %v2816_v44  ;;  %v2823_v2 = vld [vmem:[%s3113_s1 + $0x40] sm:$0xff] }
 0x41f   :  { %1015 = vmatpush1.msra.mxu0 %v2809_v51  ;;  %1086 = vmatpush1.msra.mxu1 %v3248_v5  ;;  %3267 = vst [vmem:[#allocation7_spill] sm:$0xff] %v2823_v2  ;;  %v2830_v5 = vld [vmem:[%s3113_s1 + $0x28] sm:$0xff] }
 0x420   :  { %1016 = vmatprep.subr.mxu0 %v2816_v44  ;;  %1087 = vmatprep.subr.mxu1 %v3250_v7  ;;  %3268 = vst [vmem:[#allocation15_spill] sm:$0xff] %v2830_v5  ;;  %v2837_v7 = vld [vmem:[%s3113_s1 + $0x20] sm:$0xff] }
 0x421   :  { %1017 = vmatpush1.msra.mxu0 %v2823_v2  ;;  %1088 = vmatpush1.msra.mxu1 %v3252_v10  ;;  %3269 = vst [vmem:[#allocation8_spill] sm:$0xff] %v2837_v7  ;;  %v2844_v10 = vld [vmem:[%s3113_s1 + $0x8] sm:$0xff] }
 0x422   :  { %1018 = vmatprep.subr.mxu0 %v2830_v5  ;;  %1089 = vmatprep.subr.mxu1 %v3254_v12  ;;  %3270 = vst [vmem:[#allocation17_spill] sm:$0xff] %v2844_v10  ;;  %v2851_v12 = vld [vmem:[%s3113_s1] sm:$0xff] }
 0x423   :  { %1019 = vmatpush1.msra.mxu0 %v2837_v7  ;;  %1090 = vmatpush1.msra.mxu1 %v3256_v14  ;;  %3271 = vst [vmem:[#allocation9_spill] sm:$0xff] %v2851_v12  ;;  %v2861_v14 = vld [vmem:[%s3113_s1 + $0x1f8] sm:$0xff] }
 0x424   :  { %1020 = vmatprep.subr.mxu0 %v2844_v10  ;;  %1091 = vmatprep.subr.mxu1 %v3258_v16  ;;  %3272 = vst [vmem:[#allocation18_spill] sm:$0xff] %v2861_v14  ;;  %v1558_v16 = vld [vmem:[%s3114_s0 + $0x80] sm:$0xff]  ;;  %v1560_v10 = vld [vmem:[%s3114_s0 + $0x90] sm:$0xff] }
 0x425   :  { %1021 = vmatpush1.msra.mxu0 %v2851_v12  ;;  %1054 = vmatprep.mubr.f32.mxu0 %v3260_v18 }
 0x426   :  { %1092 = vmatpush1.msra.mxu1 %v3261_v19  ;;  %1125 = vmatprep.mubr.f32.mxu1 %v3260_v18  ;;  %v1559_v19 = vld [vmem:[%s3114_s0 + $0x88] sm:$0xff] }
 0x427   :  { %1171 = vmatprep.subr.mxu0 %v2510_v20  ;;  %1242 = vmatprep.subr.mxu1 %v2861_v14  ;;  %v1561_v14 = vld [vmem:[%s3114_s0 + $0x98] sm:$0xff] }
 0x4c6   :  { %v875_v47 = vpop.f32.mrf.mxu0  ;;  %v946_v63 = vpop.f32.mrf.mxu1 }
 0x4c7   :  { %v951_v49 = vadd.f32 %v1558_v16, %v875_v47  ;;  %v953_v16 = vadd.f32 %v1560_v10, %v946_v63  ;;  %v2950_v63 = vld [vmem:[%s3113_s1 + $0x70] sm:$0xff] }
 0x4c8   :  { %v877_v46 = vpop.f32.mrf.mxu0  ;;  %v948_v18 = vpop.f32.mrf.mxu1  ;;  %3274 = vst [vmem:[#allocation19_spill] sm:$0xff] %v2950_v63 }
 0x4c9   :  { %v1562_v61 = vmul.f32 -1.442695, %v951_v49  ;;  %v952_v58 = vadd.f32 %v1559_v19, %v877_v46  ;;  %v954_v12 = vadd.f32 %v1561_v14, %v948_v18 }
 0x4cb   :  { %1655 = vpow2.f32 %v1562_v61  ;;  %v1563_v20 = vmul.f32 -1.442695, %v952_v58  ;;  %v1564_v7 = vmul.f32 -1.442695, %v954_v12  ;;  %v2943_v12 = vld [vmem:[%s3113_s1 + $0x78] sm:$0xff] }
 0x4cc   :  { %3273 = vst [vmem:[#allocation10_spill] sm:$0xff] %v2943_v12 }
 0x4cd   :  { %1657 = vpow2.f32 %v1563_v20 }
 0x4ce   :  { %1659 = vpow2.f32 %v1564_v7 }
 0x4d8   :  { %v1656_v5 = vpop.eup %1655 }
 0x4d9   :  { %v959_v47 = vadd.f32 1.0, %v1656_v5 }
 0x4da   :  { %v1658_v49 = vpop.eup %1657 }
 0x4db   :  { %1661 = vrcp.f32 %v959_v47  ;;  %v965_v19 = vadd.f32 1.0, %v1658_v49  ;;  %v1660_v20 = vpop.eup %1659  ;;  %v2957_v47 = vld [vmem:[%s3113_s1 + $0x58] sm:$0xff] }
 0x4dc   :  { %1663 = vtanh.f32 %v953_v16  ;;  %v972_v2 = vadd.f32 1.0, %v1660_v20  ;;  %v3275_v16 = vld [vmem:[#allocation13_spill] sm:$0xff]  ;;  %3276 = vst [vmem:[#allocation12_spill] sm:$0xff] %v2957_v47  ;;  %v3277_v49 = vld [vmem:[#allocation7_spill] sm:$0xff] }
 0x4dd   :  { %1665 = vrcp.f32 %v965_v19  ;;  %v2964_v19 = vld [vmem:[%s3113_s1 + $0x50] sm:$0xff]  ;;  %v3279_v20 = vld [vmem:[#allocation15_spill] sm:$0xff] }
 0x4de   :  { %1667 = vrcp.f32 %v972_v2  ;;  %v2936_v2 = vld [vmem:[%s3113_s1 + $0x90] sm:$0xff]  ;;  %3278 = vst [vmem:[#allocation20_spill] sm:$0xff] %v2964_v19 }
 0x4e8   :  { %v1662_v46 = vpop.eup %1661 }
 0x4e9   :  { %v1664_v61 = vpop.eup %1663 }
 0x4ea   :  { %v1666_v58 = vpop.eup %1665  ;;  %v976_v18 = vmul.f32 %v1664_v61, %v1662_v46  ;;  %v2971_v46 = vld [vmem:[%s3113_s1 + $0x38] sm:$0xff]  ;;  %v3281_v61 = vld [vmem:[#allocation8_spill] sm:$0xff] }
 0x4eb   :  { %v975_v14 = vmul.f32 %v1666_v58, %v2527_v55  ;;  %v1668_v5 = vpop.eup %1667  ;;  %v2929_v55 = vld [vmem:[%s3113_s1 + $0x98] sm:$0xff]  ;;  %3280 = vst [vmem:[#allocation14_spill] sm:$0xff] %v2971_v46  ;;  %v2978_v58 = vld [vmem:[%s3113_s1 + $0x30] sm:$0xff] }
 0x4ec   :  { %3282 = vst [vmem:[#allocation21_spill] sm:$0xff] %v2978_v58 }
 0x4ed   :  { %v2877_v44 = vadd.f32 %v976_v18, %v975_v14  ;;  %v3283_v18 = vld [vmem:[#allocation17_spill] sm:$0xff]  ;;  %v2985_v14 = vld [vmem:[%s3113_s1 + $0x18] sm:$0xff] }
 0x4ee   :  { %3284 = vst [vmem:[#allocation16_spill] sm:$0xff] %v2985_v14 }
 0x4ef   :  { %1669 = vtanh.f32 %v2877_v44 }
 0x4fc   :  { %v1670_v10 = vpop.eup %1669 }
 0x4fd   :  { %v979_v7 = vmul.f32 %v1670_v10, %v1668_v5  ;;  %v3285_v5 = vld [vmem:[#allocation9_spill] sm:$0xff]  ;;  %v3286_v10 = vmov 0.0  }
 0x4ff   :  { %1565 = vst [vmem:[%s3115_s2 + $0x20] sm:$0xff] %v979_v7  ;;  %1055 = vmatmul.mubr.f32.vlgmr.msra.gmra.mxu0 %v979_v7  ;;  %1126 = vmatmul.mubr.f32.vlgmr.msra.gmra.mxu1 %v979_v7  ;;  %v2993_v7 = vld [vmem:[%s3113_s1 + $0x10] sm:$0xff] }
 0x500   :  { %1172 = vmatpush1.msra.mxu0 %v2536_v9  ;;  %1243 = vmatpush1.msra.mxu1 %v2542_v53  ;;  %3287 = vst [vmem:[#allocation22_spill] sm:$0xff] %v2993_v7 }
 0x501   :  { %1173 = vmatprep.subr.mxu0 %v2548_v57  ;;  %1244 = vmatprep.subr.mxu1 %v2554_v62 }
 0x502   :  { %1174 = vmatpush1.msra.mxu0 %v2560_v0  ;;  %1245 = vmatpush1.msra.mxu1 %v2566_v56 }
 0x503   :  { %1175 = vmatprep.subr.mxu0 %v2572_v3  ;;  %1246 = vmatprep.subr.mxu1 %v2578_v59 }
 0x504   :  { %1176 = vmatpush1.msra.mxu0 %v2584_v54  ;;  %1247 = vmatpush1.msra.mxu1 %v2590_v52 }
 0x505   :  { %1177 = vmatprep.subr.mxu0 %v2596_v60  ;;  %1248 = vmatprep.subr.mxu1 %v2602_v48 }
 0x506   :  { %1178 = vmatpush1.msra.mxu0 %v2608_v50  ;;  %1249 = vmatpush1.msra.mxu1 %v2614_v1 }
 0x507   :  { %1179 = vmatprep.subr.mxu0 %v2620_v4  ;;  %1250 = vmatprep.subr.mxu1 %v2626_v6 }
 0x508   :  { %1180 = vmatpush1.msra.mxu0 %v2632_v8  ;;  %1251 = vmatpush1.msra.mxu1 %v2638_v11 }
 0x509   :  { %1181 = vmatprep.subr.mxu0 %v2644_v13  ;;  %1252 = vmatprep.subr.mxu1 %v2650_v15 }
 0x50a   :  { %1182 = vmatpush1.msra.mxu0 %v2656_v17  ;;  %1253 = vmatpush1.msra.mxu1 %v2662_v21 }
 0x50b   :  { %1183 = vmatprep.subr.mxu0 %v2668_v22  ;;  %1254 = vmatprep.subr.mxu1 %v2674_v23 }
 0x50c   :  { %1184 = vmatpush1.msra.mxu0 %v2680_v24  ;;  %1255 = vmatpush1.msra.mxu1 %v2686_v25 }
 0x50d   :  { %1185 = vmatprep.subr.mxu0 %v2692_v26  ;;  %1256 = vmatprep.subr.mxu1 %v2698_v27 }
 0x50e   :  { %1186 = vmatpush1.msra.mxu0 %v2704_v28  ;;  %1257 = vmatpush1.msra.mxu1 %v2710_v29 }
 0x50f   :  { %1187 = vmatprep.subr.mxu0 %v2716_v30  ;;  %1258 = vmatprep.subr.mxu1 %v2722_v31 }
 0x510   :  { %1188 = vmatpush1.msra.mxu0 %v2728_v32  ;;  %1259 = vmatpush1.msra.mxu1 %v2734_v33 }
 0x511   :  { %1189 = vmatprep.subr.mxu0 %v2740_v34  ;;  %1260 = vmatprep.subr.mxu1 %v2746_v35 }
 0x512   :  { %1190 = vmatpush1.msra.mxu0 %v2752_v36  ;;  %1261 = vmatpush1.msra.mxu1 %v2758_v37 }
 0x513   :  { %1191 = vmatprep.subr.mxu0 %v2764_v38  ;;  %1262 = vmatprep.subr.mxu1 %v2770_v39 }
 0x514   :  { %1192 = vmatpush1.msra.mxu0 %v2776_v40  ;;  %1263 = vmatpush1.msra.mxu1 %v2782_v41 }
 0x515   :  { %1193 = vmatprep.subr.mxu0 %v2788_v42  ;;  %1264 = vmatprep.subr.mxu1 %v2929_v55 }
 0x516   :  { %1194 = vmatpush1.msra.mxu0 %v2795_v43  ;;  %1265 = vmatpush1.msra.mxu1 %v2936_v2 }
 0x517   :  { %1195 = vmatprep.subr.mxu0 %v2802_v45  ;;  %1266 = vmatprep.subr.mxu1 %v2943_v12 }
 0x518   :  { %1196 = vmatpush1.msra.mxu0 %v2809_v51  ;;  %1267 = vmatpush1.msra.mxu1 %v2950_v63 }
 0x519   :  { %1197 = vmatprep.subr.mxu0 %v3275_v16  ;;  %1268 = vmatprep.subr.mxu1 %v2957_v47  ;;  %v1568_v16 = vld [vmem:[%s3114_s0 + $0xb0] sm:$0xff] }
 0x51a   :  { %1198 = vmatpush1.msra.mxu0 %v3277_v49  ;;  %1269 = vmatpush1.msra.mxu1 %v2964_v19 }
 0x51b   :  { %1199 = vmatprep.subr.mxu0 %v3279_v20  ;;  %1270 = vmatprep.subr.mxu1 %v2971_v46 }
 0x51c   :  { %1200 = vmatpush1.msra.mxu0 %v3281_v61  ;;  %1271 = vmatpush1.msra.mxu1 %v2978_v58  ;;  %v3289_v58 = vld [vmem:[#allocation18_spill] sm:$0xff]  ;;  %v1567_v61 = vld [vmem:[%s3114_s0 + $0xa8] sm:$0xff] }
 0x51d   :  { %1201 = vmatprep.subr.mxu0 %v3283_v18  ;;  %1272 = vmatprep.subr.mxu1 %v2985_v14  ;;  %v3288_v18 = vld [vmem:[#allocation11_spill] sm:$0xff]  ;;  %v1566_v14 = vld [vmem:[%s3114_s0 + $0xa0] sm:$0xff] }
 0x51e   :  { %1202 = vmatpush1.msra.mxu0 %v3285_v5  ;;  %1235 = vmatprep.mubr.f32.mxu0 %v3286_v10 }
 0x51f   :  { %1273 = vmatpush1.msra.mxu1 %v2993_v7  ;;  %1306 = vmatprep.mubr.f32.mxu1 %v3286_v10 }
 0x520   :  { %1352 = vmatprep.subr.mxu0 %v3288_v18  ;;  %1423 = vmatprep.subr.mxu1 %v3289_v58  ;;  %v1569_v58 = vld [vmem:[%s3114_s0 + $0xb8] sm:$0xff] }
 0x5bf   :  { %v1056_v5 = vpop.f32.mrf.mxu0  ;;  %v1127_v7 = vpop.f32.mrf.mxu1 }
 0x5c0   :  { %v1132_v46 = vadd.f32 %v1566_v14, %v1056_v5  ;;  %v1134_v14 = vadd.f32 %v1568_v16, %v1127_v7 }
 0x5c1   :  { %v1058_v20 = vpop.f32.mrf.mxu0  ;;  %v1129_v18 = vpop.f32.mrf.mxu1 }
 0x5c2   :  { %v1570_v19 = vmul.f32 -1.442695, %v1132_v46  ;;  %v1133_v49 = vadd.f32 %v1567_v61, %v1058_v20  ;;  %v1135_v47 = vadd.f32 %v1569_v58, %v1129_v18 }
 0x5c4   :  { %1671 = vpow2.f32 %v1570_v19  ;;  %v1571_v10 = vmul.f32 -1.442695, %v1133_v49  ;;  %v1572_v63 = vmul.f32 -1.442695, %v1135_v47 }
 0x5c6   :  { %1673 = vpow2.f32 %v1571_v10 }
 0x5c7   :  { %1675 = vpow2.f32 %v1572_v63 }
 0x5d1   :  { %v1672_v51 = vpop.eup %1671 }
 0x5d2   :  { %v1140_v5 = vadd.f32 1.0, %v1672_v51 }
 0x5d3   :  { %v1674_v46 = vpop.eup %1673 }
 0x5d4   :  { %1677 = vrcp.f32 %v1140_v5  ;;  %v1146_v19 = vadd.f32 1.0, %v1674_v46  ;;  %v1676_v49 = vpop.eup %1675 }
 0x5d5   :  { %1679 = vtanh.f32 %v1134_v14  ;;  %v1153_v12 = vadd.f32 1.0, %v1676_v49 }
 0x5d6   :  { %1681 = vrcp.f32 %v1146_v19 }
 0x5d7   :  { %1683 = vrcp.f32 %v1153_v12  ;;  %v1582_v12 = vld [vmem:[%s3114_s0 + $0xe0] sm:$0xff] }
 0x5e1   :  { %v1678_v20 = vpop.eup %1677 }
 0x5e2   :  { %v1680_v61 = vpop.eup %1679 }
 0x5e3   :  { %v1682_v10 = vpop.eup %1681  ;;  %v1157_v58 = vmul.f32 %v1680_v61, %v1678_v20  ;;  %v1585_v20 = vld [vmem:[%s3114_s0 + $0xf8] sm:$0xff] }
 0x5e4   :  { %v1156_v18 = vmul.f32 %v1682_v10, %v2877_v44  ;;  %v1684_v51 = vpop.eup %1683 }
 0x5e6   :  { %v3012_v45 = vadd.f32 %v1157_v58, %v1156_v18  ;;  %v1584_v58 = vld [vmem:[%s3114_s0 + $0xf0] sm:$0xff] }
 0x5e8   :  { %1685 = vtanh.f32 %v3012_v45 }
 0x5f5   :  { %v1686_v16 = vpop.eup %1685 }
 0x5f6   :  { %v1160_v63 = vmul.f32 %v1686_v16, %v1684_v51 }
 0x5f8   :  { %1573 = vst [vmem:[%s3115_s2 + $0x28] sm:$0xff] %v1160_v63  ;;  %1236 = vmatmul.mubr.f32.vlgmr.msra.gmra.mxu0 %v1160_v63  ;;  %1307 = vmatmul.mubr.f32.vlgmr.msra.gmra.mxu1 %v1160_v63 }
 0x5f9   :  { %1353 = vmatpush1.msra.mxu0 %v2536_v9  ;;  %1424 = vmatpush1.msra.mxu1 %v2542_v53  ;;  %v3290_v9 = vld [vmem:[#allocation4_spill] sm:$0xff]  ;;  %v3291_v53 = vld [vmem:[#allocation10_spill] sm:$0xff] }
 0x5fa   :  { %1354 = vmatprep.subr.mxu0 %v2548_v57  ;;  %1425 = vmatprep.subr.mxu1 %v2554_v62  ;;  %v3292_v57 = vld [vmem:[#allocation6_spill] sm:$0xff]  ;;  %v3293_v62 = vld [vmem:[#allocation19_spill] sm:$0xff] }
 0x5fb   :  { %1355 = vmatpush1.msra.mxu0 %v2560_v0  ;;  %1426 = vmatpush1.msra.mxu1 %v2566_v56  ;;  %v3294_v0 = vld [vmem:[#allocation13_spill] sm:$0xff]  ;;  %v3295_v56 = vld [vmem:[#allocation12_spill] sm:$0xff] }
 0x5fc   :  { %1356 = vmatprep.subr.mxu0 %v2572_v3  ;;  %1427 = vmatprep.subr.mxu1 %v2578_v59  ;;  %v3296_v3 = vld [vmem:[#allocation7_spill] sm:$0xff]  ;;  %v3297_v59 = vld [vmem:[#allocation20_spill] sm:$0xff] }
 0x5fd   :  { %1357 = vmatpush1.msra.mxu0 %v2584_v54  ;;  %1428 = vmatpush1.msra.mxu1 %v2590_v52  ;;  %v3298_v54 = vld [vmem:[#allocation15_spill] sm:$0xff]  ;;  %v3299_v52 = vld [vmem:[#allocation14_spill] sm:$0xff] }
 0x5fe   :  { %1358 = vmatprep.subr.mxu0 %v2596_v60  ;;  %1429 = vmatprep.subr.mxu1 %v2602_v48  ;;  %v3300_v60 = vld [vmem:[#allocation8_spill] sm:$0xff]  ;;  %v3301_v48 = vld [vmem:[#allocation21_spill] sm:$0xff] }
 0x5ff   :  { %1359 = vmatpush1.msra.mxu0 %v2608_v50  ;;  %1430 = vmatpush1.msra.mxu1 %v2614_v1  ;;  %v3302_v50 = vld [vmem:[#allocation17_spill] sm:$0xff]  ;;  %v3303_v1 = vld [vmem:[#allocation16_spill] sm:$0xff] }
 0x600   :  { %1360 = vmatprep.subr.mxu0 %v2620_v4  ;;  %1431 = vmatprep.subr.mxu1 %v2626_v6  ;;  %v3304_v4 = vld [vmem:[#allocation9_spill] sm:$0xff]  ;;  %v3305_v6 = vmov 0.0  }
 0x601   :  { %1361 = vmatpush1.msra.mxu0 %v2632_v8  ;;  %1432 = vmatpush1.msra.mxu1 %v2638_v11  ;;  %v3306_v8 = vld [vmem:[#allocation22_spill] sm:$0xff]  ;;  %v1574_v11 = vld [vmem:[%s3114_s0 + $0xc0] sm:$0xff] }
 0x602   :  { %1362 = vmatprep.subr.mxu0 %v2644_v13  ;;  %1433 = vmatprep.subr.mxu1 %v2650_v15  ;;  %v1575_v15 = vld [vmem:[%s3114_s0 + $0xc8] sm:$0xff] }
 0x603   :  { %1363 = vmatpush1.msra.mxu0 %v2656_v17  ;;  %1434 = vmatpush1.msra.mxu1 %v2662_v21 }
 0x604   :  { %1364 = vmatprep.subr.mxu0 %v2668_v22  ;;  %1435 = vmatprep.subr.mxu1 %v2674_v23 }
 0x605   :  { %1365 = vmatpush1.msra.mxu0 %v2680_v24  ;;  %1436 = vmatpush1.msra.mxu1 %v2686_v25 }
 0x606   :  { %1366 = vmatprep.subr.mxu0 %v2692_v26  ;;  %1437 = vmatprep.subr.mxu1 %v2698_v27  ;;  %v1577_v26 = vld [vmem:[%s3114_s0 + $0xd8] sm:$0xff] }
 0x607   :  { %1367 = vmatpush1.msra.mxu0 %v2704_v28  ;;  %1438 = vmatpush1.msra.mxu1 %v2710_v29  ;;  %v1576_v29 = vld [vmem:[%s3114_s0 + $0xd0] sm:$0xff] }
 0x608   :  { %1368 = vmatprep.subr.mxu0 %v2716_v30  ;;  %1439 = vmatprep.subr.mxu1 %v2722_v31 }
 0x609   :  { %1369 = vmatpush1.msra.mxu0 %v2728_v32  ;;  %1440 = vmatpush1.msra.mxu1 %v2734_v33 }
 0x60a   :  { %1370 = vmatprep.subr.mxu0 %v2740_v34  ;;  %1441 = vmatprep.subr.mxu1 %v2746_v35 }
 0x60b   :  { %1371 = vmatpush1.msra.mxu0 %v2752_v36  ;;  %1442 = vmatpush1.msra.mxu1 %v2758_v37 }
 0x60c   :  { %1372 = vmatprep.subr.mxu0 %v2764_v38  ;;  %1443 = vmatprep.subr.mxu1 %v2770_v39 }
 0x60d   :  { %1373 = vmatpush1.msra.mxu0 %v2776_v40  ;;  %1444 = vmatpush1.msra.mxu1 %v2782_v41 }
 0x60e   :  { %1374 = vmatprep.subr.mxu0 %v2788_v42  ;;  %1445 = vmatprep.subr.mxu1 %v2929_v55 }
 0x60f   :  { %1375 = vmatpush1.msra.mxu0 %v2795_v43  ;;  %1446 = vmatpush1.msra.mxu1 %v2936_v2 }
 0x610   :  { %1376 = vmatprep.subr.mxu0 %v3290_v9  ;;  %1447 = vmatprep.subr.mxu1 %v3291_v53 }
 0x611   :  { %1377 = vmatpush1.msra.mxu0 %v3292_v57  ;;  %1448 = vmatpush1.msra.mxu1 %v3293_v62 }
 0x612   :  { %1378 = vmatprep.subr.mxu0 %v3294_v0  ;;  %1449 = vmatprep.subr.mxu1 %v3295_v56 }
 0x613   :  { %1379 = vmatpush1.msra.mxu0 %v3296_v3  ;;  %1450 = vmatpush1.msra.mxu1 %v3297_v59 }
 0x614   :  { %1380 = vmatprep.subr.mxu0 %v3298_v54  ;;  %1451 = vmatprep.subr.mxu1 %v3299_v52 }
 0x615   :  { %1381 = vmatpush1.msra.mxu0 %v3300_v60  ;;  %1452 = vmatpush1.msra.mxu1 %v3301_v48 }
 0x616   :  { %1382 = vmatprep.subr.mxu0 %v3302_v50  ;;  %1453 = vmatprep.subr.mxu1 %v3303_v1 }
 0x617   :  { %1383 = vmatpush1.msra.mxu0 %v3304_v4  ;;  %1416 = vmatprep.mubr.f32.mxu0 %v3305_v6 }
 0x618   :  { %1454 = vmatpush1.msra.mxu1 %v3306_v8  ;;  %1487 = vmatprep.mubr.f32.mxu1 %v3305_v6 }
 0x6b8   :  { %v1237_v13 = vpop.f32.mrf.mxu0  ;;  %v1308_v24 = vpop.f32.mrf.mxu1 }
 0x6b9   :  { %v1313_v17 = vadd.f32 %v1574_v11, %v1237_v13  ;;  %v1315_v32 = vadd.f32 %v1576_v29, %v1308_v24 }
 0x6ba   :  { %v1239_v21 = vpop.f32.mrf.mxu0  ;;  %v1310_v27 = vpop.f32.mrf.mxu1 }
 0x6bb   :  { %v1578_v22 = vmul.f32 -1.442695, %v1313_v17  ;;  %v1314_v23 = vadd.f32 %v1575_v15, %v1239_v21  ;;  %v1316_v28 = vadd.f32 %v1577_v26, %v1310_v27 }
 0x6bd   :  { %1687 = vpow2.f32 %v1578_v22  ;;  %v1579_v25 = vmul.f32 -1.442695, %v1314_v23  ;;  %v1580_v30 = vmul.f32 -1.442695, %v1316_v28 }
 0x6bf   :  { %1689 = vpow2.f32 %v1579_v25 }
 0x6c0   :  { %1691 = vpow2.f32 %v1580_v30 }
 0x6ca   :  { %v1688_v31 = vpop.eup %1687 }
 0x6cb   :  { %v1321_v33 = vadd.f32 1.0, %v1688_v31 }
 0x6cc   :  { %v1690_v34 = vpop.eup %1689 }
 0x6cd   :  { %1693 = vrcp.f32 %v1321_v33  ;;  %v1327_v35 = vadd.f32 1.0, %v1690_v34  ;;  %v1692_v36 = vpop.eup %1691 }
 0x6ce   :  { %1695 = vtanh.f32 %v1315_v32  ;;  %v1334_v40 = vadd.f32 1.0, %v1692_v36 }
 0x6cf   :  { %1697 = vrcp.f32 %v1327_v35 }
 0x6d0   :  { %1699 = vrcp.f32 %v1334_v40 }
 0x6da   :  { %v1694_v37 = vpop.eup %1693 }
 0x6db   :  { %v1696_v38 = vpop.eup %1695 }
 0x6dc   :  { %v1698_v39 = vpop.eup %1697  ;;  %v1338_v41 = vmul.f32 %v1696_v38, %v1694_v37 }
 0x6dd   :  { %v1337_v42 = vmul.f32 %v1698_v39, %v3012_v45  ;;  %v1700_v44 = vpop.eup %1699  ;;  %v1583_v45 = vld [vmem:[%s3114_s0 + $0xe8] sm:$0xff] }
 0x6df   :  { %v1339_v43 = vadd.f32 %v1338_v41, %v1337_v42 }
 0x6e1   :  { %1701 = vtanh.f32 %v1339_v43 }
 0x6ee   :  { %v1702_v55 = vpop.eup %1701 }
 0x6ef   :  { %v1341_v2 = vmul.f32 %v1702_v55, %v1700_v44 }
 0x6f1   :  { %1581 = vst [vmem:[%s3115_s2 + $0x30] sm:$0xff] %v1341_v2  ;;  %1417 = vmatmul.mubr.f32.vlgmr.msra.gmra.mxu0 %v1341_v2  ;;  %1488 = vmatmul.mubr.f32.vlgmr.msra.gmra.mxu1 %v1341_v2 }
 0x7b1   :  { %v1418_v47 = vpop.f32.mrf.mxu0  ;;  %v1489_v19 = vpop.f32.mrf.mxu1 }
 0x7b2   :  { %v1494_v7 = vadd.f32 %v1582_v12, %v1418_v47  ;;  %v1496_v16 = vadd.f32 %v1584_v58, %v1489_v19 }
 0x7b3   :  { %v1420_v14 = vpop.f32.mrf.mxu0  ;;  %v1491_v61 = vpop.f32.mrf.mxu1 }
 0x7b4   :  { %v1586_v5 = vmul.f32 -1.442695, %v1494_v7  ;;  %v1495_v46 = vadd.f32 %v1583_v45, %v1420_v14  ;;  %v1497_v10 = vadd.f32 %v1585_v20, %v1491_v61 }
 0x7b6   :  { %1703 = vpow2.f32 %v1586_v5  ;;  %v1587_v49 = vmul.f32 -1.442695, %v1495_v46  ;;  %v1588_v18 = vmul.f32 -1.442695, %v1497_v10 }
 0x7b8   :  { %1705 = vpow2.f32 %v1587_v49 }
 0x7b9   :  { %1707 = vpow2.f32 %v1588_v18 }
 0x7c3   :  { %v1704_v51 = vpop.eup %1703 }
 0x7c4   :  { %v1502_v63 = vadd.f32 1.0, %v1704_v51 }
 0x7c5   :  { %v1706_v9 = vpop.eup %1705 }
 0x7c6   :  { %1709 = vrcp.f32 %v1502_v63  ;;  %v1508_v53 = vadd.f32 1.0, %v1706_v9  ;;  %v1708_v57 = vpop.eup %1707 }
 0x7c7   :  { %1711 = vtanh.f32 %v1496_v16  ;;  %v1515_v3 = vadd.f32 1.0, %v1708_v57 }
 0x7c8   :  { %1713 = vrcp.f32 %v1508_v53 }
 0x7c9   :  { %1715 = vrcp.f32 %v1515_v3 }
 0x7d3   :  { %v1710_v62 = vpop.eup %1709 }
 0x7d4   :  { %v1712_v0 = vpop.eup %1711 }
 0x7d5   :  { %v1714_v56 = vpop.eup %1713  ;;  %v1519_v59 = vmul.f32 %v1712_v0, %v1710_v62 }
 0x7d6   :  { %v1518_v54 = vmul.f32 %v1714_v56, %v1339_v43  ;;  %v1716_v60 = vpop.eup %1715 }
 0x7d8   :  { %v1520_v52 = vadd.f32 %v1519_v59, %v1518_v54 }
 0x7da   :  { %1717 = vtanh.f32 %v1520_v52 }
 0x7e7   :  { %v1718_v48 = vpop.eup %1717 }
 0x7e8   :  { %v1522_v50 = vmul.f32 %v1718_v48, %v1716_v60 }
 0x7ea   :  { %1589 = vst [vmem:[%s3115_s2 + $0x38] sm:$0xff] %v1522_v50 }

// kernel: lstm_model_forward.6
= control target key start
LH: loop header
LB: loop body
LE: loop exit
PB: predicated region body
PF: predicated region fallthrough
CT: control target
= control target key end

     0   :  { %v371_v3 = vmov 0.0   ;;  %s763_s1 = inlined_call_operand.vmem [shape: f32[128,512], index: 1, kind: input, shape index: {}]   ;;  %s764_s0 = inlined_call_operand.vmem [shape: f32[64,128], index: 0, kind: input, shape index: {}]   ;;  %s765_s2 = inlined_call_operand.vmem [shape: f32[1,512], index: 2, kind: input, shape index: {}]   ;;  %s766_s3 = inlined_call_operand.vmem [shape: f32[64,512], index: 3, kind: output, shape index: {}]  }
   0x1   :  { %v83_v0 = vld [vmem:[%s763_s1 + $0x1e8] sm:$0xff]  ;;  %v85_v1 = vld [vmem:[%s763_s1 + $0x1f8] sm:$0xff]  ;;  %v82_v2 = vld [vmem:[%s763_s1 + $0x1e0] sm:$0xff]  ;;  %172 = vmatprep.mubr.f32.mxu0 %v371_v3  ;;  %285 = vmatprep.mubr.f32.mxu1 %v371_v3 }
   0x2   :  { %108 = vmatprep.subr.mxu0 %v83_v0  ;;  %221 = vmatprep.subr.mxu1 %v85_v1  ;;  %v84_v4 = vld [vmem:[%s763_s1 + $0x1f0] sm:$0xff]  ;;  %v79_v5 = vld [vmem:[%s763_s1 + $0x1c8] sm:$0xff]  ;;  %v81_v6 = vld [vmem:[%s763_s1 + $0x1d8] sm:$0xff] }
   0x3   :  { %109 = vmatpush1.msra.mxu0 %v82_v2  ;;  %222 = vmatpush1.msra.mxu1 %v84_v4  ;;  %v78_v7 = vld [vmem:[%s763_s1 + $0x1c0] sm:$0xff]  ;;  %v80_v8 = vld [vmem:[%s763_s1 + $0x1d0] sm:$0xff]  ;;  %v75_v9 = vld [vmem:[%s763_s1 + $0x1a8] sm:$0xff] }
   0x4   :  { %110 = vmatprep.subr.mxu0 %v79_v5  ;;  %223 = vmatprep.subr.mxu1 %v81_v6  ;;  %v77_v10 = vld [vmem:[%s763_s1 + $0x1b8] sm:$0xff]  ;;  %v74_v11 = vld [vmem:[%s763_s1 + $0x1a0] sm:$0xff]  ;;  %v76_v12 = vld [vmem:[%s763_s1 + $0x1b0] sm:$0xff] }
   0x5   :  { %111 = vmatpush1.msra.mxu0 %v78_v7  ;;  %224 = vmatpush1.msra.mxu1 %v80_v8  ;;  %v71_v13 = vld [vmem:[%s763_s1 + $0x188] sm:$0xff]  ;;  %v73_v14 = vld [vmem:[%s763_s1 + $0x198] sm:$0xff]  ;;  %v70_v15 = vld [vmem:[%s763_s1 + $0x180] sm:$0xff] }
   0x6   :  { %112 = vmatprep.subr.mxu0 %v75_v9  ;;  %225 = vmatprep.subr.mxu1 %v77_v10  ;;  %v72_v16 = vld [vmem:[%s763_s1 + $0x190] sm:$0xff]  ;;  %v67_v17 = vld [vmem:[%s763_s1 + $0x168] sm:$0xff]  ;;  %v69_v18 = vld [vmem:[%s763_s1 + $0x178] sm:$0xff]  ;;  %v88_v10 = vlaneseq }
   0x7   :  { %113 = vmatpush1.msra.mxu0 %v74_v11  ;;  %226 = vmatpush1.msra.mxu1 %v76_v12  ;;  %v66_v19 = vld [vmem:[%s763_s1 + $0x160] sm:$0xff]  ;;  %v68_v20 = vld [vmem:[%s763_s1 + $0x170] sm:$0xff]  ;;  %v63_v21 = vld [vmem:[%s763_s1 + $0x148] sm:$0xff] }
   0x8   :  { %114 = vmatprep.subr.mxu0 %v71_v13  ;;  %227 = vmatprep.subr.mxu1 %v73_v14  ;;  %v65_v22 = vld [vmem:[%s763_s1 + $0x158] sm:$0xff]  ;;  %v62_v23 = vld [vmem:[%s763_s1 + $0x140] sm:$0xff]  ;;  %v64_v24 = vld [vmem:[%s763_s1 + $0x150] sm:$0xff]  ;;  %v89_v11 = vshrl.u32 %v88_v10, 7 }
   0x9   :  { %115 = vmatpush1.msra.mxu0 %v70_v15  ;;  %228 = vmatpush1.msra.mxu1 %v72_v16  ;;  %v59_v25 = vld [vmem:[%s763_s1 + $0x128] sm:$0xff]  ;;  %v61_v26 = vld [vmem:[%s763_s1 + $0x138] sm:$0xff]  ;;  %v58_v27 = vld [vmem:[%s763_s1 + $0x120] sm:$0xff] }
   0xa   :  { %116 = vmatprep.subr.mxu0 %v67_v17  ;;  %229 = vmatprep.subr.mxu1 %v69_v18  ;;  %v60_v28 = vld [vmem:[%s763_s1 + $0x130] sm:$0xff]  ;;  %v55_v29 = vld [vmem:[%s763_s1 + $0x108] sm:$0xff]  ;;  %v57_v30 = vld [vmem:[%s763_s1 + $0x118] sm:$0xff]  ;;  %v90_v12 = vsub.s32 0, %v89_v11  ;;  %v98_v13 = vsub.s32 2, %v89_v11  ;;  %v94_v15 = vsub.s32 1, %v89_v11 }
   0xb   :  { %117 = vmatpush1.msra.mxu0 %v66_v19  ;;  %230 = vmatpush1.msra.mxu1 %v68_v20  ;;  %v54_v31 = vld [vmem:[%s763_s1 + $0x100] sm:$0xff]  ;;  %v56_v32 = vld [vmem:[%s763_s1 + $0x110] sm:$0xff]  ;;  %v51_v33 = vld [vmem:[%s763_s1 + $0xe8] sm:$0xff]  ;;  %v102_v16 = vsub.s32 3, %v89_v11 }
   0xc   :  { %118 = vmatprep.subr.mxu0 %v63_v21  ;;  %231 = vmatprep.subr.mxu1 %v65_v22  ;;  %v53_v34 = vld [vmem:[%s763_s1 + $0xf8] sm:$0xff]  ;;  %v50_v35 = vld [vmem:[%s763_s1 + $0xe0] sm:$0xff]  ;;  %v52_v36 = vld [vmem:[%s763_s1 + $0xf0] sm:$0xff] }
   0xd   :  { %119 = vmatpush1.msra.mxu0 %v62_v23  ;;  %232 = vmatpush1.msra.mxu1 %v64_v24  ;;  %v47_v37 = vld [vmem:[%s763_s1 + $0xc8] sm:$0xff]  ;;  %v49_v38 = vld [vmem:[%s763_s1 + $0xd8] sm:$0xff]  ;;  %v46_v39 = vld [vmem:[%s763_s1 + $0xc0] sm:$0xff] }
   0xe   :  { %120 = vmatprep.subr.mxu0 %v59_v25  ;;  %233 = vmatprep.subr.mxu1 %v61_v26  ;;  %v48_v40 = vld [vmem:[%s763_s1 + $0xd0] sm:$0xff]  ;;  %v43_v41 = vld [vmem:[%s763_s1 + $0xa8] sm:$0xff]  ;;  %v45_v42 = vld [vmem:[%s763_s1 + $0xb8] sm:$0xff] }
   0xf   :  { %121 = vmatpush1.msra.mxu0 %v58_v27  ;;  %234 = vmatpush1.msra.mxu1 %v60_v28  ;;  %v42_v43 = vld [vmem:[%s763_s1 + $0xa0] sm:$0xff]  ;;  %v44_v44 = vld [vmem:[%s763_s1 + $0xb0] sm:$0xff]  ;;  %v39_v45 = vld [vmem:[%s763_s1 + $0x88] sm:$0xff] }
  0x10   :  { %122 = vmatprep.subr.mxu0 %v55_v29  ;;  %235 = vmatprep.subr.mxu1 %v57_v30  ;;  %v41_v46 = vld [vmem:[%s763_s1 + $0x98] sm:$0xff]  ;;  %v38_v47 = vld [vmem:[%s763_s1 + $0x80] sm:$0xff]  ;;  %v40_v48 = vld [vmem:[%s763_s1 + $0x90] sm:$0xff] }
  0x11   :  { %123 = vmatpush1.msra.mxu0 %v54_v31  ;;  %236 = vmatpush1.msra.mxu1 %v56_v32  ;;  %v35_v49 = vld [vmem:[%s763_s1 + $0x68] sm:$0xff]  ;;  %v37_v50 = vld [vmem:[%s763_s1 + $0x78] sm:$0xff]  ;;  %v34_v51 = vld [vmem:[%s763_s1 + $0x60] sm:$0xff] }
  0x12   :  { %124 = vmatprep.subr.mxu0 %v51_v33  ;;  %237 = vmatprep.subr.mxu1 %v53_v34  ;;  %v36_v52 = vld [vmem:[%s763_s1 + $0x70] sm:$0xff]  ;;  %v31_v53 = vld [vmem:[%s763_s1 + $0x48] sm:$0xff]  ;;  %v33_v54 = vld [vmem:[%s763_s1 + $0x58] sm:$0xff] }
  0x13   :  { %125 = vmatpush1.msra.mxu0 %v50_v35  ;;  %238 = vmatpush1.msra.mxu1 %v52_v36  ;;  %v30_v55 = vld [vmem:[%s763_s1 + $0x40] sm:$0xff]  ;;  %v32_v56 = vld [vmem:[%s763_s1 + $0x50] sm:$0xff]  ;;  %v27_v57 = vld [vmem:[%s763_s1 + $0x28] sm:$0xff] }
  0x14   :  { %126 = vmatprep.subr.mxu0 %v47_v37  ;;  %239 = vmatprep.subr.mxu1 %v49_v38  ;;  %v29_v58 = vld [vmem:[%s763_s1 + $0x38] sm:$0xff]  ;;  %v26_v59 = vld [vmem:[%s763_s1 + $0x20] sm:$0xff]  ;;  %v28_v60 = vld [vmem:[%s763_s1 + $0x30] sm:$0xff] }
  0x15   :  { %127 = vmatpush1.msra.mxu0 %v46_v39  ;;  %240 = vmatpush1.msra.mxu1 %v48_v40  ;;  %v23_v61 = vld [vmem:[%s763_s1 + $0x8] sm:$0xff]  ;;  %v25_v62 = vld [vmem:[%s763_s1 + $0x18] sm:$0xff]  ;;  %v22_v63 = vld [vmem:[%s763_s1] sm:$0xff] }
  0x16   :  { %128 = vmatprep.subr.mxu0 %v43_v41  ;;  %241 = vmatprep.subr.mxu1 %v45_v42  ;;  %v24_v0 = vld [vmem:[%s763_s1 + $0x10] sm:$0xff]  ;;  %v14_v1 = vld [vmem:[%s764_s0] sm:$0xff]  ;;  %v15_v2 = vld [vmem:[%s764_s0 + $0x8] sm:$0xff] }
  0x17   :  { %129 = vmatpush1.msra.mxu0 %v42_v43  ;;  %242 = vmatpush1.msra.mxu1 %v44_v44  ;;  %v16_v4 = vld [vmem:[%s764_s0 + $0x10] sm:$0xff]  ;;  %v17_v5 = vld [vmem:[%s764_s0 + $0x18] sm:$0xff]  ;;  %v18_v6 = vld [vmem:[%s764_s0 + $0x20] sm:$0xff] }
  0x18   :  { %130 = vmatprep.subr.mxu0 %v39_v45  ;;  %243 = vmatprep.subr.mxu1 %v41_v46  ;;  %v19_v7 = vld [vmem:[%s764_s0 + $0x28] sm:$0xff]  ;;  %v20_v8 = vld [vmem:[%s764_s0 + $0x30] sm:$0xff]  ;;  %v21_v9 = vld [vmem:[%s764_s0 + $0x38] sm:$0xff] }
  0x19   :  { %131 = vmatpush1.msra.mxu0 %v38_v47  ;;  %244 = vmatpush1.msra.mxu1 %v40_v48  ;;  %v86_v14 = vld [vmem:[%s765_s2] sm:$0xf] }
  0x1a   :  { %132 = vmatprep.subr.mxu0 %v35_v49  ;;  %245 = vmatprep.subr.mxu1 %v37_v50  ;;  %v627_v17 = vrot.slane %v86_v14, %v90_v12  ;;  %v629_v18 = vrot.slane %v86_v14, %v98_v13  ;;  %v633_v19 = vrot.slane %v86_v14, %v102_v16 }
  0x1b   :  { %133 = vmatpush1.msra.mxu0 %v34_v51  ;;  %246 = vmatpush1.msra.mxu1 %v36_v52 }
  0x1c   :  { %134 = vmatprep.subr.mxu0 %v31_v53  ;;  %247 = vmatprep.subr.mxu1 %v33_v54 }
  0x1d   :  { %135 = vmatpush1.msra.mxu0 %v30_v55  ;;  %248 = vmatpush1.msra.mxu1 %v32_v56 }
  0x1e   :  { %136 = vmatprep.subr.mxu0 %v27_v57  ;;  %249 = vmatprep.subr.mxu1 %v29_v58 }
  0x1f   :  { %137 = vmatpush1.msra.mxu0 %v26_v59  ;;  %250 = vmatpush1.msra.mxu1 %v28_v60 }
  0x20   :  { %138 = vmatprep.subr.mxu0 %v23_v61  ;;  %251 = vmatprep.subr.mxu1 %v25_v62 }
  0x21   :  { %139 = vmatpush1.msra.mxu0 %v22_v63  ;;  %252 = vmatpush1.msra.mxu1 %v24_v0 }
  0x22   :  { %173 = vmatmul.mubr.f32.vlgmr.msra.gmra.mxu0 %v14_v1  ;;  %286 = vmatmul.mubr.f32.vlgmr.msra.gmra.mxu1 %v14_v1 }
  0x23   :  { %178 = vmatprep.mubr.f32.mxu0 %v371_v3  ;;  %291 = vmatprep.mubr.f32.mxu1 %v371_v3 }
  0x26   :  { %179 = vmatmul.mubr.f32.gmra.mxu0 %v15_v2  ;;  %292 = vmatmul.mubr.f32.gmra.mxu1 %v15_v2 }
  0x27   :  { %184 = vmatprep.mubr.f32.mxu0 %v371_v3  ;;  %297 = vmatprep.mubr.f32.mxu1 %v371_v3 }
  0x2a   :  { %185 = vmatmul.mubr.f32.gmra.mxu0 %v16_v4  ;;  %298 = vmatmul.mubr.f32.gmra.mxu1 %v16_v4 }
  0x2b   :  { %190 = vmatprep.mubr.f32.mxu0 %v371_v3  ;;  %303 = vmatprep.mubr.f32.mxu1 %v371_v3 }
  0x2e   :  { %191 = vmatmul.mubr.f32.gmra.mxu0 %v17_v5  ;;  %304 = vmatmul.mubr.f32.gmra.mxu1 %v17_v5 }
  0x2f   :  { %196 = vmatprep.mubr.f32.mxu0 %v371_v3  ;;  %309 = vmatprep.mubr.f32.mxu1 %v371_v3 }
  0x32   :  { %197 = vmatmul.mubr.f32.gmra.mxu0 %v18_v6  ;;  %310 = vmatmul.mubr.f32.gmra.mxu1 %v18_v6 }
  0x33   :  { %202 = vmatprep.mubr.f32.mxu0 %v371_v3  ;;  %315 = vmatprep.mubr.f32.mxu1 %v371_v3 }
  0x36   :  { %203 = vmatmul.mubr.f32.gmra.mxu0 %v19_v7  ;;  %316 = vmatmul.mubr.f32.gmra.mxu1 %v19_v7 }
  0x37   :  { %208 = vmatprep.mubr.f32.mxu0 %v371_v3  ;;  %321 = vmatprep.mubr.f32.mxu1 %v371_v3 }
  0x3a   :  { %209 = vmatmul.mubr.f32.gmra.mxu0 %v20_v8  ;;  %322 = vmatmul.mubr.f32.gmra.mxu1 %v20_v8 }
  0x3b   :  { %214 = vmatprep.mubr.f32.mxu0 %v371_v3  ;;  %327 = vmatprep.mubr.f32.mxu1 %v371_v3  ;;  %v631_v3 = vrot.slane %v86_v14, %v94_v15 }
  0x3e   :  { %215 = vmatmul.mubr.f32.gmra.mxu0 %v21_v9  ;;  %328 = vmatmul.mubr.f32.gmra.mxu1 %v21_v9 }
  0xe2   :  { %v174_v20 = vpop.f32.mrf.mxu0  ;;  %v287_v21 = vpop.f32.mrf.mxu1 }
  0xe3   :  { %v175_v22 = vadd.f32 %v174_v20, %v627_v17  ;;  %v288_v23 = vadd.f32 %v287_v21, %v629_v18 }
  0xe4   :  { %v176_v24 = vpop.f32.mrf.mxu0  ;;  %v289_v25 = vpop.f32.mrf.mxu1 }
  0xe5   :  { %334 = vst [vmem:[%s766_s3] sm:$0xff] %v175_v22  ;;  %336 = vst [vmem:[%s766_s3 + $0x10] sm:$0xff] %v288_v23  ;;  %v177_v26 = vadd.f32 %v176_v24, %v631_v3  ;;  %v290_v27 = vadd.f32 %v289_v25, %v633_v19 }
  0xe6   :  { %v180_v28 = vpop.f32.mrf.mxu0  ;;  %v293_v29 = vpop.f32.mrf.mxu1 }
  0xe7   :  { %335 = vst [vmem:[%s766_s3 + $0x8] sm:$0xff] %v177_v26  ;;  %337 = vst [vmem:[%s766_s3 + $0x18] sm:$0xff] %v290_v27  ;;  %v181_v30 = vadd.f32 %v180_v28, %v627_v17  ;;  %v294_v31 = vadd.f32 %v293_v29, %v629_v18 }
  0xe8   :  { %v182_v32 = vpop.f32.mrf.mxu0  ;;  %v295_v33 = vpop.f32.mrf.mxu1 }
  0xe9   :  { %338 = vst [vmem:[%s766_s3 + $0x20] sm:$0xff] %v181_v30  ;;  %340 = vst [vmem:[%s766_s3 + $0x30] sm:$0xff] %v294_v31  ;;  %v183_v34 = vadd.f32 %v182_v32, %v631_v3  ;;  %v296_v35 = vadd.f32 %v295_v33, %v633_v19 }
  0xea   :  { %v186_v36 = vpop.f32.mrf.mxu0  ;;  %v299_v37 = vpop.f32.mrf.mxu1 }
  0xeb   :  { %339 = vst [vmem:[%s766_s3 + $0x28] sm:$0xff] %v183_v34  ;;  %341 = vst [vmem:[%s766_s3 + $0x38] sm:$0xff] %v296_v35  ;;  %v187_v38 = vadd.f32 %v186_v36, %v627_v17  ;;  %v300_v39 = vadd.f32 %v299_v37, %v629_v18 }
  0xec   :  { %v188_v40 = vpop.f32.mrf.mxu0  ;;  %v301_v41 = vpop.f32.mrf.mxu1 }
  0xed   :  { %342 = vst [vmem:[%s766_s3 + $0x40] sm:$0xff] %v187_v38  ;;  %344 = vst [vmem:[%s766_s3 + $0x50] sm:$0xff] %v300_v39  ;;  %v189_v42 = vadd.f32 %v188_v40, %v631_v3  ;;  %v302_v43 = vadd.f32 %v301_v41, %v633_v19 }
  0xee   :  { %v192_v44 = vpop.f32.mrf.mxu0  ;;  %v305_v45 = vpop.f32.mrf.mxu1 }
  0xef   :  { %343 = vst [vmem:[%s766_s3 + $0x48] sm:$0xff] %v189_v42  ;;  %345 = vst [vmem:[%s766_s3 + $0x58] sm:$0xff] %v302_v43  ;;  %v193_v46 = vadd.f32 %v192_v44, %v627_v17  ;;  %v306_v47 = vadd.f32 %v305_v45, %v629_v18 }
  0xf0   :  { %v194_v48 = vpop.f32.mrf.mxu0  ;;  %v307_v49 = vpop.f32.mrf.mxu1 }
  0xf1   :  { %346 = vst [vmem:[%s766_s3 + $0x60] sm:$0xff] %v193_v46  ;;  %348 = vst [vmem:[%s766_s3 + $0x70] sm:$0xff] %v306_v47  ;;  %v195_v50 = vadd.f32 %v194_v48, %v631_v3  ;;  %v308_v51 = vadd.f32 %v307_v49, %v633_v19 }
  0xf2   :  { %v198_v52 = vpop.f32.mrf.mxu0  ;;  %v311_v53 = vpop.f32.mrf.mxu1 }
  0xf3   :  { %347 = vst [vmem:[%s766_s3 + $0x68] sm:$0xff] %v195_v50  ;;  %349 = vst [vmem:[%s766_s3 + $0x78] sm:$0xff] %v308_v51  ;;  %v199_v54 = vadd.f32 %v198_v52, %v627_v17  ;;  %v312_v55 = vadd.f32 %v311_v53, %v629_v18 }
  0xf4   :  { %v200_v56 = vpop.f32.mrf.mxu0  ;;  %v313_v57 = vpop.f32.mrf.mxu1 }
  0xf5   :  { %350 = vst [vmem:[%s766_s3 + $0x80] sm:$0xff] %v199_v54  ;;  %352 = vst [vmem:[%s766_s3 + $0x90] sm:$0xff] %v312_v55  ;;  %v201_v58 = vadd.f32 %v200_v56, %v631_v3  ;;  %v314_v59 = vadd.f32 %v313_v57, %v633_v19 }
  0xf6   :  { %v204_v60 = vpop.f32.mrf.mxu0  ;;  %v317_v61 = vpop.f32.mrf.mxu1 }
  0xf7   :  { %351 = vst [vmem:[%s766_s3 + $0x88] sm:$0xff] %v201_v58  ;;  %353 = vst [vmem:[%s766_s3 + $0x98] sm:$0xff] %v314_v59  ;;  %v205_v62 = vadd.f32 %v204_v60, %v627_v17  ;;  %v318_v63 = vadd.f32 %v317_v61, %v629_v18 }
  0xf8   :  { %v206_v0 = vpop.f32.mrf.mxu0  ;;  %v319_v1 = vpop.f32.mrf.mxu1 }
  0xf9   :  { %354 = vst [vmem:[%s766_s3 + $0xa0] sm:$0xff] %v205_v62  ;;  %356 = vst [vmem:[%s766_s3 + $0xb0] sm:$0xff] %v318_v63  ;;  %v207_v2 = vadd.f32 %v206_v0, %v631_v3  ;;  %v320_v4 = vadd.f32 %v319_v1, %v633_v19 }
  0xfa   :  { %v210_v5 = vpop.f32.mrf.mxu0  ;;  %v323_v6 = vpop.f32.mrf.mxu1 }
  0xfb   :  { %355 = vst [vmem:[%s766_s3 + $0xa8] sm:$0xff] %v207_v2  ;;  %357 = vst [vmem:[%s766_s3 + $0xb8] sm:$0xff] %v320_v4  ;;  %v211_v7 = vadd.f32 %v210_v5, %v627_v17  ;;  %v324_v8 = vadd.f32 %v323_v6, %v629_v18 }
  0xfc   :  { %v212_v9 = vpop.f32.mrf.mxu0  ;;  %v325_v10 = vpop.f32.mrf.mxu1 }
  0xfd   :  { %358 = vst [vmem:[%s766_s3 + $0xc0] sm:$0xff] %v211_v7  ;;  %360 = vst [vmem:[%s766_s3 + $0xd0] sm:$0xff] %v324_v8  ;;  %v213_v11 = vadd.f32 %v212_v9, %v631_v3  ;;  %v326_v12 = vadd.f32 %v325_v10, %v633_v19 }
  0xfe   :  { %v216_v13 = vpop.f32.mrf.mxu0  ;;  %v329_v14 = vpop.f32.mrf.mxu1 }
  0xff   :  { %359 = vst [vmem:[%s766_s3 + $0xc8] sm:$0xff] %v213_v11  ;;  %361 = vst [vmem:[%s766_s3 + $0xd8] sm:$0xff] %v326_v12  ;;  %v217_v15 = vadd.f32 %v216_v13, %v627_v17  ;;  %v330_v16 = vadd.f32 %v329_v14, %v629_v18 }
 0x100   :  { %v218_v20 = vpop.f32.mrf.mxu0  ;;  %v331_v21 = vpop.f32.mrf.mxu1 }
 0x101   :  { %362 = vst [vmem:[%s766_s3 + $0xe0] sm:$0xff] %v217_v15  ;;  %364 = vst [vmem:[%s766_s3 + $0xf0] sm:$0xff] %v330_v16  ;;  %v219_v22 = vadd.f32 %v218_v20, %v631_v3  ;;  %v332_v23 = vadd.f32 %v331_v21, %v633_v19 }
 0x103   :  { %363 = vst [vmem:[%s766_s3 + $0xe8] sm:$0xff] %v219_v22  ;;  %365 = vst [vmem:[%s766_s3 + $0xf8] sm:$0xff] %v332_v23 }

// kernel: lstm_model_forward.7
= control target key start
LH: loop header
LB: loop body
LE: loop exit
PB: predicated region body
PF: predicated region fallthrough
CT: control target
= control target key end

     0   :  { %v3135_v3 = vmov 0.0   ;;  %vm25_vm0 = vcmask 7168   ;;  %s3128_s1 = inlined_call_operand.vmem [shape: f32[128,512], index: 1, kind: input, shape index: {}]   ;;  %s3129_s0 = inlined_call_operand.vmem [shape: f32[8,8,512], index: 0, kind: input, shape index: {}]   ;;  %s3130_s3 = inlined_call_operand.<no memory space> [shape: f32[1,1], index: 3, kind: input, shape index: {}]   ;;  %s3131_s4 = inlined_call_operand.vmem [shape: f32[8,1], index: 4, kind: output, shape index: {}]   ;;  %s3132_s2 = inlined_call_operand.vmem [shape: f32[1,128], index: 2, kind: input, shape index: {}]  }
   0x1   :  { %v1826_v0 = vld [vmem:[%s3128_s1 + $0x1e8] sm:$0xff]  ;;  %v1831_v1 = vld [vmem:[%s3128_s1 + $0x1e0] sm:$0xff]  ;;  %160 = vmatprep.mubr.f32.mxu0 %v3135_v3  ;;  %231 = vmatprep.mubr.f32.mxu1 %v3135_v3  ;;  %v1873_v9 = vld [vmem:[%s3128_s1 + $0x1f8] sm:$0xff] }
   0x2   :  { %3197 = vst [vmem:[#allocation5_spill] sm:$0xff] %v1826_v0  ;;  %v1836_v2 = vld [vmem:[%s3128_s1 + $0x1c8] sm:$0xff]  ;;  %96 = vmatprep.subr.mxu0 %v1826_v0  ;;  %v1844_v4 = vld [vmem:[%s3128_s1 + $0x1c0] sm:$0xff]  ;;  %3198 = vst [vmem:[#allocation6_spill] sm:$0xff] %v1873_v9  ;;  %167 = vmatprep.subr.mxu1 %v1873_v9 }
   0x3   :  { %97 = vmatpush1.msra.mxu0 %v1831_v1  ;;  %v1850_v5 = vld [vmem:[%s3128_s1 + $0x1a8] sm:$0xff]  ;;  %v1856_v6 = vld [vmem:[%s3128_s1 + $0x1a0] sm:$0xff]  ;;  %v1885_v11 = vld [vmem:[%s3128_s1 + $0x1f0] sm:$0xff] }
   0x4   :  { %98 = vmatprep.subr.mxu0 %v1836_v2  ;;  %v1862_v7 = vld [vmem:[%s3128_s1 + $0x188] sm:$0xff]  ;;  %v1868_v8 = vld [vmem:[%s3128_s1 + $0x180] sm:$0xff]  ;;  %168 = vmatpush1.msra.mxu1 %v1885_v11  ;;  %v1897_v13 = vld [vmem:[%s3128_s1 + $0x1d8] sm:$0xff] }
   0x5   :  { %99 = vmatpush1.msra.mxu0 %v1844_v4  ;;  %v1879_v10 = vld [vmem:[%s3128_s1 + $0x168] sm:$0xff]  ;;  %v1891_v12 = vld [vmem:[%s3128_s1 + $0x160] sm:$0xff]  ;;  %v1902_v14 = vld [vmem:[%s3128_s1 + $0x1d0] sm:$0xff]  ;;  %169 = vmatprep.subr.mxu1 %v1897_v13 }
   0x6   :  { %100 = vmatprep.subr.mxu0 %v1850_v5  ;;  %v1908_v15 = vld [vmem:[%s3128_s1 + $0x148] sm:$0xff]  ;;  %v1914_v16 = vld [vmem:[%s3128_s1 + $0x1b8] sm:$0xff]  ;;  %v1920_v17 = vld [vmem:[%s3128_s1 + $0x140] sm:$0xff]  ;;  %170 = vmatpush1.msra.mxu1 %v1902_v14 }
   0x7   :  { %101 = vmatpush1.msra.mxu0 %v1856_v6  ;;  %v1926_v18 = vld [vmem:[%s3128_s1 + $0x1b0] sm:$0xff]  ;;  %v1931_v19 = vld [vmem:[%s3128_s1 + $0x198] sm:$0xff]  ;;  %v1937_v20 = vld [vmem:[%s3128_s1 + $0x128] sm:$0xff]  ;;  %171 = vmatprep.subr.mxu1 %v1914_v16 }
   0x8   :  { %102 = vmatprep.subr.mxu0 %v1862_v7  ;;  %v1943_v21 = vld [vmem:[%s3128_s1 + $0x190] sm:$0xff]  ;;  %v1949_v22 = vld [vmem:[%s3128_s1 + $0x120] sm:$0xff]  ;;  %172 = vmatpush1.msra.mxu1 %v1926_v18  ;;  %v1955_v23 = vld [vmem:[%s3128_s1 + $0x178] sm:$0xff] }
   0x9   :  { %103 = vmatpush1.msra.mxu0 %v1868_v8  ;;  %v1961_v24 = vld [vmem:[%s3128_s1 + $0x108] sm:$0xff]  ;;  %173 = vmatprep.subr.mxu1 %v1931_v19  ;;  %v1967_v25 = vld [vmem:[%s3128_s1 + $0x170] sm:$0xff]  ;;  %v1973_v26 = vld [vmem:[%s3128_s1 + $0x100] sm:$0xff] }
   0xa   :  { %104 = vmatprep.subr.mxu0 %v1879_v10  ;;  %174 = vmatpush1.msra.mxu1 %v1943_v21  ;;  %v1979_v27 = vld [vmem:[%s3128_s1 + $0x158] sm:$0xff]  ;;  %v1985_v28 = vld [vmem:[%s3128_s1 + $0xe8] sm:$0xff]  ;;  %v1991_v29 = vld [vmem:[%s3128_s1 + $0x150] sm:$0xff] }
   0xb   :  { %105 = vmatpush1.msra.mxu0 %v1891_v12  ;;  %175 = vmatprep.subr.mxu1 %v1955_v23  ;;  %v1997_v30 = vld [vmem:[%s3128_s1 + $0xe0] sm:$0xff]  ;;  %v2003_v31 = vld [vmem:[%s3128_s1 + $0x138] sm:$0xff]  ;;  %v2009_v32 = vld [vmem:[%s3128_s1 + $0xc8] sm:$0xff] }
   0xc   :  { %106 = vmatprep.subr.mxu0 %v1908_v15  ;;  %176 = vmatpush1.msra.mxu1 %v1967_v25  ;;  %v2015_v33 = vld [vmem:[%s3128_s1 + $0x130] sm:$0xff]  ;;  %v2021_v34 = vld [vmem:[%s3128_s1 + $0xc0] sm:$0xff]  ;;  %v2027_v35 = vld [vmem:[%s3128_s1 + $0x118] sm:$0xff] }
   0xd   :  { %107 = vmatpush1.msra.mxu0 %v1920_v17  ;;  %177 = vmatprep.subr.mxu1 %v1979_v27  ;;  %v2033_v36 = vld [vmem:[%s3128_s1 + $0xa8] sm:$0xff]  ;;  %v2039_v37 = vld [vmem:[%s3128_s1 + $0x110] sm:$0xff]  ;;  %v2045_v38 = vld [vmem:[%s3128_s1 + $0xa0] sm:$0xff] }
   0xe   :  { %108 = vmatprep.subr.mxu0 %v1937_v20  ;;  %178 = vmatpush1.msra.mxu1 %v1991_v29  ;;  %v2051_v39 = vld [vmem:[%s3128_s1 + $0xf8] sm:$0xff]  ;;  %v2057_v40 = vld [vmem:[%s3128_s1 + $0x88] sm:$0xff]  ;;  %v2063_v41 = vld [vmem:[%s3128_s1 + $0xf0] sm:$0xff] }
   0xf   :  { %109 = vmatpush1.msra.mxu0 %v1949_v22  ;;  %179 = vmatprep.subr.mxu1 %v2003_v31  ;;  %v2069_v42 = vld [vmem:[%s3128_s1 + $0x80] sm:$0xff]  ;;  %v2075_v43 = vld [vmem:[%s3128_s1 + $0xd8] sm:$0xff]  ;;  %v2081_v44 = vld [vmem:[%s3128_s1 + $0x68] sm:$0xff] }
  0x10   :  { %110 = vmatprep.subr.mxu0 %v1961_v24  ;;  %180 = vmatpush1.msra.mxu1 %v2015_v33  ;;  %3199 = vst [vmem:[#allocation7_spill] sm:$0xff] %v2081_v44  ;;  %v2087_v45 = vld [vmem:[%s3128_s1 + $0xd0] sm:$0xff]  ;;  %v2093_v46 = vld [vmem:[%s3128_s1 + $0x60] sm:$0xff]  ;;  %v2099_v47 = vld [vmem:[%s3128_s1 + $0xb8] sm:$0xff] }
  0x11   :  { %111 = vmatpush1.msra.mxu0 %v1973_v26  ;;  %181 = vmatprep.subr.mxu1 %v2027_v35  ;;  %3200 = vst [vmem:[#allocation8_spill] sm:$0xff] %v2093_v46  ;;  %v2105_v48 = vld [vmem:[%s3128_s1 + $0x48] sm:$0xff]  ;;  %v2111_v49 = vld [vmem:[%s3128_s1 + $0xb0] sm:$0xff]  ;;  %v2117_v50 = vld [vmem:[%s3128_s1 + $0x40] sm:$0xff] }
  0x12   :  { %112 = vmatprep.subr.mxu0 %v1985_v28  ;;  %182 = vmatpush1.msra.mxu1 %v2039_v37  ;;  %3201 = vst [vmem:[#allocation9_spill] sm:$0xff] %v2105_v48  ;;  %3202 = vst [vmem:[#allocation10_spill] sm:$0xff] %v2117_v50  ;;  %v2123_v51 = vld [vmem:[%s3128_s1 + $0x98] sm:$0xff]  ;;  %v2129_v52 = vld [vmem:[%s3128_s1 + $0x28] sm:$0xff] }
  0x13   :  { %113 = vmatpush1.msra.mxu0 %v1997_v30  ;;  %183 = vmatprep.subr.mxu1 %v2051_v39  ;;  %3203 = vst [vmem:[#allocation11_spill] sm:$0xff] %v2129_v52  ;;  %v2135_v53 = vld [vmem:[%s3128_s1 + $0x90] sm:$0xff]  ;;  %v2141_v54 = vld [vmem:[%s3128_s1 + $0x20] sm:$0xff]  ;;  %v2147_v55 = vld [vmem:[%s3128_s1 + $0x78] sm:$0xff] }
  0x14   :  { %114 = vmatprep.subr.mxu0 %v2009_v32  ;;  %184 = vmatpush1.msra.mxu1 %v2063_v41  ;;  %3204 = vst [vmem:[#allocation12_spill] sm:$0xff] %v2135_v53  ;;  %3205 = vst [vmem:[#allocation13_spill] sm:$0xff] %v2141_v54  ;;  %v2153_v56 = vld [vmem:[%s3128_s1 + $0x8] sm:$0xff]  ;;  %v2159_v57 = vld [vmem:[%s3128_s1 + $0x70] sm:$0xff] }
  0x15   :  { %115 = vmatpush1.msra.mxu0 %v2021_v34  ;;  %185 = vmatprep.subr.mxu1 %v2075_v43  ;;  %3206 = vst [vmem:[#allocation14_spill] sm:$0xff] %v2147_v55  ;;  %3207 = vst [vmem:[#allocation15_spill] sm:$0xff] %v2153_v56  ;;  %v2165_v58 = vld [vmem:[%s3128_s1] sm:$0xff]  ;;  %v2171_v59 = vld [vmem:[%s3128_s1 + $0x58] sm:$0xff] }
  0x16   :  { %116 = vmatprep.subr.mxu0 %v2033_v36  ;;  %186 = vmatpush1.msra.mxu1 %v2087_v45  ;;  %3208 = vst [vmem:[#allocation16_spill] sm:$0xff] %v2159_v57  ;;  %3209 = vst [vmem:[#allocation17_spill] sm:$0xff] %v2165_v58  ;;  %v2178_v60 = vld [vmem:[%s3128_s1 + $0x50] sm:$0xff]  ;;  %v2185_v61 = vld [vmem:[%s3128_s1 + $0x38] sm:$0xff] }
  0x17   :  { %117 = vmatpush1.msra.mxu0 %v2045_v38  ;;  %187 = vmatprep.subr.mxu1 %v2099_v47  ;;  %3210 = vst [vmem:[#allocation18_spill] sm:$0xff] %v2171_v59  ;;  %3211 = vst [vmem:[#allocation19_spill] sm:$0xff] %v2178_v60  ;;  %v2192_v62 = vld [vmem:[%s3128_s1 + $0x30] sm:$0xff]  ;;  %v2199_v63 = vld [vmem:[%s3128_s1 + $0x18] sm:$0xff] }
  0x18   :  { %118 = vmatprep.subr.mxu0 %v2057_v40  ;;  %188 = vmatpush1.msra.mxu1 %v2111_v49  ;;  %3212 = vst [vmem:[#allocation20_spill] sm:$0xff] %v2185_v61  ;;  %3213 = vst [vmem:[#allocation21_spill] sm:$0xff] %v2192_v62 }
  0x19   :  { %119 = vmatpush1.msra.mxu0 %v2069_v42  ;;  %189 = vmatprep.subr.mxu1 %v2123_v51  ;;  %3214 = vst [vmem:[#allocation22_spill] sm:$0xff] %v2199_v63 }
  0x1a   :  { %120 = vmatprep.subr.mxu0 %v2081_v44  ;;  %190 = vmatpush1.msra.mxu1 %v2135_v53 }
  0x1b   :  { %121 = vmatpush1.msra.mxu0 %v2093_v46  ;;  %191 = vmatprep.subr.mxu1 %v2147_v55 }
  0x1c   :  { %122 = vmatprep.subr.mxu0 %v2105_v48  ;;  %192 = vmatpush1.msra.mxu1 %v2159_v57 }
  0x1d   :  { %123 = vmatpush1.msra.mxu0 %v2117_v50  ;;  %193 = vmatprep.subr.mxu1 %v2171_v59 }
  0x1e   :  { %124 = vmatprep.subr.mxu0 %v2129_v52  ;;  %194 = vmatpush1.msra.mxu1 %v2178_v60 }
  0x1f   :  { %125 = vmatpush1.msra.mxu0 %v2141_v54  ;;  %195 = vmatprep.subr.mxu1 %v2185_v61 }
  0x20   :  { %126 = vmatprep.subr.mxu0 %v2153_v56  ;;  %196 = vmatpush1.msra.mxu1 %v2192_v62 }
  0x21   :  { %127 = vmatpush1.msra.mxu0 %v2165_v58  ;;  %v2205_v58 = vld [vmem:[%s3128_s1 + $0x10] sm:$0xff]  ;;  %197 = vmatprep.subr.mxu1 %v2199_v63 }
  0x22   :  { %161 = vmatmul.mubr.f32.vlgmr.msra.gmra.mxu0 %v3135_v3  ;;  %3215 = vst [vmem:[#allocation23_spill] sm:$0xff] %v2205_v58  ;;  %275 = vmatprep.subr.mxu0 %v1826_v0 }
  0x23   :  { %276 = vmatpush1.msra.mxu0 %v1831_v1  ;;  %198 = vmatpush1.msra.mxu1 %v2205_v58 }
  0x24   :  { %277 = vmatprep.subr.mxu0 %v1836_v2  ;;  %232 = vmatmul.mubr.f32.vlgmr.msra.gmra.mxu1 %v3135_v3  ;;  %v3216_v3 = vld [vmem:[#allocation17_spill] sm:$0xff] }
  0x25   :  { %278 = vmatpush1.msra.mxu0 %v1844_v4  ;;  %346 = vmatprep.subr.mxu1 %v1873_v9 }
  0x26   :  { %347 = vmatpush1.msra.mxu1 %v1885_v11  ;;  %279 = vmatprep.subr.mxu0 %v1850_v5 }
  0x27   :  { %348 = vmatprep.subr.mxu1 %v1897_v13  ;;  %280 = vmatpush1.msra.mxu0 %v1856_v6 }
  0x28   :  { %349 = vmatpush1.msra.mxu1 %v1902_v14  ;;  %281 = vmatprep.subr.mxu0 %v1862_v7 }
  0x29   :  { %350 = vmatprep.subr.mxu1 %v1914_v16  ;;  %282 = vmatpush1.msra.mxu0 %v1868_v8 }
  0x2a   :  { %351 = vmatpush1.msra.mxu1 %v1926_v18  ;;  %283 = vmatprep.subr.mxu0 %v1879_v10 }
  0x2b   :  { %352 = vmatprep.subr.mxu1 %v1931_v19  ;;  %284 = vmatpush1.msra.mxu0 %v1891_v12 }
  0x2c   :  { %353 = vmatpush1.msra.mxu1 %v1943_v21  ;;  %285 = vmatprep.subr.mxu0 %v1908_v15 }
  0x2d   :  { %354 = vmatprep.subr.mxu1 %v1955_v23  ;;  %286 = vmatpush1.msra.mxu0 %v1920_v17 }
  0x2e   :  { %355 = vmatpush1.msra.mxu1 %v1967_v25  ;;  %287 = vmatprep.subr.mxu0 %v1937_v20 }
  0x2f   :  { %356 = vmatprep.subr.mxu1 %v1979_v27  ;;  %288 = vmatpush1.msra.mxu0 %v1949_v22 }
  0x30   :  { %357 = vmatpush1.msra.mxu1 %v1991_v29  ;;  %289 = vmatprep.subr.mxu0 %v1961_v24 }
  0x31   :  { %358 = vmatprep.subr.mxu1 %v2003_v31  ;;  %290 = vmatpush1.msra.mxu0 %v1973_v26 }
  0x32   :  { %359 = vmatpush1.msra.mxu1 %v2015_v33  ;;  %291 = vmatprep.subr.mxu0 %v1985_v28 }
  0x33   :  { %360 = vmatprep.subr.mxu1 %v2027_v35  ;;  %292 = vmatpush1.msra.mxu0 %v1997_v30 }
  0x34   :  { %361 = vmatpush1.msra.mxu1 %v2039_v37  ;;  %293 = vmatprep.subr.mxu0 %v2009_v32 }
  0x35   :  { %362 = vmatprep.subr.mxu1 %v2051_v39  ;;  %294 = vmatpush1.msra.mxu0 %v2021_v34 }
  0x36   :  { %363 = vmatpush1.msra.mxu1 %v2063_v41  ;;  %295 = vmatprep.subr.mxu0 %v2033_v36 }
  0x37   :  { %364 = vmatprep.subr.mxu1 %v2075_v43  ;;  %296 = vmatpush1.msra.mxu0 %v2045_v38 }
  0x38   :  { %365 = vmatpush1.msra.mxu1 %v2087_v45  ;;  %297 = vmatprep.subr.mxu0 %v2057_v40 }
  0x39   :  { %366 = vmatprep.subr.mxu1 %v2099_v47  ;;  %298 = vmatpush1.msra.mxu0 %v2069_v42 }
  0x3a   :  { %367 = vmatpush1.msra.mxu1 %v2111_v49  ;;  %299 = vmatprep.subr.mxu0 %v2081_v44 }
  0x3b   :  { %368 = vmatprep.subr.mxu1 %v2123_v51  ;;  %300 = vmatpush1.msra.mxu0 %v2093_v46 }
  0x3c   :  { %369 = vmatpush1.msra.mxu1 %v2135_v53  ;;  %301 = vmatprep.subr.mxu0 %v2105_v48  ;;  %v3217_v48 = vmov 0.0  }
  0x3d   :  { %370 = vmatprep.subr.mxu1 %v2147_v55  ;;  %302 = vmatpush1.msra.mxu0 %v2117_v50 }
  0x3e   :  { %371 = vmatpush1.msra.mxu1 %v2159_v57  ;;  %303 = vmatprep.subr.mxu0 %v2129_v52 }
  0x3f   :  { %372 = vmatprep.subr.mxu1 %v2171_v59  ;;  %304 = vmatpush1.msra.mxu0 %v2141_v54 }
  0x40   :  { %373 = vmatpush1.msra.mxu1 %v2178_v60  ;;  %305 = vmatprep.subr.mxu0 %v2153_v56  ;;  %v91_v56 = vld [vmem:[%s3129_s0] sm:$0xff]  ;;  %v93_v60 = vld [vmem:[%s3129_s0 + $0x10] sm:$0xff] }
  0x41   :  { %374 = vmatprep.subr.mxu1 %v2185_v61  ;;  %306 = vmatpush1.msra.mxu0 %v3216_v3  ;;  %v92_v3 = vld [vmem:[%s3129_s0 + $0x8] sm:$0xff] }
  0x42   :  { %375 = vmatpush1.msra.mxu1 %v2192_v62  ;;  %339 = vmatprep.mubr.f32.mxu0 %v3217_v48 }
  0x43   :  { %376 = vmatprep.subr.mxu1 %v2199_v63  ;;  %410 = vmatprep.mubr.f32.mxu1 %v3217_v48 }
  0x44   :  { %377 = vmatpush1.msra.mxu1 %v2205_v58  ;;  %454 = vmatprep.subr.mxu0 %v1826_v0 }
  0x45   :  { %525 = vmatprep.subr.mxu1 %v1873_v9  ;;  %v94_v9 = vld [vmem:[%s3129_s0 + $0x18] sm:$0xff] }
  0xe2   :  { %v162_v54 = vpop.f32.mrf.mxu0 }
  0xe3   :  { %v238_v62 = vadd.f32 %v162_v54, %v91_v56 }
  0xe4   :  { %v164_v61 = vpop.f32.mrf.mxu0  ;;  %v233_v58 = vpop.f32.mrf.mxu1 }
  0xe5   :  { %v1550_v63 = vmul.f32 -1.442695, %v238_v62  ;;  %v239_v52 = vadd.f32 %v164_v61, %v92_v3  ;;  %v240_v59 = vadd.f32 %v233_v58, %v93_v60  ;;  %v3222_v58 = vld [vmem:[#allocation16_spill] sm:$0xff]  ;;  %v3224_v60 = vld [vmem:[#allocation18_spill] sm:$0xff] }
  0xe6   :  { %v235_v0 = vpop.f32.mrf.mxu1 }
  0xe7   :  { %1605 = vpow2.f32 %v1550_v63  ;;  %v1551_v48 = vmul.f32 -1.442695, %v239_v52  ;;  %v241_v50 = vadd.f32 %v235_v0, %v94_v9 }
  0xe9   :  { %1607 = vpow2.f32 %v1551_v48  ;;  %v1552_v57 = vmul.f32 -1.442695, %v241_v50 }
  0xea   :  { %1609 = vtanh.f32 %v240_v59  ;;  %v3223_v59 = vld [vmem:[#allocation9_spill] sm:$0xff] }
  0xeb   :  { %1611 = vpow2.f32 %v1552_v57  ;;  %v3221_v57 = vld [vmem:[#allocation8_spill] sm:$0xff] }
  0xf4   :  { %v1606_v54 = vpop.eup %1605 }
  0xf5   :  { %v246_v56 = vadd.f32 1.0, %v1606_v54  ;;  %v3225_v54 = vld [vmem:[#allocation10_spill] sm:$0xff] }
  0xf6   :  { %v1608_v3 = vpop.eup %1607 }
  0xf7   :  { %1613 = vrcp.f32 %v246_v56  ;;  %v252_v52 = vadd.f32 1.0, %v1608_v3  ;;  %v1610_v48 = vpop.eup %1609  ;;  %v3226_v56 = vld [vmem:[#allocation19_spill] sm:$0xff] }
  0xf8   :  { %v1612_v61 = vpop.eup %1611  ;;  %v3227_v3 = vld [vmem:[#allocation11_spill] sm:$0xff] }
  0xf9   :  { %1615 = vrcp.f32 %v252_v52  ;;  %v259_v46 = vadd.f32 1.0, %v1612_v61  ;;  %v3228_v52 = vld [vmem:[#allocation20_spill] sm:$0xff]  ;;  %v3230_v61 = vld [vmem:[#allocation21_spill] sm:$0xff] }
  0xfb   :  { %1617 = vrcp.f32 %v259_v46  ;;  %v3219_v46 = vld [vmem:[#allocation7_spill] sm:$0xff] }
 0x104   :  { %v1614_v62 = vpop.eup %1613 }
 0x105   :  { %v263_v44 = vmul.f32 %v1614_v62, %v1610_v48  ;;  %v3229_v48 = vld [vmem:[#allocation13_spill] sm:$0xff]  ;;  %v3231_v62 = vld [vmem:[#allocation15_spill] sm:$0xff] }
 0x106   :  { %v1616_v63 = vpop.eup %1615 }
 0x107   :  { %v262_v55 = vmul.f32 0.0, %v1616_v63  ;;  %v3232_v63 = vld [vmem:[#allocation22_spill] sm:$0xff] }
 0x108   :  { %v1618_v0 = vpop.eup %1617 }
 0x109   :  { %v2291_v53 = vadd.f32 %v263_v44, %v262_v55  ;;  %v3218_v44 = vld [vmem:[#allocation12_spill] sm:$0xff]  ;;  %v3220_v55 = vld [vmem:[#allocation14_spill] sm:$0xff] }
 0x10b   :  { %1619 = vtanh.f32 %v2291_v53 }
 0x118   :  { %v1620_v9 = vpop.eup %1619 }
 0x119   :  { %v266_v50 = vmul.f32 %v1620_v9, %v1618_v0  ;;  %v3233_v0 = vld [vmem:[#allocation17_spill] sm:$0xff]  ;;  %v3234_v9 = vmov 0.0  }
 0x11b   :  { %340 = vmatmul.mubr.f32.vlgmr.msra.gmra.mxu0 %v266_v50  ;;  %411 = vmatmul.mubr.f32.vlgmr.msra.gmra.mxu1 %v266_v50  ;;  %v3235_v50 = vld [vmem:[#allocation23_spill] sm:$0xff] }
 0x11c   :  { %455 = vmatpush1.msra.mxu0 %v1831_v1  ;;  %526 = vmatpush1.msra.mxu1 %v1885_v11 }
 0x11d   :  { %456 = vmatprep.subr.mxu0 %v1836_v2  ;;  %527 = vmatprep.subr.mxu1 %v1897_v13 }
 0x11e   :  { %457 = vmatpush1.msra.mxu0 %v1844_v4  ;;  %528 = vmatpush1.msra.mxu1 %v1902_v14 }
 0x11f   :  { %458 = vmatprep.subr.mxu0 %v1850_v5  ;;  %529 = vmatprep.subr.mxu1 %v1914_v16 }
 0x120   :  { %459 = vmatpush1.msra.mxu0 %v1856_v6  ;;  %530 = vmatpush1.msra.mxu1 %v1926_v18 }
 0x121   :  { %460 = vmatprep.subr.mxu0 %v1862_v7  ;;  %531 = vmatprep.subr.mxu1 %v1931_v19 }
 0x122   :  { %461 = vmatpush1.msra.mxu0 %v1868_v8  ;;  %532 = vmatpush1.msra.mxu1 %v1943_v21 }
 0x123   :  { %462 = vmatprep.subr.mxu0 %v1879_v10  ;;  %533 = vmatprep.subr.mxu1 %v1955_v23 }
 0x124   :  { %463 = vmatpush1.msra.mxu0 %v1891_v12  ;;  %534 = vmatpush1.msra.mxu1 %v1967_v25 }
 0x125   :  { %464 = vmatprep.subr.mxu0 %v1908_v15  ;;  %535 = vmatprep.subr.mxu1 %v1979_v27 }
 0x126   :  { %465 = vmatpush1.msra.mxu0 %v1920_v17  ;;  %536 = vmatpush1.msra.mxu1 %v1991_v29 }
 0x127   :  { %466 = vmatprep.subr.mxu0 %v1937_v20  ;;  %537 = vmatprep.subr.mxu1 %v2003_v31 }
 0x128   :  { %467 = vmatpush1.msra.mxu0 %v1949_v22  ;;  %538 = vmatpush1.msra.mxu1 %v2015_v33 }
 0x129   :  { %468 = vmatprep.subr.mxu0 %v1961_v24  ;;  %539 = vmatprep.subr.mxu1 %v2027_v35 }
 0x12a   :  { %469 = vmatpush1.msra.mxu0 %v1973_v26  ;;  %540 = vmatpush1.msra.mxu1 %v2039_v37 }
 0x12b   :  { %470 = vmatprep.subr.mxu0 %v1985_v28  ;;  %541 = vmatprep.subr.mxu1 %v2051_v39 }
 0x12c   :  { %471 = vmatpush1.msra.mxu0 %v1997_v30  ;;  %542 = vmatpush1.msra.mxu1 %v2063_v41 }
 0x12d   :  { %472 = vmatprep.subr.mxu0 %v2009_v32  ;;  %543 = vmatprep.subr.mxu1 %v2075_v43 }
 0x12e   :  { %473 = vmatpush1.msra.mxu0 %v2021_v34  ;;  %544 = vmatpush1.msra.mxu1 %v2087_v45 }
 0x12f   :  { %474 = vmatprep.subr.mxu0 %v2033_v36  ;;  %545 = vmatprep.subr.mxu1 %v2099_v47 }
 0x130   :  { %475 = vmatpush1.msra.mxu0 %v2045_v38  ;;  %546 = vmatpush1.msra.mxu1 %v2111_v49 }
 0x131   :  { %476 = vmatprep.subr.mxu0 %v2057_v40  ;;  %547 = vmatprep.subr.mxu1 %v2123_v51 }
 0x132   :  { %477 = vmatpush1.msra.mxu0 %v2069_v42  ;;  %548 = vmatpush1.msra.mxu1 %v3218_v44 }
 0x133   :  { %478 = vmatprep.subr.mxu0 %v3219_v46  ;;  %549 = vmatprep.subr.mxu1 %v3220_v55 }
 0x134   :  { %479 = vmatpush1.msra.mxu0 %v3221_v57  ;;  %550 = vmatpush1.msra.mxu1 %v3222_v58 }
 0x135   :  { %480 = vmatprep.subr.mxu0 %v3223_v59  ;;  %551 = vmatprep.subr.mxu1 %v3224_v60  ;;  %v1555_v59 = vld [vmem:[%s3129_s0 + $0x30] sm:$0xff] }
 0x136   :  { %481 = vmatpush1.msra.mxu0 %v3225_v54  ;;  %552 = vmatpush1.msra.mxu1 %v3226_v56  ;;  %v3236_v56 = vld [vmem:[#allocation5_spill] sm:$0xff] }
 0x137   :  { %482 = vmatprep.subr.mxu0 %v3227_v3  ;;  %553 = vmatprep.subr.mxu1 %v3228_v52  ;;  %v3237_v3 = vld [vmem:[#allocation6_spill] sm:$0xff] }
 0x138   :  { %483 = vmatpush1.msra.mxu0 %v3229_v48  ;;  %554 = vmatpush1.msra.mxu1 %v3230_v61  ;;  %v1553_v61 = vld [vmem:[%s3129_s0 + $0x20] sm:$0xff] }
 0x139   :  { %484 = vmatprep.subr.mxu0 %v3231_v62  ;;  %555 = vmatprep.subr.mxu1 %v3232_v63  ;;  %v1554_v63 = vld [vmem:[%s3129_s0 + $0x28] sm:$0xff] }
 0x13a   :  { %485 = vmatpush1.msra.mxu0 %v3233_v0  ;;  %518 = vmatprep.mubr.f32.mxu0 %v3234_v9 }
 0x13b   :  { %556 = vmatpush1.msra.mxu1 %v3235_v50  ;;  %589 = vmatprep.mubr.f32.mxu1 %v3234_v9 }
 0x13c   :  { %633 = vmatprep.subr.mxu0 %v3236_v56  ;;  %704 = vmatprep.subr.mxu1 %v3237_v3  ;;  %v1556_v3 = vld [vmem:[%s3129_s0 + $0x38] sm:$0xff] }
 0x1db   :  { %v341_v48 = vpop.f32.mrf.mxu0  ;;  %v412_v50 = vpop.f32.mrf.mxu1 }
 0x1dc   :  { %v417_v0 = vadd.f32 %v1553_v61, %v341_v48  ;;  %v419_v48 = vadd.f32 %v1555_v59, %v412_v50  ;;  %v3241_v50 = vld [vmem:[#allocation16_spill] sm:$0xff] }
 0x1dd   :  { %v343_v62 = vpop.f32.mrf.mxu0  ;;  %v414_v56 = vpop.f32.mrf.mxu1 }
 0x1de   :  { %v1557_v52 = vmul.f32 -1.442695, %v417_v0  ;;  %v418_v54 = vadd.f32 %v1554_v63, %v343_v62  ;;  %v420_v60 = vadd.f32 %v1556_v3, %v414_v56 }
 0x1e0   :  { %1621 = vpow2.f32 %v1557_v52  ;;  %v1558_v9 = vmul.f32 -1.442695, %v418_v54  ;;  %v1559_v58 = vmul.f32 -1.442695, %v420_v60  ;;  %v3240_v60 = vld [vmem:[#allocation8_spill] sm:$0xff] }
 0x1e2   :  { %1623 = vpow2.f32 %v1558_v9 }
 0x1e3   :  { %1625 = vpow2.f32 %v1559_v58 }
 0x1ed   :  { %v1622_v57 = vpop.eup %1621 }
 0x1ee   :  { %v425_v61 = vadd.f32 1.0, %v1622_v57 }
 0x1ef   :  { %v1624_v0 = vpop.eup %1623 }
 0x1f0   :  { %1627 = vrcp.f32 %v425_v61  ;;  %v431_v52 = vadd.f32 1.0, %v1624_v0  ;;  %v1626_v54 = vpop.eup %1625  ;;  %v3243_v61 = vld [vmem:[#allocation18_spill] sm:$0xff] }
 0x1f1   :  { %1629 = vtanh.f32 %v419_v48  ;;  %v438_v55 = vadd.f32 1.0, %v1626_v54  ;;  %v3242_v48 = vld [vmem:[#allocation9_spill] sm:$0xff]  ;;  %v3244_v0 = vld [vmem:[#allocation10_spill] sm:$0xff]  ;;  %v3246_v54 = vld [vmem:[#allocation11_spill] sm:$0xff] }
 0x1f2   :  { %1631 = vrcp.f32 %v431_v52  ;;  %v3245_v52 = vld [vmem:[#allocation19_spill] sm:$0xff] }
 0x1f3   :  { %1633 = vrcp.f32 %v438_v55  ;;  %v3239_v55 = vld [vmem:[#allocation14_spill] sm:$0xff] }
 0x1fd   :  { %v1628_v62 = vpop.eup %1627 }
 0x1fe   :  { %v1630_v63 = vpop.eup %1629 }
 0x1ff   :  { %v1632_v9 = vpop.eup %1631  ;;  %v442_v56 = vmul.f32 %v1630_v63, %v1628_v62  ;;  %v3247_v62 = vld [vmem:[#allocation20_spill] sm:$0xff]  ;;  %v3248_v63 = vld [vmem:[#allocation13_spill] sm:$0xff] }
 0x200   :  { %v441_v3 = vmul.f32 %v1632_v9, %v2291_v53  ;;  %v1634_v57 = vpop.eup %1633  ;;  %v3238_v53 = vld [vmem:[#allocation7_spill] sm:$0xff]  ;;  %v3249_v9 = vld [vmem:[#allocation21_spill] sm:$0xff] }
 0x202   :  { %v2373_v46 = vadd.f32 %v442_v56, %v441_v3  ;;  %v3250_v56 = vld [vmem:[#allocation15_spill] sm:$0xff]  ;;  %v3251_v3 = vld [vmem:[#allocation22_spill] sm:$0xff] }
 0x204   :  { %1635 = vtanh.f32 %v2373_v46 }
 0x211   :  { %v1636_v59 = vpop.eup %1635 }
 0x212   :  { %v445_v58 = vmul.f32 %v1636_v59, %v1634_v57  ;;  %v3252_v57 = vld [vmem:[#allocation17_spill] sm:$0xff]  ;;  %v3253_v59 = vmov 0.0  }
 0x214   :  { %519 = vmatmul.mubr.f32.vlgmr.msra.gmra.mxu0 %v445_v58  ;;  %590 = vmatmul.mubr.f32.vlgmr.msra.gmra.mxu1 %v445_v58  ;;  %v3254_v58 = vld [vmem:[#allocation23_spill] sm:$0xff] }
 0x215   :  { %634 = vmatpush1.msra.mxu0 %v1831_v1  ;;  %705 = vmatpush1.msra.mxu1 %v1885_v11 }
 0x216   :  { %635 = vmatprep.subr.mxu0 %v1836_v2  ;;  %706 = vmatprep.subr.mxu1 %v1897_v13 }
 0x217   :  { %636 = vmatpush1.msra.mxu0 %v1844_v4  ;;  %707 = vmatpush1.msra.mxu1 %v1902_v14 }
 0x218   :  { %637 = vmatprep.subr.mxu0 %v1850_v5  ;;  %708 = vmatprep.subr.mxu1 %v1914_v16 }
 0x219   :  { %638 = vmatpush1.msra.mxu0 %v1856_v6  ;;  %709 = vmatpush1.msra.mxu1 %v1926_v18 }
 0x21a   :  { %639 = vmatprep.subr.mxu0 %v1862_v7  ;;  %710 = vmatprep.subr.mxu1 %v1931_v19 }
 0x21b   :  { %640 = vmatpush1.msra.mxu0 %v1868_v8  ;;  %711 = vmatpush1.msra.mxu1 %v1943_v21 }
 0x21c   :  { %641 = vmatprep.subr.mxu0 %v1879_v10  ;;  %712 = vmatprep.subr.mxu1 %v1955_v23 }
 0x21d   :  { %642 = vmatpush1.msra.mxu0 %v1891_v12  ;;  %713 = vmatpush1.msra.mxu1 %v1967_v25 }
 0x21e   :  { %643 = vmatprep.subr.mxu0 %v1908_v15  ;;  %714 = vmatprep.subr.mxu1 %v1979_v27 }
 0x21f   :  { %644 = vmatpush1.msra.mxu0 %v1920_v17  ;;  %715 = vmatpush1.msra.mxu1 %v1991_v29 }
 0x220   :  { %645 = vmatprep.subr.mxu0 %v1937_v20  ;;  %716 = vmatprep.subr.mxu1 %v2003_v31 }
 0x221   :  { %646 = vmatpush1.msra.mxu0 %v1949_v22  ;;  %717 = vmatpush1.msra.mxu1 %v2015_v33 }
 0x222   :  { %647 = vmatprep.subr.mxu0 %v1961_v24  ;;  %718 = vmatprep.subr.mxu1 %v2027_v35 }
 0x223   :  { %648 = vmatpush1.msra.mxu0 %v1973_v26  ;;  %719 = vmatpush1.msra.mxu1 %v2039_v37 }
 0x224   :  { %649 = vmatprep.subr.mxu0 %v1985_v28  ;;  %720 = vmatprep.subr.mxu1 %v2051_v39 }
 0x225   :  { %650 = vmatpush1.msra.mxu0 %v1997_v30  ;;  %721 = vmatpush1.msra.mxu1 %v2063_v41 }
 0x226   :  { %651 = vmatprep.subr.mxu0 %v2009_v32  ;;  %722 = vmatprep.subr.mxu1 %v2075_v43 }
 0x227   :  { %652 = vmatpush1.msra.mxu0 %v2021_v34  ;;  %723 = vmatpush1.msra.mxu1 %v2087_v45 }
 0x228   :  { %653 = vmatprep.subr.mxu0 %v2033_v36  ;;  %724 = vmatprep.subr.mxu1 %v2099_v47 }
 0x229   :  { %654 = vmatpush1.msra.mxu0 %v2045_v38  ;;  %725 = vmatpush1.msra.mxu1 %v2111_v49 }
 0x22a   :  { %655 = vmatprep.subr.mxu0 %v2057_v40  ;;  %726 = vmatprep.subr.mxu1 %v2123_v51 }
 0x22b   :  { %656 = vmatpush1.msra.mxu0 %v2069_v42  ;;  %727 = vmatpush1.msra.mxu1 %v3218_v44 }
 0x22c   :  { %657 = vmatprep.subr.mxu0 %v3238_v53  ;;  %728 = vmatprep.subr.mxu1 %v3239_v55 }
 0x22d   :  { %658 = vmatpush1.msra.mxu0 %v3240_v60  ;;  %729 = vmatpush1.msra.mxu1 %v3241_v50 }
 0x22e   :  { %659 = vmatprep.subr.mxu0 %v3242_v48  ;;  %730 = vmatprep.subr.mxu1 %v3243_v61  ;;  %v1562_v48 = vld [vmem:[%s3129_s0 + $0x50] sm:$0xff] }
 0x22f   :  { %660 = vmatpush1.msra.mxu0 %v3244_v0  ;;  %731 = vmatpush1.msra.mxu1 %v3245_v52  ;;  %v3255_v52 = vld [vmem:[#allocation5_spill] sm:$0xff] }
 0x230   :  { %661 = vmatprep.subr.mxu0 %v3246_v54  ;;  %732 = vmatprep.subr.mxu1 %v3247_v62  ;;  %v3256_v54 = vld [vmem:[#allocation6_spill] sm:$0xff] }
 0x231   :  { %662 = vmatpush1.msra.mxu0 %v3248_v63  ;;  %733 = vmatpush1.msra.mxu1 %v3249_v9  ;;  %v1560_v9 = vld [vmem:[%s3129_s0 + $0x40] sm:$0xff] }
 0x232   :  { %663 = vmatprep.subr.mxu0 %v3250_v56  ;;  %734 = vmatprep.subr.mxu1 %v3251_v3  ;;  %v1561_v3 = vld [vmem:[%s3129_s0 + $0x48] sm:$0xff] }
 0x233   :  { %664 = vmatpush1.msra.mxu0 %v3252_v57  ;;  %697 = vmatprep.mubr.f32.mxu0 %v3253_v59 }
 0x234   :  { %735 = vmatpush1.msra.mxu1 %v3254_v58  ;;  %768 = vmatprep.mubr.f32.mxu1 %v3253_v59 }
 0x235   :  { %812 = vmatprep.subr.mxu0 %v3255_v52  ;;  %883 = vmatprep.subr.mxu1 %v3256_v54  ;;  %v1563_v52 = vld [vmem:[%s3129_s0 + $0x58] sm:$0xff] }
 0x2d4   :  { %v520_v63 = vpop.f32.mrf.mxu0  ;;  %v591_v58 = vpop.f32.mrf.mxu1 }
 0x2d5   :  { %v596_v57 = vadd.f32 %v1560_v9, %v520_v63  ;;  %v598_v63 = vadd.f32 %v1562_v48, %v591_v58 }
 0x2d6   :  { %v522_v56 = vpop.f32.mrf.mxu0  ;;  %v593_v54 = vpop.f32.mrf.mxu1 }
 0x2d7   :  { %v1564_v62 = vmul.f32 -1.442695, %v596_v57  ;;  %v597_v0 = vadd.f32 %v1561_v3, %v522_v56  ;;  %v599_v61 = vadd.f32 %v1563_v52, %v593_v54 }
 0x2d9   :  { %1637 = vpow2.f32 %v1564_v62  ;;  %v1565_v59 = vmul.f32 -1.442695, %v597_v0  ;;  %v1566_v50 = vmul.f32 -1.442695, %v599_v61 }
 0x2db   :  { %1639 = vpow2.f32 %v1565_v59 }
 0x2dc   :  { %1641 = vpow2.f32 %v1566_v50 }
 0x2e6   :  { %v1638_v60 = vpop.eup %1637 }
 0x2e7   :  { %v604_v9 = vadd.f32 1.0, %v1638_v60 }
 0x2e8   :  { %v1640_v57 = vpop.eup %1639 }
 0x2e9   :  { %1643 = vrcp.f32 %v604_v9  ;;  %v610_v62 = vadd.f32 1.0, %v1640_v57  ;;  %v1642_v0 = vpop.eup %1641 }
 0x2ea   :  { %1645 = vtanh.f32 %v598_v63  ;;  %v617_v55 = vadd.f32 1.0, %v1642_v0  ;;  %v2548_v0 = vld [vmem:[%s3128_s1 + $0x1e0] sm:$0xff] }
 0x2eb   :  { %1647 = vrcp.f32 %v610_v62 }
 0x2ec   :  { %1649 = vrcp.f32 %v617_v55 }
 0x2f6   :  { %v1644_v56 = vpop.eup %1643 }
 0x2f7   :  { %v1646_v3 = vpop.eup %1645 }
 0x2f8   :  { %v1648_v59 = vpop.eup %1647  ;;  %v621_v54 = vmul.f32 %v1646_v3, %v1644_v56  ;;  %v2560_v56 = vld [vmem:[%s3128_s1 + $0x1c8] sm:$0xff]  ;;  %v2566_v3 = vld [vmem:[%s3128_s1 + $0x1d8] sm:$0xff] }
 0x2f9   :  { %v620_v52 = vmul.f32 %v1648_v59, %v2373_v46  ;;  %v1650_v60 = vpop.eup %1649  ;;  %v2572_v59 = vld [vmem:[%s3128_s1 + $0x1c0] sm:$0xff] }
 0x2fb   :  { %v2455_v53 = vadd.f32 %v621_v54, %v620_v52  ;;  %v2578_v54 = vld [vmem:[%s3128_s1 + $0x1d0] sm:$0xff]  ;;  %v2584_v52 = vld [vmem:[%s3128_s1 + $0x1a8] sm:$0xff] }
 0x2fd   :  { %1651 = vtanh.f32 %v2455_v53 }
 0x30a   :  { %v1652_v48 = vpop.eup %1651 }
 0x30b   :  { %v624_v50 = vmul.f32 %v1652_v48, %v1650_v60  ;;  %v2590_v60 = vld [vmem:[%s3128_s1 + $0x1b8] sm:$0xff]  ;;  %v2596_v48 = vld [vmem:[%s3128_s1 + $0x1a0] sm:$0xff] }
 0x30d   :  { %698 = vmatmul.mubr.f32.vlgmr.msra.gmra.mxu0 %v624_v50  ;;  %769 = vmatmul.mubr.f32.vlgmr.msra.gmra.mxu1 %v624_v50  ;;  %v2602_v50 = vld [vmem:[%s3128_s1 + $0x1b0] sm:$0xff] }
 0x30e   :  { %813 = vmatpush1.msra.mxu0 %v1831_v1  ;;  %884 = vmatpush1.msra.mxu1 %v1885_v11  ;;  %v3257_v1 = vld [vmem:[#allocation7_spill] sm:$0xff] }
 0x30f   :  { %814 = vmatprep.subr.mxu0 %v1836_v2  ;;  %885 = vmatprep.subr.mxu1 %v1897_v13  ;;  %v3258_v2 = vld [vmem:[#allocation14_spill] sm:$0xff]  ;;  %v3265_v11 = vld [vmem:[#allocation11_spill] sm:$0xff]  ;;  %v3267_v13 = vld [vmem:[#allocation13_spill] sm:$0xff] }
 0x310   :  { %815 = vmatpush1.msra.mxu0 %v1844_v4  ;;  %886 = vmatpush1.msra.mxu1 %v1902_v14  ;;  %v3259_v4 = vld [vmem:[#allocation8_spill] sm:$0xff]  ;;  %v3268_v14 = vld [vmem:[#allocation21_spill] sm:$0xff] }
 0x311   :  { %816 = vmatprep.subr.mxu0 %v1850_v5  ;;  %887 = vmatprep.subr.mxu1 %v1914_v16  ;;  %v3260_v5 = vld [vmem:[#allocation16_spill] sm:$0xff]  ;;  %v3270_v16 = vld [vmem:[#allocation22_spill] sm:$0xff] }
 0x312   :  { %817 = vmatpush1.msra.mxu0 %v1856_v6  ;;  %888 = vmatpush1.msra.mxu1 %v1926_v18  ;;  %v3261_v6 = vld [vmem:[#allocation9_spill] sm:$0xff]  ;;  %v3272_v18 = vmov 0.0  }
 0x313   :  { %818 = vmatprep.subr.mxu0 %v1862_v7  ;;  %889 = vmatprep.subr.mxu1 %v1931_v19  ;;  %v3262_v7 = vld [vmem:[#allocation18_spill] sm:$0xff]  ;;  %v3273_v19 = vld [vmem:[#allocation23_spill] sm:$0xff] }
 0x314   :  { %819 = vmatpush1.msra.mxu0 %v1868_v8  ;;  %890 = vmatpush1.msra.mxu1 %v1943_v21  ;;  %v3263_v8 = vld [vmem:[#allocation10_spill] sm:$0xff] }
 0x315   :  { %820 = vmatprep.subr.mxu0 %v1879_v10  ;;  %891 = vmatprep.subr.mxu1 %v1955_v23  ;;  %v3264_v10 = vld [vmem:[#allocation19_spill] sm:$0xff]  ;;  %v3275_v21 = vld [vmem:[#allocation6_spill] sm:$0xff] }
 0x316   :  { %821 = vmatpush1.msra.mxu0 %v1891_v12  ;;  %892 = vmatpush1.msra.mxu1 %v1967_v25  ;;  %v3266_v12 = vld [vmem:[#allocation20_spill] sm:$0xff] }
 0x317   :  { %822 = vmatprep.subr.mxu0 %v1908_v15  ;;  %893 = vmatprep.subr.mxu1 %v1979_v27  ;;  %v3269_v15 = vld [vmem:[#allocation15_spill] sm:$0xff] }
 0x318   :  { %823 = vmatpush1.msra.mxu0 %v1920_v17  ;;  %894 = vmatpush1.msra.mxu1 %v1991_v29  ;;  %v3271_v17 = vld [vmem:[#allocation17_spill] sm:$0xff] }
 0x319   :  { %824 = vmatprep.subr.mxu0 %v1937_v20  ;;  %895 = vmatprep.subr.mxu1 %v2003_v31  ;;  %v2525_v20 = vld [vmem:[%s3128_s1 + $0x1e8] sm:$0xff]  ;;  %v1570_v31 = vld [vmem:[%s3129_s0 + $0x78] sm:$0xff] }
 0x31a   :  { %825 = vmatpush1.msra.mxu0 %v1949_v22  ;;  %896 = vmatpush1.msra.mxu1 %v2015_v33  ;;  %3274 = vst [vmem:[#allocation12_spill] sm:$0xff] %v2525_v20  ;;  %v1567_v22 = vld [vmem:[%s3129_s0 + $0x60] sm:$0xff] }
 0x31b   :  { %826 = vmatprep.subr.mxu0 %v1961_v24  ;;  %897 = vmatprep.subr.mxu1 %v2027_v35  ;;  %v1568_v24 = vld [vmem:[%s3129_s0 + $0x68] sm:$0xff] }
 0x31c   :  { %827 = vmatpush1.msra.mxu0 %v1973_v26  ;;  %898 = vmatpush1.msra.mxu1 %v2039_v37 }
 0x31d   :  { %828 = vmatprep.subr.mxu0 %v1985_v28  ;;  %899 = vmatprep.subr.mxu1 %v2051_v39 }
 0x31e   :  { %829 = vmatpush1.msra.mxu0 %v1997_v30  ;;  %900 = vmatpush1.msra.mxu1 %v2063_v41 }
 0x31f   :  { %830 = vmatprep.subr.mxu0 %v2009_v32  ;;  %901 = vmatprep.subr.mxu1 %v2075_v43 }
 0x320   :  { %831 = vmatpush1.msra.mxu0 %v2021_v34  ;;  %902 = vmatpush1.msra.mxu1 %v2087_v45  ;;  %v1569_v34 = vld [vmem:[%s3129_s0 + $0x70] sm:$0xff] }
 0x321   :  { %832 = vmatprep.subr.mxu0 %v2033_v36  ;;  %903 = vmatprep.subr.mxu1 %v2099_v47 }
 0x322   :  { %833 = vmatpush1.msra.mxu0 %v2045_v38  ;;  %904 = vmatpush1.msra.mxu1 %v2111_v49 }
 0x323   :  { %834 = vmatprep.subr.mxu0 %v2057_v40  ;;  %905 = vmatprep.subr.mxu1 %v2123_v51 }
 0x324   :  { %835 = vmatpush1.msra.mxu0 %v2069_v42  ;;  %906 = vmatpush1.msra.mxu1 %v3218_v44 }
 0x325   :  { %836 = vmatprep.subr.mxu0 %v3257_v1  ;;  %907 = vmatprep.subr.mxu1 %v3258_v2  ;;  %v2608_v1 = vld [vmem:[%s3128_s1 + $0x188] sm:$0xff] }
 0x326   :  { %837 = vmatpush1.msra.mxu0 %v3259_v4  ;;  %908 = vmatpush1.msra.mxu1 %v3260_v5  ;;  %v2614_v4 = vld [vmem:[%s3128_s1 + $0x198] sm:$0xff] }
 0x327   :  { %838 = vmatprep.subr.mxu0 %v3261_v6  ;;  %909 = vmatprep.subr.mxu1 %v3262_v7  ;;  %v2620_v6 = vld [vmem:[%s3128_s1 + $0x180] sm:$0xff] }
 0x328   :  { %839 = vmatpush1.msra.mxu0 %v3263_v8  ;;  %910 = vmatpush1.msra.mxu1 %v3264_v10  ;;  %v2626_v8 = vld [vmem:[%s3128_s1 + $0x190] sm:$0xff] }
 0x329   :  { %840 = vmatprep.subr.mxu0 %v3265_v11  ;;  %911 = vmatprep.subr.mxu1 %v3266_v12  ;;  %v2632_v11 = vld [vmem:[%s3128_s1 + $0x168] sm:$0xff] }
 0x32a   :  { %841 = vmatpush1.msra.mxu0 %v3267_v13  ;;  %912 = vmatpush1.msra.mxu1 %v3268_v14  ;;  %v2638_v13 = vld [vmem:[%s3128_s1 + $0x178] sm:$0xff] }
 0x32b   :  { %842 = vmatprep.subr.mxu0 %v3269_v15  ;;  %913 = vmatprep.subr.mxu1 %v3270_v16 }
 0x32c   :  { %843 = vmatpush1.msra.mxu0 %v3271_v17  ;;  %876 = vmatprep.mubr.f32.mxu0 %v3272_v18 }
 0x32d   :  { %914 = vmatpush1.msra.mxu1 %v3273_v19  ;;  %947 = vmatprep.mubr.f32.mxu1 %v3272_v18 }
 0x32e   :  { %991 = vmatprep.subr.mxu0 %v2525_v20  ;;  %1062 = vmatprep.subr.mxu1 %v3275_v21  ;;  %v2644_v21 = vld [vmem:[%s3128_s1 + $0x160] sm:$0xff] }
 0x3cd   :  { %v699_v23 = vpop.f32.mrf.mxu0  ;;  %v770_v29 = vpop.f32.mrf.mxu1 }
 0x3ce   :  { %v775_v25 = vadd.f32 %v1567_v22, %v699_v23  ;;  %v777_v37 = vadd.f32 %v1569_v34, %v770_v29  ;;  %v2650_v22 = vld [vmem:[%s3128_s1 + $0x170] sm:$0xff]  ;;  %v2656_v23 = vld [vmem:[%s3128_s1 + $0x148] sm:$0xff]  ;;  %v2692_v29 = vld [vmem:[%s3128_s1 + $0x120] sm:$0xff] }
 0x3cf   :  { %v701_v26 = vpop.f32.mrf.mxu0  ;;  %v772_v32 = vpop.f32.mrf.mxu1  ;;  %v2722_v34 = vld [vmem:[%s3128_s1 + $0x110] sm:$0xff] }
 0x3d0   :  { %v1571_v27 = vmul.f32 -1.442695, %v775_v25  ;;  %v776_v28 = vadd.f32 %v1568_v24, %v701_v26  ;;  %v778_v33 = vadd.f32 %v1570_v31, %v772_v32  ;;  %v2662_v24 = vld [vmem:[%s3128_s1 + $0x158] sm:$0xff]  ;;  %v2668_v25 = vld [vmem:[%s3128_s1 + $0x140] sm:$0xff]  ;;  %v2674_v26 = vld [vmem:[%s3128_s1 + $0x150] sm:$0xff] }
 0x3d1   :  { %v2704_v31 = vld [vmem:[%s3128_s1 + $0x108] sm:$0xff]  ;;  %v2710_v32 = vld [vmem:[%s3128_s1 + $0x118] sm:$0xff] }
 0x3d2   :  { %1653 = vpow2.f32 %v1571_v27  ;;  %v1572_v30 = vmul.f32 -1.442695, %v776_v28  ;;  %v1573_v35 = vmul.f32 -1.442695, %v778_v33  ;;  %v2680_v27 = vld [vmem:[%s3128_s1 + $0x128] sm:$0xff]  ;;  %v2686_v28 = vld [vmem:[%s3128_s1 + $0x138] sm:$0xff] }
 0x3d3   :  { %v2716_v33 = vld [vmem:[%s3128_s1 + $0x100] sm:$0xff] }
 0x3d4   :  { %1655 = vpow2.f32 %v1572_v30  ;;  %v2698_v30 = vld [vmem:[%s3128_s1 + $0x130] sm:$0xff] }
 0x3d5   :  { %1657 = vpow2.f32 %v1573_v35  ;;  %v2728_v35 = vld [vmem:[%s3128_s1 + $0xe8] sm:$0xff] }
 0x3df   :  { %v1654_v36 = vpop.eup %1653 }
 0x3e0   :  { %v783_v38 = vadd.f32 1.0, %v1654_v36  ;;  %v2734_v36 = vld [vmem:[%s3128_s1 + $0xf8] sm:$0xff] }
 0x3e1   :  { %v1656_v39 = vpop.eup %1655 }
 0x3e2   :  { %1659 = vrcp.f32 %v783_v38  ;;  %v789_v40 = vadd.f32 1.0, %v1656_v39  ;;  %v1658_v41 = vpop.eup %1657  ;;  %v2746_v38 = vld [vmem:[%s3128_s1 + $0xf0] sm:$0xff]  ;;  %v2752_v39 = vld [vmem:[%s3128_s1 + $0xc8] sm:$0xff] }
 0x3e3   :  { %1661 = vtanh.f32 %v777_v37  ;;  %v796_v55 = vadd.f32 1.0, %v1658_v41  ;;  %v2740_v37 = vld [vmem:[%s3128_s1 + $0xe0] sm:$0xff] }
 0x3e4   :  { %1663 = vrcp.f32 %v789_v40  ;;  %v2758_v40 = vld [vmem:[%s3128_s1 + $0xd8] sm:$0xff]  ;;  %v2764_v41 = vld [vmem:[%s3128_s1 + $0xc0] sm:$0xff] }
 0x3e5   :  { %1665 = vrcp.f32 %v796_v55 }
 0x3ef   :  { %v1660_v42 = vpop.eup %1659 }
 0x3f0   :  { %v1662_v43 = vpop.eup %1661 }
 0x3f1   :  { %v1664_v46 = vpop.eup %1663  ;;  %v800_v61 = vmul.f32 %v1662_v43, %v1660_v42  ;;  %v2771_v42 = vld [vmem:[%s3128_s1 + $0xa8] sm:$0xff]  ;;  %v2778_v43 = vld [vmem:[%s3128_s1 + $0xa0] sm:$0xff] }
 0x3f2   :  { %v799_v58 = vmul.f32 %v1664_v46, %v2455_v53  ;;  %v1666_v9 = vpop.eup %1665  ;;  %v2554_v53 = vld [vmem:[%s3128_s1 + $0x1f0] sm:$0xff] }
 0x3f4   :  { %v2542_v63 = vadd.f32 %v800_v61, %v799_v58  ;;  %v1577_v58 = vld [vmem:[%s3129_s0 + $0x98] sm:$0xff] }
 0x3f6   :  { %1667 = vtanh.f32 %v2542_v63 }
 0x403   :  { %v1668_v57 = vpop.eup %1667 }
 0x404   :  { %v803_v62 = vmul.f32 %v1668_v57, %v1666_v9 }
 0x406   :  { %877 = vmatmul.mubr.f32.vlgmr.msra.gmra.mxu0 %v803_v62  ;;  %948 = vmatmul.mubr.f32.vlgmr.msra.gmra.mxu1 %v803_v62  ;;  %v1576_v62 = vld [vmem:[%s3129_s0 + $0x90] sm:$0xff] }
 0x407   :  { %992 = vmatpush1.msra.mxu0 %v2548_v0  ;;  %1063 = vmatpush1.msra.mxu1 %v2554_v53 }
 0x408   :  { %993 = vmatprep.subr.mxu0 %v2560_v56  ;;  %1064 = vmatprep.subr.mxu1 %v2566_v3 }
 0x409   :  { %994 = vmatpush1.msra.mxu0 %v2572_v59  ;;  %1065 = vmatpush1.msra.mxu1 %v2578_v54 }
 0x40a   :  { %995 = vmatprep.subr.mxu0 %v2584_v52  ;;  %1066 = vmatprep.subr.mxu1 %v2590_v60 }
 0x40b   :  { %996 = vmatpush1.msra.mxu0 %v2596_v48  ;;  %1067 = vmatpush1.msra.mxu1 %v2602_v50 }
 0x40c   :  { %997 = vmatprep.subr.mxu0 %v2608_v1  ;;  %1068 = vmatprep.subr.mxu1 %v2614_v4 }
 0x40d   :  { %998 = vmatpush1.msra.mxu0 %v2620_v6  ;;  %1069 = vmatpush1.msra.mxu1 %v2626_v8 }
 0x40e   :  { %999 = vmatprep.subr.mxu0 %v2632_v11  ;;  %1070 = vmatprep.subr.mxu1 %v2638_v13 }
 0x40f   :  { %1000 = vmatpush1.msra.mxu0 %v2644_v21  ;;  %1071 = vmatpush1.msra.mxu1 %v2650_v22 }
 0x410   :  { %1001 = vmatprep.subr.mxu0 %v2656_v23  ;;  %1072 = vmatprep.subr.mxu1 %v2662_v24 }
 0x411   :  { %1002 = vmatpush1.msra.mxu0 %v2668_v25  ;;  %1073 = vmatpush1.msra.mxu1 %v2674_v26 }
 0x412   :  { %1003 = vmatprep.subr.mxu0 %v2680_v27  ;;  %1074 = vmatprep.subr.mxu1 %v2686_v28 }
 0x413   :  { %1004 = vmatpush1.msra.mxu0 %v2692_v29  ;;  %1075 = vmatpush1.msra.mxu1 %v2698_v30 }
 0x414   :  { %1005 = vmatprep.subr.mxu0 %v2704_v31  ;;  %1076 = vmatprep.subr.mxu1 %v2710_v32 }
 0x415   :  { %1006 = vmatpush1.msra.mxu0 %v2716_v33  ;;  %1077 = vmatpush1.msra.mxu1 %v2722_v34 }
 0x416   :  { %1007 = vmatprep.subr.mxu0 %v2728_v35  ;;  %1078 = vmatprep.subr.mxu1 %v2734_v36 }
 0x417   :  { %1008 = vmatpush1.msra.mxu0 %v2740_v37  ;;  %1079 = vmatpush1.msra.mxu1 %v2746_v38 }
 0x418   :  { %1009 = vmatprep.subr.mxu0 %v2752_v39  ;;  %1080 = vmatprep.subr.mxu1 %v2758_v40 }
 0x419   :  { %1010 = vmatpush1.msra.mxu0 %v2764_v41  ;;  %1081 = vmatpush1.msra.mxu1 %v2087_v45  ;;  %v2785_v45 = vld [vmem:[%s3128_s1 + $0x88] sm:$0xff] }
 0x41a   :  { %1011 = vmatprep.subr.mxu0 %v2771_v42  ;;  %1082 = vmatprep.subr.mxu1 %v2099_v47  ;;  %v2792_v47 = vld [vmem:[%s3128_s1 + $0x80] sm:$0xff] }
 0x41b   :  { %1012 = vmatpush1.msra.mxu0 %v2778_v43  ;;  %1083 = vmatpush1.msra.mxu1 %v2111_v49  ;;  %v2799_v49 = vld [vmem:[%s3128_s1 + $0x68] sm:$0xff] }
 0x41c   :  { %1013 = vmatprep.subr.mxu0 %v2785_v45  ;;  %1084 = vmatprep.subr.mxu1 %v2123_v51  ;;  %3276 = vst [vmem:[#allocation5_spill] sm:$0xff] %v2799_v49  ;;  %v2806_v51 = vld [vmem:[%s3128_s1 + $0x60] sm:$0xff] }
 0x41d   :  { %1014 = vmatpush1.msra.mxu0 %v2792_v47  ;;  %1085 = vmatpush1.msra.mxu1 %v3218_v44  ;;  %3277 = vst [vmem:[#allocation7_spill] sm:$0xff] %v2806_v51  ;;  %v2813_v44 = vld [vmem:[%s3128_s1 + $0x48] sm:$0xff] }
 0x41e   :  { %1015 = vmatprep.subr.mxu0 %v2799_v49  ;;  %1086 = vmatprep.subr.mxu1 %v3258_v2  ;;  %3278 = vst [vmem:[#allocation14_spill] sm:$0xff] %v2813_v44  ;;  %v2820_v2 = vld [vmem:[%s3128_s1 + $0x40] sm:$0xff] }
 0x41f   :  { %1016 = vmatpush1.msra.mxu0 %v2806_v51  ;;  %1087 = vmatpush1.msra.mxu1 %v3260_v5  ;;  %3279 = vst [vmem:[#allocation8_spill] sm:$0xff] %v2820_v2  ;;  %v2827_v5 = vld [vmem:[%s3128_s1 + $0x28] sm:$0xff] }
 0x420   :  { %1017 = vmatprep.subr.mxu0 %v2813_v44  ;;  %1088 = vmatprep.subr.mxu1 %v3262_v7  ;;  %3280 = vst [vmem:[#allocation16_spill] sm:$0xff] %v2827_v5  ;;  %v2834_v7 = vld [vmem:[%s3128_s1 + $0x20] sm:$0xff] }
 0x421   :  { %1018 = vmatpush1.msra.mxu0 %v2820_v2  ;;  %1089 = vmatpush1.msra.mxu1 %v3264_v10  ;;  %3281 = vst [vmem:[#allocation9_spill] sm:$0xff] %v2834_v7  ;;  %v2848_v10 = vld [vmem:[%s3128_s1 + $0x1f8] sm:$0xff] }
 0x422   :  { %1019 = vmatprep.subr.mxu0 %v2827_v5  ;;  %1090 = vmatprep.subr.mxu1 %v3266_v12  ;;  %3282 = vst [vmem:[#allocation18_spill] sm:$0xff] %v2848_v10  ;;  %v1574_v12 = vld [vmem:[%s3129_s0 + $0x80] sm:$0xff] }
 0x423   :  { %1020 = vmatpush1.msra.mxu0 %v2834_v7  ;;  %1091 = vmatpush1.msra.mxu1 %v3268_v14 }
 0x424   :  { %1021 = vmatprep.subr.mxu0 %v3269_v15  ;;  %1092 = vmatprep.subr.mxu1 %v3270_v16  ;;  %v1575_v15 = vld [vmem:[%s3129_s0 + $0x88] sm:$0xff] }
 0x425   :  { %1022 = vmatpush1.msra.mxu0 %v3271_v17  ;;  %1055 = vmatprep.mubr.f32.mxu0 %v3272_v18 }
 0x426   :  { %1093 = vmatpush1.msra.mxu1 %v3273_v19  ;;  %1126 = vmatprep.mubr.f32.mxu1 %v3272_v18 }
 0x427   :  { %1170 = vmatprep.subr.mxu0 %v2525_v20  ;;  %1241 = vmatprep.subr.mxu1 %v2848_v10 }
 0x4c6   :  { %v878_v14 = vpop.f32.mrf.mxu0  ;;  %v949_v55 = vpop.f32.mrf.mxu1 }
 0x4c7   :  { %v954_v16 = vadd.f32 %v1574_v12, %v878_v14  ;;  %v956_v12 = vadd.f32 %v1576_v62, %v949_v55  ;;  %v2928_v62 = vld [vmem:[%s3128_s1 + $0x98] sm:$0xff] }
 0x4c8   :  { %v880_v17 = vpop.f32.mrf.mxu0  ;;  %v951_v9 = vpop.f32.mrf.mxu1 }
 0x4c9   :  { %v1578_v19 = vmul.f32 -1.442695, %v954_v16  ;;  %v955_v46 = vadd.f32 %v1575_v15, %v880_v17  ;;  %v957_v57 = vadd.f32 %v1577_v58, %v951_v9 }
 0x4cb   :  { %1669 = vpow2.f32 %v1578_v19  ;;  %v1579_v61 = vmul.f32 -1.442695, %v955_v46  ;;  %v1580_v10 = vmul.f32 -1.442695, %v957_v57  ;;  %v2921_v57 = vld [vmem:[%s3128_s1 + $0xb0] sm:$0xff] }
 0x4cd   :  { %1671 = vpow2.f32 %v1579_v61 }
 0x4ce   :  { %1673 = vpow2.f32 %v1580_v10 }
 0x4d8   :  { %v1670_v20 = vpop.eup %1669 }
 0x4d9   :  { %v962_v14 = vadd.f32 1.0, %v1670_v20 }
 0x4da   :  { %v1672_v16 = vpop.eup %1671 }
 0x4db   :  { %1675 = vrcp.f32 %v962_v14  ;;  %v968_v15 = vadd.f32 1.0, %v1672_v16  ;;  %v1674_v17 = vpop.eup %1673  ;;  %v2942_v14 = vld [vmem:[%s3128_s1 + $0x78] sm:$0xff]  ;;  %v2949_v16 = vld [vmem:[%s3128_s1 + $0x70] sm:$0xff] }
 0x4dc   :  { %1677 = vtanh.f32 %v956_v12  ;;  %v975_v18 = vadd.f32 1.0, %v1674_v17  ;;  %v2935_v12 = vld [vmem:[%s3128_s1 + $0x90] sm:$0xff]  ;;  %3283 = vst [vmem:[#allocation10_spill] sm:$0xff] %v2942_v14  ;;  %3284 = vst [vmem:[#allocation19_spill] sm:$0xff] %v2949_v16 }
 0x4dd   :  { %1679 = vrcp.f32 %v968_v15  ;;  %v2956_v15 = vld [vmem:[%s3128_s1 + $0x58] sm:$0xff]  ;;  %v2963_v17 = vld [vmem:[%s3128_s1 + $0x50] sm:$0xff] }
 0x4de   :  { %1681 = vrcp.f32 %v975_v18  ;;  %v2907_v18 = vld [vmem:[%s3128_s1 + $0xd0] sm:$0xff]  ;;  %3285 = vst [vmem:[#allocation11_spill] sm:$0xff] %v2956_v15  ;;  %3286 = vst [vmem:[#allocation20_spill] sm:$0xff] %v2963_v17 }
 0x4e8   :  { %v1676_v19 = vpop.eup %1675 }
 0x4e9   :  { %v1678_v46 = vpop.eup %1677 }
 0x4ea   :  { %v1680_v61 = vpop.eup %1679  ;;  %v979_v58 = vmul.f32 %v1678_v46, %v1676_v19  ;;  %v2970_v19 = vld [vmem:[%s3128_s1 + $0x38] sm:$0xff]  ;;  %v3288_v46 = vld [vmem:[#allocation9_spill] sm:$0xff] }
 0x4eb   :  { %v978_v9 = vmul.f32 %v1680_v61, %v2542_v63  ;;  %v1682_v20 = vpop.eup %1681  ;;  %v2914_v63 = vld [vmem:[%s3128_s1 + $0xb8] sm:$0xff]  ;;  %3287 = vst [vmem:[#allocation13_spill] sm:$0xff] %v2970_v19  ;;  %v2977_v61 = vld [vmem:[%s3128_s1 + $0x30] sm:$0xff] }
 0x4ec   :  { %3289 = vst [vmem:[#allocation21_spill] sm:$0xff] %v2977_v61 }
 0x4ed   :  { %v2864_v7 = vadd.f32 %v979_v58, %v978_v9  ;;  %v2983_v58 = vld [vmem:[%s3128_s1 + $0x8] sm:$0xff]  ;;  %v2989_v9 = vld [vmem:[%s3128_s1 + $0x18] sm:$0xff] }
 0x4ee   :  { %3290 = vst [vmem:[#allocation15_spill] sm:$0xff] %v2983_v58  ;;  %3291 = vst [vmem:[#allocation22_spill] sm:$0xff] %v2989_v9 }
 0x4ef   :  { %1683 = vtanh.f32 %v2864_v7 }
 0x4fc   :  { %v1684_v55 = vpop.eup %1683 }
 0x4fd   :  { %v982_v10 = vmul.f32 %v1684_v55, %v1682_v20  ;;  %v2995_v20 = vld [vmem:[%s3128_s1] sm:$0xff]  ;;  %v3293_v55 = vmov 0.0  }
 0x4fe   :  { %3292 = vst [vmem:[#allocation17_spill] sm:$0xff] %v2995_v20 }
 0x4ff   :  { %1056 = vmatmul.mubr.f32.vlgmr.msra.gmra.mxu0 %v982_v10  ;;  %1127 = vmatmul.mubr.f32.vlgmr.msra.gmra.mxu1 %v982_v10  ;;  %v3002_v10 = vld [vmem:[%s3128_s1 + $0x10] sm:$0xff] }
 0x500   :  { %1171 = vmatpush1.msra.mxu0 %v2548_v0  ;;  %1242 = vmatpush1.msra.mxu1 %v2554_v53  ;;  %3294 = vst [vmem:[#allocation23_spill] sm:$0xff] %v3002_v10 }
 0x501   :  { %1172 = vmatprep.subr.mxu0 %v2560_v56  ;;  %1243 = vmatprep.subr.mxu1 %v2566_v3 }
 0x502   :  { %1173 = vmatpush1.msra.mxu0 %v2572_v59  ;;  %1244 = vmatpush1.msra.mxu1 %v2578_v54 }
 0x503   :  { %1174 = vmatprep.subr.mxu0 %v2584_v52  ;;  %1245 = vmatprep.subr.mxu1 %v2590_v60 }
 0x504   :  { %1175 = vmatpush1.msra.mxu0 %v2596_v48  ;;  %1246 = vmatpush1.msra.mxu1 %v2602_v50 }
 0x505   :  { %1176 = vmatprep.subr.mxu0 %v2608_v1  ;;  %1247 = vmatprep.subr.mxu1 %v2614_v4 }
 0x506   :  { %1177 = vmatpush1.msra.mxu0 %v2620_v6  ;;  %1248 = vmatpush1.msra.mxu1 %v2626_v8 }
 0x507   :  { %1178 = vmatprep.subr.mxu0 %v2632_v11  ;;  %1249 = vmatprep.subr.mxu1 %v2638_v13 }
 0x508   :  { %1179 = vmatpush1.msra.mxu0 %v2644_v21  ;;  %1250 = vmatpush1.msra.mxu1 %v2650_v22 }
 0x509   :  { %1180 = vmatprep.subr.mxu0 %v2656_v23  ;;  %1251 = vmatprep.subr.mxu1 %v2662_v24 }
 0x50a   :  { %1181 = vmatpush1.msra.mxu0 %v2668_v25  ;;  %1252 = vmatpush1.msra.mxu1 %v2674_v26 }
 0x50b   :  { %1182 = vmatprep.subr.mxu0 %v2680_v27  ;;  %1253 = vmatprep.subr.mxu1 %v2686_v28 }
 0x50c   :  { %1183 = vmatpush1.msra.mxu0 %v2692_v29  ;;  %1254 = vmatpush1.msra.mxu1 %v2698_v30 }
 0x50d   :  { %1184 = vmatprep.subr.mxu0 %v2704_v31  ;;  %1255 = vmatprep.subr.mxu1 %v2710_v32 }
 0x50e   :  { %1185 = vmatpush1.msra.mxu0 %v2716_v33  ;;  %1256 = vmatpush1.msra.mxu1 %v2722_v34 }
 0x50f   :  { %1186 = vmatprep.subr.mxu0 %v2728_v35  ;;  %1257 = vmatprep.subr.mxu1 %v2734_v36 }
 0x510   :  { %1187 = vmatpush1.msra.mxu0 %v2740_v37  ;;  %1258 = vmatpush1.msra.mxu1 %v2746_v38 }
 0x511   :  { %1188 = vmatprep.subr.mxu0 %v2752_v39  ;;  %1259 = vmatprep.subr.mxu1 %v2758_v40 }
 0x512   :  { %1189 = vmatpush1.msra.mxu0 %v2764_v41  ;;  %1260 = vmatpush1.msra.mxu1 %v2907_v18 }
 0x513   :  { %1190 = vmatprep.subr.mxu0 %v2771_v42  ;;  %1261 = vmatprep.subr.mxu1 %v2914_v63 }
 0x514   :  { %1191 = vmatpush1.msra.mxu0 %v2778_v43  ;;  %1262 = vmatpush1.msra.mxu1 %v2921_v57 }
 0x515   :  { %1192 = vmatprep.subr.mxu0 %v2785_v45  ;;  %1263 = vmatprep.subr.mxu1 %v2928_v62 }
 0x516   :  { %1193 = vmatpush1.msra.mxu0 %v2792_v47  ;;  %1264 = vmatpush1.msra.mxu1 %v2935_v12 }
 0x517   :  { %1194 = vmatprep.subr.mxu0 %v2799_v49  ;;  %1265 = vmatprep.subr.mxu1 %v2942_v14 }
 0x518   :  { %1195 = vmatpush1.msra.mxu0 %v2806_v51  ;;  %1266 = vmatpush1.msra.mxu1 %v2949_v16 }
 0x519   :  { %1196 = vmatprep.subr.mxu0 %v2813_v44  ;;  %1267 = vmatprep.subr.mxu1 %v2956_v15  ;;  %v1583_v44 = vld [vmem:[%s3129_s0 + $0xb0] sm:$0xff] }
 0x51a   :  { %1197 = vmatpush1.msra.mxu0 %v2820_v2  ;;  %1268 = vmatpush1.msra.mxu1 %v2963_v17 }
 0x51b   :  { %1198 = vmatprep.subr.mxu0 %v2827_v5  ;;  %1269 = vmatprep.subr.mxu1 %v2970_v19 }
 0x51c   :  { %1199 = vmatpush1.msra.mxu0 %v3288_v46  ;;  %1270 = vmatpush1.msra.mxu1 %v2977_v61  ;;  %v1581_v61 = vld [vmem:[%s3129_s0 + $0xa0] sm:$0xff]  ;;  %v1582_v46 = vld [vmem:[%s3129_s0 + $0xa8] sm:$0xff] }
 0x51d   :  { %1200 = vmatprep.subr.mxu0 %v2983_v58  ;;  %1271 = vmatprep.subr.mxu1 %v2989_v9  ;;  %v3295_v58 = vld [vmem:[#allocation12_spill] sm:$0xff]  ;;  %v3296_v9 = vld [vmem:[#allocation18_spill] sm:$0xff] }
 0x51e   :  { %1201 = vmatpush1.msra.mxu0 %v2995_v20  ;;  %1234 = vmatprep.mubr.f32.mxu0 %v3293_v55 }
 0x51f   :  { %1272 = vmatpush1.msra.mxu1 %v3002_v10  ;;  %1305 = vmatprep.mubr.f32.mxu1 %v3293_v55 }
 0x520   :  { %1349 = vmatprep.subr.mxu0 %v3295_v58  ;;  %1420 = vmatprep.subr.mxu1 %v3296_v9  ;;  %v1584_v58 = vld [vmem:[%s3129_s0 + $0xb8] sm:$0xff] }
 0x5bf   :  { %v1057_v20 = vpop.f32.mrf.mxu0  ;;  %v1128_v10 = vpop.f32.mrf.mxu1 }
 0x5c0   :  { %v1133_v19 = vadd.f32 %v1581_v61, %v1057_v20  ;;  %v1135_v61 = vadd.f32 %v1583_v44, %v1128_v10  ;;  %v1596_v10 = vld [vmem:[%s3129_s0 + $0xe8] sm:$0xff] }
 0x5c1   :  { %v1059_v5 = vpop.f32.mrf.mxu0  ;;  %v1130_v9 = vpop.f32.mrf.mxu1 }
 0x5c2   :  { %v1585_v17 = vmul.f32 -1.442695, %v1133_v19  ;;  %v1134_v2 = vadd.f32 %v1582_v46, %v1059_v5  ;;  %v1136_v15 = vadd.f32 %v1584_v58, %v1130_v9 }
 0x5c4   :  { %1685 = vpow2.f32 %v1585_v17  ;;  %v1586_v55 = vmul.f32 -1.442695, %v1134_v2  ;;  %v1587_v16 = vmul.f32 -1.442695, %v1136_v15 }
 0x5c6   :  { %1687 = vpow2.f32 %v1586_v55 }
 0x5c7   :  { %1689 = vpow2.f32 %v1587_v16 }
 0x5d1   :  { %v1686_v51 = vpop.eup %1685 }
 0x5d2   :  { %v1141_v20 = vadd.f32 1.0, %v1686_v51 }
 0x5d3   :  { %v1688_v19 = vpop.eup %1687 }
 0x5d4   :  { %1691 = vrcp.f32 %v1141_v20  ;;  %v1147_v5 = vadd.f32 1.0, %v1688_v19  ;;  %v1690_v2 = vpop.eup %1689 }
 0x5d5   :  { %1693 = vtanh.f32 %v1135_v61  ;;  %v1154_v14 = vadd.f32 1.0, %v1690_v2 }
 0x5d6   :  { %1695 = vrcp.f32 %v1147_v5 }
 0x5d7   :  { %1697 = vrcp.f32 %v1154_v14  ;;  %v9_v14 = vstv %s3130_s3 }
 0x5d8   :  { %10 = vst [vmem:[#allocation4] sm:$0x1] %v9_v14 }
 0x5e1   :  { %v1692_v17 = vpop.eup %1691 }
 0x5e2   :  { %v1694_v46 = vpop.eup %1693 }
 0x5e3   :  { %v1696_v55 = vpop.eup %1695  ;;  %v1158_v58 = vmul.f32 %v1694_v46, %v1692_v17  ;;  %v1598_v46 = vld [vmem:[%s3129_s0 + $0xf8] sm:$0xff] }
 0x5e4   :  { %v1157_v9 = vmul.f32 %v1696_v55, %v2864_v7  ;;  %v1698_v51 = vpop.eup %1697 }
 0x5e6   :  { %v3021_v49 = vadd.f32 %v1158_v58, %v1157_v9  ;;  %v1597_v9 = vld [vmem:[%s3129_s0 + $0xf0] sm:$0xff] }
 0x5e8   :  { %1699 = vtanh.f32 %v3021_v49 }
 0x5f5   :  { %v1700_v44 = vpop.eup %1699 }
 0x5f6   :  { %v1161_v16 = vmul.f32 %v1700_v44, %v1698_v51 }
 0x5f8   :  { %1235 = vmatmul.mubr.f32.vlgmr.msra.gmra.mxu0 %v1161_v16  ;;  %1306 = vmatmul.mubr.f32.vlgmr.msra.gmra.mxu1 %v1161_v16 }
 0x5f9   :  { %1350 = vmatpush1.msra.mxu0 %v2548_v0  ;;  %1421 = vmatpush1.msra.mxu1 %v2554_v53  ;;  %v3297_v0 = vld [vmem:[#allocation5_spill] sm:$0xff]  ;;  %v3298_v53 = vld [vmem:[#allocation10_spill] sm:$0xff] }
 0x5fa   :  { %1351 = vmatprep.subr.mxu0 %v2560_v56  ;;  %1422 = vmatprep.subr.mxu1 %v2566_v3  ;;  %v3299_v56 = vld [vmem:[#allocation7_spill] sm:$0xff] }
 0x5fb   :  { %1352 = vmatpush1.msra.mxu0 %v2572_v59  ;;  %1423 = vmatpush1.msra.mxu1 %v2578_v54  ;;  %v3300_v3 = vld [vmem:[#allocation19_spill] sm:$0xff]  ;;  %v3301_v59 = vld [vmem:[#allocation14_spill] sm:$0xff] }
 0x5fc   :  { %1353 = vmatprep.subr.mxu0 %v2584_v52  ;;  %1424 = vmatprep.subr.mxu1 %v2590_v60  ;;  %v3302_v54 = vld [vmem:[#allocation11_spill] sm:$0xff]  ;;  %v3303_v52 = vld [vmem:[#allocation8_spill] sm:$0xff] }
 0x5fd   :  { %1354 = vmatpush1.msra.mxu0 %v2596_v48  ;;  %1425 = vmatpush1.msra.mxu1 %v2602_v50  ;;  %v3304_v60 = vld [vmem:[#allocation20_spill] sm:$0xff]  ;;  %v3306_v50 = vld [vmem:[#allocation13_spill] sm:$0xff] }
 0x5fe   :  { %1355 = vmatprep.subr.mxu0 %v2608_v1  ;;  %1426 = vmatprep.subr.mxu1 %v2614_v4  ;;  %v3305_v48 = vld [vmem:[#allocation16_spill] sm:$0xff]  ;;  %v3307_v1 = vld [vmem:[#allocation9_spill] sm:$0xff] }
 0x5ff   :  { %1356 = vmatpush1.msra.mxu0 %v2620_v6  ;;  %1427 = vmatpush1.msra.mxu1 %v2626_v8  ;;  %v3308_v4 = vld [vmem:[#allocation21_spill] sm:$0xff]  ;;  %v3309_v6 = vld [vmem:[#allocation15_spill] sm:$0xff]  ;;  %v3310_v8 = vld [vmem:[#allocation22_spill] sm:$0xff] }
 0x600   :  { %1357 = vmatprep.subr.mxu0 %v2632_v11  ;;  %1428 = vmatprep.subr.mxu1 %v2638_v13  ;;  %v3311_v11 = vld [vmem:[#allocation17_spill] sm:$0xff]  ;;  %v3312_v13 = vmov 0.0  }
 0x601   :  { %1358 = vmatpush1.msra.mxu0 %v2644_v21  ;;  %1429 = vmatpush1.msra.mxu1 %v2650_v22  ;;  %v3313_v21 = vld [vmem:[#allocation23_spill] sm:$0xff]  ;;  %v1588_v22 = vld [vmem:[%s3129_s0 + $0xc0] sm:$0xff]  ;;  %26 = vst.msk [vmem:[%s3131_s4] sm:$0xff] %vm25_vm0, %v3312_v13 }
 0x602   :  { %1359 = vmatprep.subr.mxu0 %v2656_v23  ;;  %1430 = vmatprep.subr.mxu1 %v2662_v24  ;;  %v1589_v24 = vld [vmem:[%s3129_s0 + $0xc8] sm:$0xff] }
 0x603   :  { %1360 = vmatpush1.msra.mxu0 %v2668_v25  ;;  %1431 = vmatpush1.msra.mxu1 %v2674_v26 }
 0x604   :  { %1361 = vmatprep.subr.mxu0 %v2680_v27  ;;  %1432 = vmatprep.subr.mxu1 %v2686_v28 }
 0x605   :  { %1362 = vmatpush1.msra.mxu0 %v2692_v29  ;;  %1433 = vmatpush1.msra.mxu1 %v2698_v30 }
 0x606   :  { %1363 = vmatprep.subr.mxu0 %v2704_v31  ;;  %1434 = vmatprep.subr.mxu1 %v2710_v32  ;;  %v1591_v31 = vld [vmem:[%s3129_s0 + $0xd8] sm:$0xff] }
 0x607   :  { %1364 = vmatpush1.msra.mxu0 %v2716_v33  ;;  %1435 = vmatpush1.msra.mxu1 %v2722_v34  ;;  %v1590_v34 = vld [vmem:[%s3129_s0 + $0xd0] sm:$0xff] }
 0x608   :  { %1365 = vmatprep.subr.mxu0 %v2728_v35  ;;  %1436 = vmatprep.subr.mxu1 %v2734_v36 }
 0x609   :  { %1366 = vmatpush1.msra.mxu0 %v2740_v37  ;;  %1437 = vmatpush1.msra.mxu1 %v2746_v38 }
 0x60a   :  { %1367 = vmatprep.subr.mxu0 %v2752_v39  ;;  %1438 = vmatprep.subr.mxu1 %v2758_v40 }
 0x60b   :  { %1368 = vmatpush1.msra.mxu0 %v2764_v41  ;;  %1439 = vmatpush1.msra.mxu1 %v2907_v18 }
 0x60c   :  { %1369 = vmatprep.subr.mxu0 %v2771_v42  ;;  %1440 = vmatprep.subr.mxu1 %v2914_v63 }
 0x60d   :  { %1370 = vmatpush1.msra.mxu0 %v2778_v43  ;;  %1441 = vmatpush1.msra.mxu1 %v2921_v57 }
 0x60e   :  { %1371 = vmatprep.subr.mxu0 %v2785_v45  ;;  %1442 = vmatprep.subr.mxu1 %v2928_v62 }
 0x60f   :  { %1372 = vmatpush1.msra.mxu0 %v2792_v47  ;;  %1443 = vmatpush1.msra.mxu1 %v2935_v12 }
 0x610   :  { %1373 = vmatprep.subr.mxu0 %v3297_v0  ;;  %1444 = vmatprep.subr.mxu1 %v3298_v53 }
 0x611   :  { %1374 = vmatpush1.msra.mxu0 %v3299_v56  ;;  %1445 = vmatpush1.msra.mxu1 %v3300_v3 }
 0x612   :  { %1375 = vmatprep.subr.mxu0 %v3301_v59  ;;  %1446 = vmatprep.subr.mxu1 %v3302_v54 }
 0x613   :  { %1376 = vmatpush1.msra.mxu0 %v3303_v52  ;;  %1447 = vmatpush1.msra.mxu1 %v3304_v60 }
 0x614   :  { %1377 = vmatprep.subr.mxu0 %v3305_v48  ;;  %1448 = vmatprep.subr.mxu1 %v3306_v50 }
 0x615   :  { %1378 = vmatpush1.msra.mxu0 %v3307_v1  ;;  %1449 = vmatpush1.msra.mxu1 %v3308_v4 }
 0x616   :  { %1379 = vmatprep.subr.mxu0 %v3309_v6  ;;  %1450 = vmatprep.subr.mxu1 %v3310_v8  ;;  %v1602_v8 = vld [vmem:[%s3132_s2] ss:$0 sm:$0xff] }
 0x617   :  { %1380 = vmatpush1.msra.mxu0 %v3311_v11  ;;  %1413 = vmatprep.mubr.f32.mxu0 %v3312_v13 }
 0x618   :  { %1451 = vmatpush1.msra.mxu1 %v3313_v21  ;;  %1484 = vmatprep.mubr.f32.mxu1 %v3312_v13  ;;  %v1603_v21 = vld [vmem:[#allocation4] ss:$0 sm:$0xff] }
 0x6b8   :  { %v1236_v23 = vpop.f32.mrf.mxu0  ;;  %v1307_v29 = vpop.f32.mrf.mxu1 }
 0x6b9   :  { %v1312_v25 = vadd.f32 %v1588_v22, %v1236_v23  ;;  %v1314_v37 = vadd.f32 %v1590_v34, %v1307_v29 }
 0x6ba   :  { %v1238_v26 = vpop.f32.mrf.mxu0  ;;  %v1309_v32 = vpop.f32.mrf.mxu1 }
 0x6bb   :  { %v1592_v27 = vmul.f32 -1.442695, %v1312_v25  ;;  %v1313_v28 = vadd.f32 %v1589_v24, %v1238_v26  ;;  %v1315_v33 = vadd.f32 %v1591_v31, %v1309_v32 }
 0x6bd   :  { %1701 = vpow2.f32 %v1592_v27  ;;  %v1593_v30 = vmul.f32 -1.442695, %v1313_v28  ;;  %v1594_v35 = vmul.f32 -1.442695, %v1315_v33 }
 0x6bf   :  { %1703 = vpow2.f32 %v1593_v30 }
 0x6c0   :  { %1705 = vpow2.f32 %v1594_v35 }
 0x6ca   :  { %v1702_v36 = vpop.eup %1701 }
 0x6cb   :  { %v1320_v38 = vadd.f32 1.0, %v1702_v36 }
 0x6cc   :  { %v1704_v39 = vpop.eup %1703 }
 0x6cd   :  { %1707 = vrcp.f32 %v1320_v38  ;;  %v1326_v40 = vadd.f32 1.0, %v1704_v39  ;;  %v1706_v41 = vpop.eup %1705 }
 0x6ce   :  { %1709 = vtanh.f32 %v1314_v37  ;;  %v1333_v47 = vadd.f32 1.0, %v1706_v41 }
 0x6cf   :  { %1711 = vrcp.f32 %v1326_v40 }
 0x6d0   :  { %1713 = vrcp.f32 %v1333_v47 }
 0x6da   :  { %v1708_v42 = vpop.eup %1707 }
 0x6db   :  { %v1710_v43 = vpop.eup %1709 }
 0x6dc   :  { %v1712_v45 = vpop.eup %1711  ;;  %v1337_v7 = vmul.f32 %v1710_v43, %v1708_v42 }
 0x6dd   :  { %v1336_v18 = vmul.f32 %v1712_v45, %v3021_v49  ;;  %v1714_v57 = vpop.eup %1713  ;;  %v1595_v49 = vld [vmem:[%s3129_s0 + $0xe0] sm:$0xff] }
 0x6df   :  { %v1338_v63 = vadd.f32 %v1337_v7, %v1336_v18 }
 0x6e1   :  { %1715 = vtanh.f32 %v1338_v63 }
 0x6ee   :  { %v1716_v62 = vpop.eup %1715 }
 0x6ef   :  { %v1340_v12 = vmul.f32 %v1716_v62, %v1714_v57 }
 0x6f1   :  { %1414 = vmatmul.mubr.f32.vlgmr.msra.gmra.mxu0 %v1340_v12  ;;  %1485 = vmatmul.mubr.f32.vlgmr.msra.gmra.mxu1 %v1340_v12 }
 0x7b1   :  { %v1415_v15 = vpop.f32.mrf.mxu0  ;;  %v1486_v2 = vpop.f32.mrf.mxu1 }
 0x7b2   :  { %v1491_v61 = vadd.f32 %v1595_v49, %v1415_v15  ;;  %v1493_v16 = vadd.f32 %v1597_v9, %v1486_v2 }
 0x7b3   :  { %v1417_v20 = vpop.f32.mrf.mxu0  ;;  %v1488_v55 = vpop.f32.mrf.mxu1 }
 0x7b4   :  { %v1599_v19 = vmul.f32 -1.442695, %v1491_v61  ;;  %v1492_v5 = vadd.f32 %v1596_v10, %v1417_v20  ;;  %v1494_v58 = vadd.f32 %v1598_v46, %v1488_v55 }
 0x7b6   :  { %1717 = vpow2.f32 %v1599_v19  ;;  %v1600_v17 = vmul.f32 -1.442695, %v1492_v5  ;;  %v1601_v51 = vmul.f32 -1.442695, %v1494_v58 }
 0x7b8   :  { %1719 = vpow2.f32 %v1600_v17 }
 0x7b9   :  { %1721 = vpow2.f32 %v1601_v51 }
 0x7c3   :  { %v1718_v44 = vpop.eup %1717 }
 0x7c4   :  { %v1499_v0 = vadd.f32 1.0, %v1718_v44 }
 0x7c5   :  { %v1720_v53 = vpop.eup %1719 }
 0x7c6   :  { %1723 = vrcp.f32 %v1499_v0  ;;  %v1505_v56 = vadd.f32 1.0, %v1720_v53  ;;  %v1722_v3 = vpop.eup %1721 }
 0x7c7   :  { %1725 = vtanh.f32 %v1493_v16  ;;  %v1512_v60 = vadd.f32 1.0, %v1722_v3 }
 0x7c8   :  { %1727 = vrcp.f32 %v1505_v56 }
 0x7c9   :  { %1729 = vrcp.f32 %v1512_v60 }
 0x7d3   :  { %v1724_v59 = vpop.eup %1723 }
 0x7d4   :  { %v1726_v54 = vpop.eup %1725 }
 0x7d5   :  { %v1728_v52 = vpop.eup %1727  ;;  %v1516_v48 = vmul.f32 %v1726_v54, %v1724_v59 }
 0x7d6   :  { %v1515_v50 = vmul.f32 %v1728_v52, %v1338_v63  ;;  %v1730_v4 = vpop.eup %1729 }
 0x7d8   :  { %v1517_v1 = vadd.f32 %v1516_v48, %v1515_v50 }
 0x7da   :  { %1731 = vtanh.f32 %v1517_v1 }
 0x7e7   :  { %v1732_v6 = vpop.eup %1731 }
 0x7e8   :  { %v1519_v11 = vmul.f32 %v1732_v6, %v1730_v4 }
 0x7ea   :  { %v1533_v13 = vmul.f32 %v1602_v8, %v1519_v11 }
 0x7ec   :  { %1534 = vadd.xlane.f32.xlu0 %v1533_v13 }
 0x875   :  { %v1535_v22 = vpop.xlane.xlu0 %1534 }
 0x876   :  { %v1543_v23 = vadd.f32 %v1603_v21, %v1535_v22 }
 0x878   :  { %1545 = vst.msk [vmem:[%s3131_s4] sm:$0xff] %vm25_vm0, %v1543_v23 }

</bundles_post_ra>
